<compile_context>
chip_gen: v5e
topology: v5e:2x2
jax: 0.10.0
libtpu: 0.0.40
codegen_flags: <defaults>
</compile_context>

<pallas_src>
import functools

import jax
import jax.numpy as jnp
from jax.experimental import pallas as pl
from jax.experimental.pallas import tpu as pltpu


# ---------------------------------------------------------------------------
# Fused Pallas kernel: [norm-folded conv3x3 + ReLU] -> [conv3x3 + ReLU] -> 1x1
# ---------------------------------------------------------------------------
def _fused_field_kernel(x_ref, w1_ref, b1_ref, w2_ref, b2_ref, wh_ref, bh_ref,
                        out_ref, h1_ref, *, H, W, cin_pad, hidden,
                        compute_dtype):
    """One batch image per grid step.

    x_ref   : (1, H+2, W+2, cin_pad) raw image, spatially padded with pixel_mean
                                     (normalization is folded into w1/b1)
    w1_ref  : (9, cin_pad, hidden)   folded conv1 weights, one (K, N) slab per tap
    b1_ref  : (1, hidden)            folded conv1 bias
    w2_ref  : (9, hidden, hidden)    conv2 weights per tap
    b2_ref  : (1, hidden)
    wh_ref  : (hidden, 1)            1x1 head weights (fused epilogue)
    bh_ref  : (1, 1)
    out_ref : (1, H*W, 1)
    h1_ref  : (H+2, W+2, hidden)     VMEM scratch: conv1 activation + zero halo
    """
    x = x_ref[0].astype(compute_dtype)                      # (H+2, W+2, cin_pad)

    # ---- conv1 (3x3, pad=1), normalization folded into weights/bias --------
    acc1 = jnp.zeros((H * W, hidden), jnp.float32)
    for dh in range(3):
        for dw in range(3):
            patch = x[dh:dh + H, dw:dw + W, :].reshape(H * W, cin_pad)
            w_tap = w1_ref[dh * 3 + dw].astype(compute_dtype)
            acc1 = acc1 + jnp.dot(patch, w_tap,
                                  preferred_element_type=jnp.float32)
    h1 = jnp.maximum(acc1 + b1_ref[...], 0.0)               # (H*W, hidden) f32

    # Stage conv1 output in VMEM with a zero halo: conv2 never touches HBM.
    h1_ref[...] = jnp.zeros_like(h1_ref)
    h1_ref[1:H + 1, 1:W + 1, :] = h1.reshape(H, W, hidden)

    # ---- conv2 (3x3, pad=1) + ReLU ------------------------------------------
    acc2 = jnp.zeros((H * W, hidden), jnp.float32)
    for dh in range(3):
        for dw in range(3):
            patch = h1_ref[dh:dh + H, dw:dw + W, :]
            patch = patch.reshape(H * W, hidden).astype(compute_dtype)
            w_tap = w2_ref[dh * 3 + dw].astype(compute_dtype)
            acc2 = acc2 + jnp.dot(patch, w_tap,
                                  preferred_element_type=jnp.float32)
    h2 = jnp.maximum(acc2 + b2_ref[...], 0.0)               # (H*W, hidden) f32

    # ---- 1x1 conv head, fused into the epilogue -----------------------------
    out = jnp.dot(h2.astype(compute_dtype),
                  wh_ref[...].astype(compute_dtype),
                  preferred_element_type=jnp.float32) + bh_ref[...]
    out_ref[...] = out[None].astype(out_ref.dtype)          # (1, H*W, 1)


def fused_field_forward(xpad, w1f, b1f, w2, b2, w_head, b_head, *,
                        H, W, compute_dtype=jnp.float32):
    """xpad: (B, H+2, W+2, cin_pad) raw image padded with pixel_mean."""
    B, Hp, Wp, cin_pad = xpad.shape
    hidden = w1f.shape[-1]
    assert Hp == H + 2 and Wp == W + 2
    HW = H * W

    flops = 2 * B * HW * (9 * cin_pad * hidden + 9 * hidden * hidden + hidden)
    bytes_accessed = 4 * (xpad.size + w1f.size + b1f.size + w2.size + b2.size
                          + w_head.size + b_head.size + B * HW)

    # VMEM budget: double-buffered input/output tiles + resident weights +
    # haloed h1 scratch + headroom for compiler temporaries.  Clamped so it is
    # safe on every generation (v5e/v6e 128 MiB, v7x 64 MiB physical).
    vmem_bytes = 4 * (2 * Hp * Wp * cin_pad
                      + 9 * cin_pad * hidden + 9 * hidden * hidden
                      + 3 * hidden + 1
                      + 2 * HW
                      + Hp * Wp * hidden
                      + 8 * HW * hidden)
    vmem_bytes = int(min(max(2 * vmem_bytes, 8 * 1024 * 1024),
                         32 * 1024 * 1024))

    kernel = functools.partial(_fused_field_kernel, H=H, W=W,
                               cin_pad=cin_pad, hidden=hidden,
                               compute_dtype=compute_dtype)

    return pl.pallas_call(
        kernel,
        out_shape=jax.ShapeDtypeStruct((B, HW, 1), jnp.float32),
        grid=(B,),
        in_specs=[
            pl.BlockSpec((1, Hp, Wp, cin_pad), lambda b: (b, 0, 0, 0)),
            pl.BlockSpec((9, cin_pad, hidden), lambda b: (0, 0, 0)),
            pl.BlockSpec((1, hidden), lambda b: (0, 0)),
            pl.BlockSpec((9, hidden, hidden), lambda b: (0, 0, 0)),
            pl.BlockSpec((1, hidden), lambda b: (0, 0)),
            pl.BlockSpec((hidden, 1), lambda b: (0, 0)),
            pl.BlockSpec((1, 1), lambda b: (0, 0)),
        ],
        out_specs=pl.BlockSpec((1, HW, 1), lambda b: (b, 0, 0)),
        scratch_shapes=[pltpu.VMEM((Hp, Wp, hidden), jnp.float32)],
        compiler_params=pltpu.CompilerParams(
            dimension_semantics=("parallel",),
            vmem_limit_bytes=vmem_bytes),
        cost_estimate=pl.CostEstimate(flops=flops, transcendentals=0,
                                      bytes_accessed=bytes_accessed),
    )(xpad, w1f, b1f, w2, b2, w_head, b_head)


# ---------------------------------------------------------------------------
# FieldGenerator wrapper (eval-mode forward path)
# ---------------------------------------------------------------------------
class FieldGeneratorPallas:
    """Synthetic FieldGenerator: normalize -> backbone -> head, fully fused.

    backbone: Conv3x3(C_in -> hidden) + ReLU, Conv3x3(hidden -> hidden) + ReLU
    head    : Conv1x1(hidden -> 1)   (ignores `targets` at inference, like the
              reference when conditions is None)
    """

    def __init__(self, *, in_channels=3, hidden=128, pixel_mean=0.5,
                 pixel_std=0.25, resize_size=None, output_dir="",
                 compute_dtype=jnp.float32):
        self.pixel_mean = float(pixel_mean)
        self.pixel_std = float(pixel_std)
        self.resize_size = resize_size      # None -> no bicubic resize branch
        self.output_dir = output_dir
        self.hidden = hidden
        self.in_channels = in_channels
        # Per-tap K padded to a sublane multiple (3 -> 8): better B-operand
        # layout at negligible cost (extra weight rows are zero).
        self.cin_pad = max(8, -(-in_channels // 8) * 8)
        # compute_dtype=jnp.bfloat16 is supported for the MXU inputs on
        # v6e/v7x (accumulation stays f32); default is f32 for exactness.
        self.compute_dtype = compute_dtype

        key = jax.random.PRNGKey(42)
        k1, k2, k3 = jax.random.split(key, 3)
        w1 = jax.random.normal(k1, (9, in_channels, hidden), jnp.float32) * 0.1
        self.w1 = jnp.pad(w1, ((0, 0), (0, self.cin_pad - in_channels), (0, 0)))
        self.b1 = jnp.zeros((hidden,), jnp.float32)
        self.w2 = jax.random.normal(k2, (9, hidden, hidden), jnp.float32) * 0.02
        self.b2 = jnp.zeros((hidden,), jnp.float32)
        self.w_head = jax.random.normal(k3, (hidden, 1), jnp.float32) * 0.1
        self.b_head = jnp.zeros((1,), jnp.float32)

        # Fold (x - mean)/std into conv1:
        #   conv((x - m)/s, w) + b == conv(x_padded_with_m, w/s)
        #                              + (b - (m/s) * sum_over_taps_and_cin(w))
        # Exact everywhere (including borders) because the raw image is padded
        # with pixel_mean, which normalizes to the reference's zero padding.
        self.w1_folded = self.w1 / self.pixel_std
        self.b1_folded = self.b1 - (self.pixel_mean / self.pixel_std) * \
            jnp.sum(self.w1, axis=(0, 1))

        # TODO(synk): nn.functional.interpolate(mode='bicubic',
        # align_corners=True) has no clean Pallas equivalent; only the
        # resize_size=None path is implemented.  save_img / event storage /
        # losses are training-time I/O and are out of scope for the kernel.

    def preprocess_image(self, images_nchw):
        """NCHW -> padded NHWC.  The per-pixel normalization itself is folded
        into conv1's weights, so no separate normalize pass runs."""
        B, C, H, W = images_nchw.shape
        x = jnp.transpose(images_nchw, (0, 2, 3, 1)).astype(jnp.float32)
        xpad = jnp.pad(x, ((0, 0), (1, 1), (1, 1), (0, self.cin_pad - C)),
                       constant_values=self.pixel_mean)
        return xpad

    def inference(self, xpad, targets=None, conditions=None):
        """backbone (2x conv3x3+ReLU) and head (1x1 conv) as ONE fused Pallas
        kernel per image; `targets`/`conditions` are ignored at inference."""
        B, Hp, Wp, _ = xpad.shape
        H, W = Hp - 2, Wp - 2
        out = fused_field_forward(
            xpad,
            self.w1_folded, self.b1_folded.reshape(1, -1),
            self.w2, self.b2.reshape(1, -1),
            self.w_head, self.b_head.reshape(1, 1),
            H=H, W=W, compute_dtype=self.compute_dtype)
        return out.reshape(B, H, W, 1), None

    def forward(self, images_nchw):
        """Eval-mode forward: returns per-sample field prediction, NCHW."""
        xpad = self.preprocess_image(images_nchw)
        results, _ = self.inference(xpad, targets=None)
        # resize_size is None -> sample.pred = result (no bicubic upsample)
        return jnp.transpose(results, (0, 3, 1, 2))         # NHWC -> NCHW

    __call__ = forward


# ---------------------------------------------------------------------------
# Pure-JAX reference (un-fused, un-folded) for a correctness check
# ---------------------------------------------------------------------------
def _reference_forward(images_nchw, model):
    cin = images_nchw.shape[1]
    x = jnp.transpose(images_nchw, (0, 2, 3, 1)).astype(jnp.float32)
    xn = (x - model.pixel_mean) / model.pixel_std

    def conv3x3(z, w, b):                       # w: (9, Cin, Cout)
        B, H, W, _ = z.shape
        zp = jnp.pad(z, ((0, 0), (1, 1), (1, 1), (0, 0)))
        acc = jnp.zeros((B, H, W, w.shape[-1]), jnp.float32)
        for dh in range(3):
            for dw in range(3):
                acc = acc + jnp.einsum(
                    'bhwc,cd->bhwd', zp[:, dh:dh + H, dw:dw + W, :],
                    w[dh * 3 + dw], precision=jax.lax.Precision.HIGHEST)
        return acc + b

    h1 = jnp.maximum(conv3x3(xn, model.w1[:, :cin, :], model.b1), 0.0)
    h2 = jnp.maximum(conv3x3(h1, model.w2, model.b2), 0.0)
    out = jnp.einsum('bhwc,cd->bhwd', h2, model.w_head,
                     precision=jax.lax.Precision.HIGHEST) + model.b_head
    return jnp.transpose(out, (0, 3, 1, 2))


# ---------------------------------------------------------------------------
if __name__ == "__main__":
    key = jax.random.PRNGKey(0)
    # samples: batch=2 RGB images, 16x16 (PyTorch NCHW convention)
    images = jax.random.uniform(key, (2, 3, 16, 16), dtype=jnp.float32)

    model = FieldGeneratorPallas(in_channels=3, hidden=128,
                                 pixel_mean=0.5, pixel_std=0.25,
                                 resize_size=None, output_dir="")
    preds = jax.block_until_ready(model(images))
    assert preds.shape == (2, 1, 16, 16), preds.shape
    assert preds.dtype == jnp.float32

    ref = jax.block_until_ready(_reference_forward(images, model))
    max_err = float(jnp.max(jnp.abs(preds - ref)))
    assert jnp.allclose(preds, ref, atol=3e-2, rtol=3e-2), max_err

    print("KERNEL_OK")
</pallas_src>

<mosaic_0001>
module attributes {stable_mosaic.version = 11 : i64} {
  func.func @_fused_field_kernel(%arg0: i32, %arg1: memref<1x18x18x8xf32, #tpu.memory_space<vmem>>, %arg2: memref<9x8x128xf32, #tpu.memory_space<vmem>>, %arg3: memref<1x128xf32, #tpu.memory_space<vmem>>, %arg4: memref<9x128x128xf32, #tpu.memory_space<vmem>>, %arg5: memref<1x128xf32, #tpu.memory_space<vmem>>, %arg6: memref<128x1xf32, #tpu.memory_space<vmem>>, %arg7: memref<1x1xf32, #tpu.memory_space<vmem>>, %arg8: memref<1x256x1xf32, #tpu.memory_space<vmem>>, %arg9: memref<18x18x128xf32, #tpu.memory_space<vmem>>) attributes {dimension_semantics = [#tpu.dimension_semantics<parallel>], iteration_bounds = array<i64: 2>, scalar_prefetch = 0 : i64, scratch_operands = 1 : i64, tpu.core_type = #tpu.core_type<tc>, window_params = [{transform_indices = @transform_0, window_bounds = array<i64: 1, 18, 18, 8>}, {pipeline_mode = #tpu.pipeline_mode<synchronous>, transform_indices = @transform_1, window_bounds = array<i64: 9, 8, 128>}, {pipeline_mode = #tpu.pipeline_mode<synchronous>, transform_indices = @transform_2, window_bounds = array<i64: 1, 128>}, {pipeline_mode = #tpu.pipeline_mode<synchronous>, transform_indices = @transform_3, window_bounds = array<i64: 9, 128, 128>}, {pipeline_mode = #tpu.pipeline_mode<synchronous>, transform_indices = @transform_4, window_bounds = array<i64: 1, 128>}, {pipeline_mode = #tpu.pipeline_mode<synchronous>, transform_indices = @transform_5, window_bounds = array<i64: 128, 1>}, {pipeline_mode = #tpu.pipeline_mode<synchronous>, transform_indices = @transform_6, window_bounds = array<i64: 1, 1>}, {transform_indices = @transform_7, window_bounds = array<i64: 1, 256, 1>}]} {
    %c0 = arith.constant 0 : index
    %c0_0 = arith.constant 0 : index
    %c0_1 = arith.constant 0 : index
    %c0_2 = arith.constant 0 : index
    %0 = vector.load %arg1[%c0, %c0_0, %c0_1, %c0_2] : memref<1x18x18x8xf32, #tpu.memory_space<vmem>>, vector<1x18x18x8xf32>
    %1 = vector.shape_cast %0 : vector<1x18x18x8xf32> to vector<18x18x8xf32>
    %cst = arith.constant 0.000000e+00 : f32
    %2 = vector.broadcast %cst : f32 to vector<256x128xf32>
    %3 = vector.extract_strided_slice %1 {offsets = [0, 0, 0], sizes = [16, 16, 8], strides = [1, 1, 1]} : vector<18x18x8xf32> to vector<16x16x8xf32>
    %4 = vector.shape_cast %3 : vector<16x16x8xf32> to vector<256x8xf32>
    %c0_3 = arith.constant 0 : index
    %c0_4 = arith.constant 0 : index
    %c0_5 = arith.constant 0 : index
    %5 = vector.load %arg2[%c0_3, %c0_4, %c0_5] : memref<9x8x128xf32, #tpu.memory_space<vmem>>, vector<1x8x128xf32>
    %6 = vector.shape_cast %5 : vector<1x8x128xf32> to vector<8x128xf32>
    %cst_6 = arith.constant dense<0.000000e+00> : vector<256x128xf32>
    %7 = tpu.matmul %4, %6, %cst_6 {dimension_numbers = #tpu.dot_dimension_numbers<[1], [0], [0], [1], [0, 0, 1, 1], [], []>} : vector<256x8xf32>, vector<8x128xf32>, vector<256x128xf32> -> vector<256x128xf32>
    %8 = arith.addf %2, %7 : vector<256x128xf32>
    %9 = vector.extract_strided_slice %1 {offsets = [0, 1, 0], sizes = [16, 16, 8], strides = [1, 1, 1]} : vector<18x18x8xf32> to vector<16x16x8xf32>
    %10 = vector.shape_cast %9 : vector<16x16x8xf32> to vector<256x8xf32>
    %c1 = arith.constant 1 : index
    %c0_7 = arith.constant 0 : index
    %c0_8 = arith.constant 0 : index
    %11 = vector.load %arg2[%c1, %c0_7, %c0_8] : memref<9x8x128xf32, #tpu.memory_space<vmem>>, vector<1x8x128xf32>
    %12 = vector.shape_cast %11 : vector<1x8x128xf32> to vector<8x128xf32>
    %cst_9 = arith.constant dense<0.000000e+00> : vector<256x128xf32>
    %13 = tpu.matmul %10, %12, %cst_9 {dimension_numbers = #tpu.dot_dimension_numbers<[1], [0], [0], [1], [0, 0, 1, 1], [], []>} : vector<256x8xf32>, vector<8x128xf32>, vector<256x128xf32> -> vector<256x128xf32>
    %14 = arith.addf %8, %13 : vector<256x128xf32>
    %15 = vector.extract_strided_slice %1 {offsets = [0, 2, 0], sizes = [16, 16, 8], strides = [1, 1, 1]} : vector<18x18x8xf32> to vector<16x16x8xf32>
    %16 = vector.shape_cast %15 : vector<16x16x8xf32> to vector<256x8xf32>
    %c2 = arith.constant 2 : index
    %c0_10 = arith.constant 0 : index
    %c0_11 = arith.constant 0 : index
    %17 = vector.load %arg2[%c2, %c0_10, %c0_11] : memref<9x8x128xf32, #tpu.memory_space<vmem>>, vector<1x8x128xf32>
    %18 = vector.shape_cast %17 : vector<1x8x128xf32> to vector<8x128xf32>
    %cst_12 = arith.constant dense<0.000000e+00> : vector<256x128xf32>
    %19 = tpu.matmul %16, %18, %cst_12 {dimension_numbers = #tpu.dot_dimension_numbers<[1], [0], [0], [1], [0, 0, 1, 1], [], []>} : vector<256x8xf32>, vector<8x128xf32>, vector<256x128xf32> -> vector<256x128xf32>
    %20 = arith.addf %14, %19 : vector<256x128xf32>
    %21 = vector.extract_strided_slice %1 {offsets = [1, 0, 0], sizes = [16, 16, 8], strides = [1, 1, 1]} : vector<18x18x8xf32> to vector<16x16x8xf32>
    %22 = vector.shape_cast %21 : vector<16x16x8xf32> to vector<256x8xf32>
    %c3 = arith.constant 3 : index
    %c0_13 = arith.constant 0 : index
    %c0_14 = arith.constant 0 : index
    %23 = vector.load %arg2[%c3, %c0_13, %c0_14] : memref<9x8x128xf32, #tpu.memory_space<vmem>>, vector<1x8x128xf32>
    %24 = vector.shape_cast %23 : vector<1x8x128xf32> to vector<8x128xf32>
    %cst_15 = arith.constant dense<0.000000e+00> : vector<256x128xf32>
    %25 = tpu.matmul %22, %24, %cst_15 {dimension_numbers = #tpu.dot_dimension_numbers<[1], [0], [0], [1], [0, 0, 1, 1], [], []>} : vector<256x8xf32>, vector<8x128xf32>, vector<256x128xf32> -> vector<256x128xf32>
    %26 = arith.addf %20, %25 : vector<256x128xf32>
    %27 = vector.extract_strided_slice %1 {offsets = [1, 1, 0], sizes = [16, 16, 8], strides = [1, 1, 1]} : vector<18x18x8xf32> to vector<16x16x8xf32>
    %28 = vector.shape_cast %27 : vector<16x16x8xf32> to vector<256x8xf32>
    %c4 = arith.constant 4 : index
    %c0_16 = arith.constant 0 : index
    %c0_17 = arith.constant 0 : index
    %29 = vector.load %arg2[%c4, %c0_16, %c0_17] : memref<9x8x128xf32, #tpu.memory_space<vmem>>, vector<1x8x128xf32>
    %30 = vector.shape_cast %29 : vector<1x8x128xf32> to vector<8x128xf32>
    %cst_18 = arith.constant dense<0.000000e+00> : vector<256x128xf32>
    %31 = tpu.matmul %28, %30, %cst_18 {dimension_numbers = #tpu.dot_dimension_numbers<[1], [0], [0], [1], [0, 0, 1, 1], [], []>} : vector<256x8xf32>, vector<8x128xf32>, vector<256x128xf32> -> vector<256x128xf32>
    %32 = arith.addf %26, %31 : vector<256x128xf32>
    %33 = vector.extract_strided_slice %1 {offsets = [1, 2, 0], sizes = [16, 16, 8], strides = [1, 1, 1]} : vector<18x18x8xf32> to vector<16x16x8xf32>
    %34 = vector.shape_cast %33 : vector<16x16x8xf32> to vector<256x8xf32>
    %c5 = arith.constant 5 : index
    %c0_19 = arith.constant 0 : index
    %c0_20 = arith.constant 0 : index
    %35 = vector.load %arg2[%c5, %c0_19, %c0_20] : memref<9x8x128xf32, #tpu.memory_space<vmem>>, vector<1x8x128xf32>
    %36 = vector.shape_cast %35 : vector<1x8x128xf32> to vector<8x128xf32>
    %cst_21 = arith.constant dense<0.000000e+00> : vector<256x128xf32>
    %37 = tpu.matmul %34, %36, %cst_21 {dimension_numbers = #tpu.dot_dimension_numbers<[1], [0], [0], [1], [0, 0, 1, 1], [], []>} : vector<256x8xf32>, vector<8x128xf32>, vector<256x128xf32> -> vector<256x128xf32>
    %38 = arith.addf %32, %37 : vector<256x128xf32>
    %39 = vector.extract_strided_slice %1 {offsets = [2, 0, 0], sizes = [16, 16, 8], strides = [1, 1, 1]} : vector<18x18x8xf32> to vector<16x16x8xf32>
    %40 = vector.shape_cast %39 : vector<16x16x8xf32> to vector<256x8xf32>
    %c6 = arith.constant 6 : index
    %c0_22 = arith.constant 0 : index
    %c0_23 = arith.constant 0 : index
    %41 = vector.load %arg2[%c6, %c0_22, %c0_23] : memref<9x8x128xf32, #tpu.memory_space<vmem>>, vector<1x8x128xf32>
    %42 = vector.shape_cast %41 : vector<1x8x128xf32> to vector<8x128xf32>
    %cst_24 = arith.constant dense<0.000000e+00> : vector<256x128xf32>
    %43 = tpu.matmul %40, %42, %cst_24 {dimension_numbers = #tpu.dot_dimension_numbers<[1], [0], [0], [1], [0, 0, 1, 1], [], []>} : vector<256x8xf32>, vector<8x128xf32>, vector<256x128xf32> -> vector<256x128xf32>
    %44 = arith.addf %38, %43 : vector<256x128xf32>
    %45 = vector.extract_strided_slice %1 {offsets = [2, 1, 0], sizes = [16, 16, 8], strides = [1, 1, 1]} : vector<18x18x8xf32> to vector<16x16x8xf32>
    %46 = vector.shape_cast %45 : vector<16x16x8xf32> to vector<256x8xf32>
    %c7 = arith.constant 7 : index
    %c0_25 = arith.constant 0 : index
    %c0_26 = arith.constant 0 : index
    %47 = vector.load %arg2[%c7, %c0_25, %c0_26] : memref<9x8x128xf32, #tpu.memory_space<vmem>>, vector<1x8x128xf32>
    %48 = vector.shape_cast %47 : vector<1x8x128xf32> to vector<8x128xf32>
    %cst_27 = arith.constant dense<0.000000e+00> : vector<256x128xf32>
    %49 = tpu.matmul %46, %48, %cst_27 {dimension_numbers = #tpu.dot_dimension_numbers<[1], [0], [0], [1], [0, 0, 1, 1], [], []>} : vector<256x8xf32>, vector<8x128xf32>, vector<256x128xf32> -> vector<256x128xf32>
    %50 = arith.addf %44, %49 : vector<256x128xf32>
    %51 = vector.extract_strided_slice %1 {offsets = [2, 2, 0], sizes = [16, 16, 8], strides = [1, 1, 1]} : vector<18x18x8xf32> to vector<16x16x8xf32>
    %52 = vector.shape_cast %51 : vector<16x16x8xf32> to vector<256x8xf32>
    %c8 = arith.constant 8 : index
    %c0_28 = arith.constant 0 : index
    %c0_29 = arith.constant 0 : index
    %53 = vector.load %arg2[%c8, %c0_28, %c0_29] : memref<9x8x128xf32, #tpu.memory_space<vmem>>, vector<1x8x128xf32>
    %54 = vector.shape_cast %53 : vector<1x8x128xf32> to vector<8x128xf32>
    %cst_30 = arith.constant dense<0.000000e+00> : vector<256x128xf32>
    %55 = tpu.matmul %52, %54, %cst_30 {dimension_numbers = #tpu.dot_dimension_numbers<[1], [0], [0], [1], [0, 0, 1, 1], [], []>} : vector<256x8xf32>, vector<8x128xf32>, vector<256x128xf32> -> vector<256x128xf32>
    %56 = arith.addf %50, %55 : vector<256x128xf32>
    %c0_31 = arith.constant 0 : index
    %c0_32 = arith.constant 0 : index
    %57 = vector.load %arg3[%c0_31, %c0_32] : memref<1x128xf32, #tpu.memory_space<vmem>>, vector<1x128xf32>
    %58 = vector.broadcast %57 : vector<1x128xf32> to vector<256x128xf32>
    %59 = arith.addf %56, %58 : vector<256x128xf32>
    %cst_33 = arith.constant 0.000000e+00 : f32
    %60 = vector.broadcast %cst_33 : f32 to vector<256x128xf32>
    %61 = arith.maximumf %59, %60 : vector<256x128xf32>
    %cst_34 = arith.constant 0.000000e+00 : f32
    %62 = vector.broadcast %cst_34 : f32 to vector<18x18x128xf32>
    %c0_35 = arith.constant 0 : index
    %c0_36 = arith.constant 0 : index
    %c0_37 = arith.constant 0 : index
    %63 = vector.load %arg9[%c0_35, %c0_36, %c0_37] : memref<18x18x128xf32, #tpu.memory_space<vmem>>, vector<18x18x128xf32>
    tpu.vector_store %arg9[%c0_35, %c0_36, %c0_37], %62 {strides = array<i32>} : memref<18x18x128xf32, #tpu.memory_space<vmem>>, vector<18x18x128xf32>,
    %64 = vector.shape_cast %61 : vector<256x128xf32> to vector<16x16x128xf32>
    %c1_38 = arith.constant 1 : index
    %c1_39 = arith.constant 1 : index
    %c0_40 = arith.constant 0 : index
    %65 = vector.load %arg9[%c1_38, %c1_39, %c0_40] : memref<18x18x128xf32, #tpu.memory_space<vmem>>, vector<16x16x128xf32>
    tpu.vector_store %arg9[%c1_38, %c1_39, %c0_40], %64 {strides = array<i32>} : memref<18x18x128xf32, #tpu.memory_space<vmem>>, vector<16x16x128xf32>,
    %cst_41 = arith.constant 0.000000e+00 : f32
    %66 = vector.broadcast %cst_41 : f32 to vector<256x128xf32>
    %c0_42 = arith.constant 0 : index
    %c0_43 = arith.constant 0 : index
    %c0_44 = arith.constant 0 : index
    %67 = vector.load %arg9[%c0_42, %c0_43, %c0_44] : memref<18x18x128xf32, #tpu.memory_space<vmem>>, vector<16x16x128xf32>
    %68 = vector.shape_cast %67 : vector<16x16x128xf32> to vector<256x128xf32>
    %c0_45 = arith.constant 0 : index
    %c0_46 = arith.constant 0 : index
    %c0_47 = arith.constant 0 : index
    %69 = vector.load %arg4[%c0_45, %c0_46, %c0_47] : memref<9x128x128xf32, #tpu.memory_space<vmem>>, vector<1x128x128xf32>
    %70 = vector.shape_cast %69 : vector<1x128x128xf32> to vector<128x128xf32>
    %cst_48 = arith.constant dense<0.000000e+00> : vector<256x128xf32>
    %71 = tpu.matmul %68, %70, %cst_48 {dimension_numbers = #tpu.dot_dimension_numbers<[1], [0], [0], [1], [0, 0, 1, 1], [], []>} : vector<256x128xf32>, vector<128x128xf32>, vector<256x128xf32> -> vector<256x128xf32>
    %72 = arith.addf %66, %71 : vector<256x128xf32>
    %c0_49 = arith.constant 0 : index
    %c1_50 = arith.constant 1 : index
    %c0_51 = arith.constant 0 : index
    %73 = vector.load %arg9[%c0_49, %c1_50, %c0_51] : memref<18x18x128xf32, #tpu.memory_space<vmem>>, vector<16x16x128xf32>
    %74 = vector.shape_cast %73 : vector<16x16x128xf32> to vector<256x128xf32>
    %c1_52 = arith.constant 1 : index
    %c0_53 = arith.constant 0 : index
    %c0_54 = arith.constant 0 : index
    %75 = vector.load %arg4[%c1_52, %c0_53, %c0_54] : memref<9x128x128xf32, #tpu.memory_space<vmem>>, vector<1x128x128xf32>
    %76 = vector.shape_cast %75 : vector<1x128x128xf32> to vector<128x128xf32>
    %cst_55 = arith.constant dense<0.000000e+00> : vector<256x128xf32>
    %77 = tpu.matmul %74, %76, %cst_55 {dimension_numbers = #tpu.dot_dimension_numbers<[1], [0], [0], [1], [0, 0, 1, 1], [], []>} : vector<256x128xf32>, vector<128x128xf32>, vector<256x128xf32> -> vector<256x128xf32>
    %78 = arith.addf %72, %77 : vector<256x128xf32>
    %c0_56 = arith.constant 0 : index
    %c2_57 = arith.constant 2 : index
    %c0_58 = arith.constant 0 : index
    %79 = vector.load %arg9[%c0_56, %c2_57, %c0_58] : memref<18x18x128xf32, #tpu.memory_space<vmem>>, vector<16x16x128xf32>
    %80 = vector.shape_cast %79 : vector<16x16x128xf32> to vector<256x128xf32>
    %c2_59 = arith.constant 2 : index
    %c0_60 = arith.constant 0 : index
    %c0_61 = arith.constant 0 : index
    %81 = vector.load %arg4[%c2_59, %c0_60, %c0_61] : memref<9x128x128xf32, #tpu.memory_space<vmem>>, vector<1x128x128xf32>
    %82 = vector.shape_cast %81 : vector<1x128x128xf32> to vector<128x128xf32>
    %cst_62 = arith.constant dense<0.000000e+00> : vector<256x128xf32>
    %83 = tpu.matmul %80, %82, %cst_62 {dimension_numbers = #tpu.dot_dimension_numbers<[1], [0], [0], [1], [0, 0, 1, 1], [], []>} : vector<256x128xf32>, vector<128x128xf32>, vector<256x128xf32> -> vector<256x128xf32>
    %84 = arith.addf %78, %83 : vector<256x128xf32>
    %c1_63 = arith.constant 1 : index
    %c0_64 = arith.constant 0 : index
    %c0_65 = arith.constant 0 : index
    %85 = vector.load %arg9[%c1_63, %c0_64, %c0_65] : memref<18x18x128xf32, #tpu.memory_space<vmem>>, vector<16x16x128xf32>
    %86 = vector.shape_cast %85 : vector<16x16x128xf32> to vector<256x128xf32>
    %c3_66 = arith.constant 3 : index
    %c0_67 = arith.constant 0 : index
    %c0_68 = arith.constant 0 : index
    %87 = vector.load %arg4[%c3_66, %c0_67, %c0_68] : memref<9x128x128xf32, #tpu.memory_space<vmem>>, vector<1x128x128xf32>
    %88 = vector.shape_cast %87 : vector<1x128x128xf32> to vector<128x128xf32>
    %cst_69 = arith.constant dense<0.000000e+00> : vector<256x128xf32>
    %89 = tpu.matmul %86, %88, %cst_69 {dimension_numbers = #tpu.dot_dimension_numbers<[1], [0], [0], [1], [0, 0, 1, 1], [], []>} : vector<256x128xf32>, vector<128x128xf32>, vector<256x128xf32> -> vector<256x128xf32>
    %90 = arith.addf %84, %89 : vector<256x128xf32>
    %c1_70 = arith.constant 1 : index
    %c1_71 = arith.constant 1 : index
    %c0_72 = arith.constant 0 : index
    %91 = vector.load %arg9[%c1_70, %c1_71, %c0_72] : memref<18x18x128xf32, #tpu.memory_space<vmem>>, vector<16x16x128xf32>
    %92 = vector.shape_cast %91 : vector<16x16x128xf32> to vector<256x128xf32>
    %c4_73 = arith.constant 4 : index
    %c0_74 = arith.constant 0 : index
    %c0_75 = arith.constant 0 : index
    %93 = vector.load %arg4[%c4_73, %c0_74, %c0_75] : memref<9x128x128xf32, #tpu.memory_space<vmem>>, vector<1x128x128xf32>
    %94 = vector.shape_cast %93 : vector<1x128x128xf32> to vector<128x128xf32>
    %cst_76 = arith.constant dense<0.000000e+00> : vector<256x128xf32>
    %95 = tpu.matmul %92, %94, %cst_76 {dimension_numbers = #tpu.dot_dimension_numbers<[1], [0], [0], [1], [0, 0, 1, 1], [], []>} : vector<256x128xf32>, vector<128x128xf32>, vector<256x128xf32> -> vector<256x128xf32>
    %96 = arith.addf %90, %95 : vector<256x128xf32>
    %c1_77 = arith.constant 1 : index
    %c2_78 = arith.constant 2 : index
    %c0_79 = arith.constant 0 : index
    %97 = vector.load %arg9[%c1_77, %c2_78, %c0_79] : memref<18x18x128xf32, #tpu.memory_space<vmem>>, vector<16x16x128xf32>
    %98 = vector.shape_cast %97 : vector<16x16x128xf32> to vector<256x128xf32>
    %c5_80 = arith.constant 5 : index
    %c0_81 = arith.constant 0 : index
    %c0_82 = arith.constant 0 : index
    %99 = vector.load %arg4[%c5_80, %c0_81, %c0_82] : memref<9x128x128xf32, #tpu.memory_space<vmem>>, vector<1x128x128xf32>
    %100 = vector.shape_cast %99 : vector<1x128x128xf32> to vector<128x128xf32>
    %cst_83 = arith.constant dense<0.000000e+00> : vector<256x128xf32>
    %101 = tpu.matmul %98, %100, %cst_83 {dimension_numbers = #tpu.dot_dimension_numbers<[1], [0], [0], [1], [0, 0, 1, 1], [], []>} : vector<256x128xf32>, vector<128x128xf32>, vector<256x128xf32> -> vector<256x128xf32>
    %102 = arith.addf %96, %101 : vector<256x128xf32>
    %c2_84 = arith.constant 2 : index
    %c0_85 = arith.constant 0 : index
    %c0_86 = arith.constant 0 : index
    %103 = vector.load %arg9[%c2_84, %c0_85, %c0_86] : memref<18x18x128xf32, #tpu.memory_space<vmem>>, vector<16x16x128xf32>
    %104 = vector.shape_cast %103 : vector<16x16x128xf32> to vector<256x128xf32>
    %c6_87 = arith.constant 6 : index
    %c0_88 = arith.constant 0 : index
    %c0_89 = arith.constant 0 : index
    %105 = vector.load %arg4[%c6_87, %c0_88, %c0_89] : memref<9x128x128xf32, #tpu.memory_space<vmem>>, vector<1x128x128xf32>
    %106 = vector.shape_cast %105 : vector<1x128x128xf32> to vector<128x128xf32>
    %cst_90 = arith.constant dense<0.000000e+00> : vector<256x128xf32>
    %107 = tpu.matmul %104, %106, %cst_90 {dimension_numbers = #tpu.dot_dimension_numbers<[1], [0], [0], [1], [0, 0, 1, 1], [], []>} : vector<256x128xf32>, vector<128x128xf32>, vector<256x128xf32> -> vector<256x128xf32>
    %108 = arith.addf %102, %107 : vector<256x128xf32>
    %c2_91 = arith.constant 2 : index
    %c1_92 = arith.constant 1 : index
    %c0_93 = arith.constant 0 : index
    %109 = vector.load %arg9[%c2_91, %c1_92, %c0_93] : memref<18x18x128xf32, #tpu.memory_space<vmem>>, vector<16x16x128xf32>
    %110 = vector.shape_cast %109 : vector<16x16x128xf32> to vector<256x128xf32>
    %c7_94 = arith.constant 7 : index
    %c0_95 = arith.constant 0 : index
    %c0_96 = arith.constant 0 : index
    %111 = vector.load %arg4[%c7_94, %c0_95, %c0_96] : memref<9x128x128xf32, #tpu.memory_space<vmem>>, vector<1x128x128xf32>
    %112 = vector.shape_cast %111 : vector<1x128x128xf32> to vector<128x128xf32>
    %cst_97 = arith.constant dense<0.000000e+00> : vector<256x128xf32>
    %113 = tpu.matmul %110, %112, %cst_97 {dimension_numbers = #tpu.dot_dimension_numbers<[1], [0], [0], [1], [0, 0, 1, 1], [], []>} : vector<256x128xf32>, vector<128x128xf32>, vector<256x128xf32> -> vector<256x128xf32>
    %114 = arith.addf %108, %113 : vector<256x128xf32>
    %c2_98 = arith.constant 2 : index
    %c2_99 = arith.constant 2 : index
    %c0_100 = arith.constant 0 : index
    %115 = vector.load %arg9[%c2_98, %c2_99, %c0_100] : memref<18x18x128xf32, #tpu.memory_space<vmem>>, vector<16x16x128xf32>
    %116 = vector.shape_cast %115 : vector<16x16x128xf32> to vector<256x128xf32>
    %c8_101 = arith.constant 8 : index
    %c0_102 = arith.constant 0 : index
    %c0_103 = arith.constant 0 : index
    %117 = vector.load %arg4[%c8_101, %c0_102, %c0_103] : memref<9x128x128xf32, #tpu.memory_space<vmem>>, vector<1x128x128xf32>
    %118 = vector.shape_cast %117 : vector<1x128x128xf32> to vector<128x128xf32>
    %cst_104 = arith.constant dense<0.000000e+00> : vector<256x128xf32>
    %119 = tpu.matmul %116, %118, %cst_104 {dimension_numbers = #tpu.dot_dimension_numbers<[1], [0], [0], [1], [0, 0, 1, 1], [], []>} : vector<256x128xf32>, vector<128x128xf32>, vector<256x128xf32> -> vector<256x128xf32>
    %120 = arith.addf %114, %119 : vector<256x128xf32>
    %c0_105 = arith.constant 0 : index
    %c0_106 = arith.constant 0 : index
    %121 = vector.load %arg5[%c0_105, %c0_106] : memref<1x128xf32, #tpu.memory_space<vmem>>, vector<1x128xf32>
    %122 = vector.broadcast %121 : vector<1x128xf32> to vector<256x128xf32>
    %123 = arith.addf %120, %122 : vector<256x128xf32>
    %cst_107 = arith.constant 0.000000e+00 : f32
    %124 = vector.broadcast %cst_107 : f32 to vector<256x128xf32>
    %125 = arith.maximumf %123, %124 : vector<256x128xf32>
    %c0_108 = arith.constant 0 : index
    %c0_109 = arith.constant 0 : index
    %126 = vector.load %arg6[%c0_108, %c0_109] : memref<128x1xf32, #tpu.memory_space<vmem>>, vector<128x1xf32>
    %cst_110 = arith.constant dense<0.000000e+00> : vector<256x1xf32>
    %127 = tpu.matmul %125, %126, %cst_110 {dimension_numbers = #tpu.dot_dimension_numbers<[1], [0], [0], [1], [0, 0, 1, 1], [], []>} : vector<256x128xf32>, vector<128x1xf32>, vector<256x1xf32> -> vector<256x1xf32>
    %c0_111 = arith.constant 0 : index
    %c0_112 = arith.constant 0 : index
    %128 = vector.load %arg7[%c0_111, %c0_112] : memref<1x1xf32, #tpu.memory_space<vmem>>, vector<1x1xf32>
    %129 = vector.broadcast %128 : vector<1x1xf32> to vector<256x1xf32>
    %130 = arith.addf %127, %129 : vector<256x1xf32>
    %131 = vector.shape_cast %130 : vector<256x1xf32> to vector<1x256x1xf32>
    %c0_113 = arith.constant 0 : index
    %c0_114 = arith.constant 0 : index
    %c0_115 = arith.constant 0 : index
    %132 = vector.load %arg8[%c0_113, %c0_114, %c0_115] : memref<1x256x1xf32, #tpu.memory_space<vmem>>, vector<1x256x1xf32>
    tpu.vector_store %arg8[%c0_113, %c0_114, %c0_115], %131 {strides = array<i32>} : memref<1x256x1xf32, #tpu.memory_space<vmem>>, vector<1x256x1xf32>,
    return
  }
  func.func @transform_0(%arg0: i32) -> (i32, i32, i32, i32) {
    %c0_i32 = arith.constant 0 : i32
    %c0_i32_0 = arith.constant 0 : i32
    %c0_i32_1 = arith.constant 0 : i32
    %c0_i32_2 = arith.constant 0 : i32
    return %arg0, %c0_i32, %c0_i32_0, %c0_i32_1 : i32, i32, i32, i32
  }
  func.func @transform_1(%arg0: i32) -> (i32, i32, i32) {
    %c0_i32 = arith.constant 0 : i32
    %c0_i32_0 = arith.constant 0 : i32
    %c0_i32_1 = arith.constant 0 : i32
    %c0_i32_2 = arith.constant 0 : i32
    return %c0_i32, %c0_i32_0, %c0_i32_1 : i32, i32, i32
  }
  func.func @transform_2(%arg0: i32) -> (i32, i32) {
    %c0_i32 = arith.constant 0 : i32
    %c0_i32_0 = arith.constant 0 : i32
    %c0_i32_1 = arith.constant 0 : i32
    return %c0_i32, %c0_i32_0 : i32, i32
  }
  func.func @transform_3(%arg0: i32) -> (i32, i32, i32) {
    %c0_i32 = arith.constant 0 : i32
    %c0_i32_0 = arith.constant 0 : i32
    %c0_i32_1 = arith.constant 0 : i32
    %c0_i32_2 = arith.constant 0 : i32
    return %c0_i32, %c0_i32_0, %c0_i32_1 : i32, i32, i32
  }
  func.func @transform_4(%arg0: i32) -> (i32, i32) {
    %c0_i32 = arith.constant 0 : i32
    %c0_i32_0 = arith.constant 0 : i32
    %c0_i32_1 = arith.constant 0 : i32
    return %c0_i32, %c0_i32_0 : i32, i32
  }
  func.func @transform_5(%arg0: i32) -> (i32, i32) {
    %c0_i32 = arith.constant 0 : i32
    %c0_i32_0 = arith.constant 0 : i32
    %c0_i32_1 = arith.constant 0 : i32
    return %c0_i32, %c0_i32_0 : i32, i32
  }
  func.func @transform_6(%arg0: i32) -> (i32, i32) {
    %c0_i32 = arith.constant 0 : i32
    %c0_i32_0 = arith.constant 0 : i32
    %c0_i32_1 = arith.constant 0 : i32
    return %c0_i32, %c0_i32_0 : i32, i32
  }
  func.func @transform_7(%arg0: i32) -> (i32, i32, i32) {
    %c0_i32 = arith.constant 0 : i32
    %c0_i32_0 = arith.constant 0 : i32
    %c0_i32_1 = arith.constant 0 : i32
    return %arg0, %c0_i32, %c0_i32_0 : i32, i32, i32
  }
}

</mosaic_0001>

<bundles_post_ra>
// kernel: tpu_custom_call.1
= control target key start
LH: loop header
LB: loop body
LE: loop exit
PB: predicated region body
PF: predicated region fallthrough
CT: control target
= control target key end

     0   :  { %s4685_s26 = smov 0   ;;  %s7619_s0 = inlined_call_operand.vmem [shape: f32[2,18,18,8], index: 0, kind: input, shape index: {}]   ;;  %s7620_s1 = inlined_call_operand.vmem [shape: f32[9,8,128], index: 1, kind: input, shape index: {}]   ;;  %s7621_s2 = inlined_call_operand.vmem [shape: f32[1,128], index: 2, kind: input, shape index: {}]   ;;  %s7622_s3 = inlined_call_operand.vmem [shape: f32[9,128,128], index: 3, kind: input, shape index: {}]   ;;  %s7623_s4 = inlined_call_operand.vmem [shape: f32[1,128], index: 4, kind: input, shape index: {}]   ;;  %s7624_s5 = inlined_call_operand.vmem [shape: f32[128,1], index: 5, kind: input, shape index: {}]   ;;  %s7625_s6 = inlined_call_operand.<no memory space> [shape: f32[1,1], index: 6, kind: input, shape index: {}]   ;;  %s7626_s7 = inlined_call_operand.vmem [shape: f32[2,256,1], index: 7, kind: output, shape index: {}]  }
   0x1   :  { %v12_v0 = vstv %s7625_s6 }
   0x2   :  { %13 = vst [vmem:[#allocation3] sm:$0x1] %v12_v0 }
   0x3 LB: > { %s4172_s27 = sadd.s32 4294967295, %s4639_s26   ;;  %p4176_p0 = scmp.ge.s32.totalorder %s4639_s26, 1  ;;  %s4639_s26 = sphi %s4685_s26, %s19_s26  }
   0x4   : > { %p239_p1 = scmp.lt.s32.totalorder %s4639_s26, 3 }
   0x6   : > { %p240_p2 = pnand %p4176_p0, %p239_p1 }
   0x8   : > { %243 = sbr.rel (%p240_p2) target bundleno = 1623 (0x657), region = 48 }
   0xd   : > { %v4180_v1 = vld [vmem:[%s7620_s1 + $0x8] sm:$0xff]  ;;  %p271_p3 = scmp.lt.s32.totalorder %s4172_s27, 1  ;;  %v335_v2 = vld [vmem:[%s7620_s1] sm:$0xff]  ;;  %v4245_v3 = vld [vmem:[%s7620_s1 + $0x10] sm:$0xff]  ;;  %vm384_vm0 = vcmask 1046528   ;;  %vm467_vm1 = vcmask 64512  }
   0xe   : > { %547 = vmatpush.msra.mxu0 %v4180_v1  ;;  %4607 = vmatpush.msra.mxu3 %v4180_v1  ;;  %v4311_v4 = vld [vmem:[%s7620_s1 + $0x20] sm:$0xff]  ;;  %vm822_vm2 = vcmask 1045504   ;;  %vm4084_vm3 = vcmask 7168  }
   0xf   : > { %s7980_s27 = smov (!%p271_p3, %s4172_s27), 1  ;;  %984 = vmatpush.msra.mxu2 %v4245_v3  ;;  %724 = vmatpush.msra.mxu1 %v335_v2 }
  0x10   : > { %4608 = vmatpush.msrb.mxu3 %v335_v2  ;;  %1294 = vmatpush.msrb.mxu0 %v4311_v4  ;;  %s4610_s12 = smul.u32 432, %s7980_s27 }
  0x12   : > { %s4711_s15 = scalar_lea.vmem %s7619_s0, %s4610_s12 }
  0x13   : > { %v281_v5 = vld [vmem:[%s4711_s15] sm:$0xff]  ;;  %v282_v6 = vld [vmem:[%s4711_s15 + $0x8] sm:$0xff]  ;;  %v283_v15 = vld [vmem:[%s4711_s15 + $0x10] sm:$0x3] }
  0x14   : > { %v4716_v7 = vld [vmem:[%s4711_s15 + $0x120] sm:$0xff]  ;;  %v385_v8 = vrot.slane %v281_v5, 1  ;;  %v386_v9 = vrot.slane %v282_v6, 1  ;;  %v4719_v10 = vld [vmem:[%s4711_s15 + $0x128] sm:$0xff]  ;;  %v823_v12 = vrot.slane %v281_v5, 2  ;;  %4213 = vmatmul.msk.f32.vlgmr.msra.gmra.mxu1 %vm467_vm1, %v281_v5  ;;  %v824_v14 = vrot.slane %v282_v6, 2 }
  0x15   : > { %v445_v11 = vrot.slane %v4716_v7, 1  ;;  %v446_v13 = vrot.slane %v4719_v10, 1  ;;  %v4727_v17 = vld [vmem:[%s4711_s15 + $0x130] sm:$0x3]  ;;  %v388_v20 = vrot.slane %v283_v15, 1  ;;  %v826_v22 = vrot.slane %v283_v15, 2 }
  0x16   : > { %v387_v16 = vsel %vm384_vm0, %v385_v8, %v386_v9  ;;  %v825_v19 = vsel %vm822_vm2, %v823_v12, %v824_v14  ;;  %v448_v21 = vrot.slane %v4727_v17, 1  ;;  %v4745_v26 = vld [vmem:[%s4711_s15 + $0x18] sm:$0xff]  ;;  %v4748_v27 = vld [vmem:[%s4711_s15 + $0x20] sm:$0xff]  ;;  %v286_v39 = vld [vmem:[%s4711_s15 + $0x28] sm:$0x3] }
  0x17   : > { %4181 = vmatmul.msk.f32.vlgmr.msra.gmra.mxu0 %vm467_vm1, %v387_v16  ;;  %v4731_v18 = vsel %vm384_vm0, %v445_v11, %v446_v13  ;;  %4246 = vmatmul.msk.f32.vlgmr.msra.gmra.mxu2 %vm467_vm1, %v825_v19  ;;  %v389_v23 = vsel %vm384_vm0, %v386_v9, %v388_v20  ;;  %v827_v25 = vsel %vm822_vm2, %v824_v14, %v826_v22  ;;  %v4751_v28 = vld [vmem:[%s4711_s15 + $0x138] sm:$0xff]  ;;  %v4754_v29 = vld [vmem:[%s4711_s15 + $0x140] sm:$0xff]  ;;  %v390_v30 = vrot.slane %v4745_v26, 1  ;;  %v4779_v40 = vld [vmem:[%s4711_s15 + $0x148] sm:$0x3] }
  0x18   : > { %7712 = vst [vmem:[#allocation4_spill] sm:$0xff] %v4731_v18  ;;  %4205 = vmatmul.msk.f32.vlgmr.msra.gmra.mxu3 %vm467_vm1, %v4731_v18  ;;  %v4741_v24 = vsel %vm384_vm0, %v446_v13, %v448_v21  ;;  %v391_v31 = vrot.slane %v4748_v27, 1  ;;  %v450_v32 = vrot.slane %v4751_v28, 1  ;;  %v451_v33 = vrot.slane %v4754_v29, 1  ;;  %v4800_v47 = vld [vmem:[%s4711_s15 + $0x30] sm:$0xff]  ;;  %v4803_v48 = vld [vmem:[%s4711_s15 + $0x38] sm:$0xff] }
  0x19   : > { %4609 = vmatpush.msra.mxu3 %v4245_v3  ;;  %7713 = vst [vmem:[#allocation5_spill] sm:$0xff] %v4741_v24  ;;  %v828_v34 = vrot.slane %v4745_v26, 2  ;;  %v829_v35 = vrot.slane %v4748_v27, 2  ;;  %v393_v41 = vrot.slane %v286_v39, 1  ;;  %v453_v42 = vrot.slane %v4779_v40, 1  ;;  %v4806_v49 = vld [vmem:[%s4711_s15 + $0x150] sm:$0xff] }
  0x1a   : > { %v4767_v36 = vsel %vm384_vm0, %v390_v30, %v391_v31  ;;  %v4772_v37 = vsel %vm384_vm0, %v450_v32, %v451_v33  ;;  %v831_v43 = vrot.slane %v286_v39, 2  ;;  %v4809_v50 = vld [vmem:[%s4711_s15 + $0x158] sm:$0xff]  ;;  %v395_v51 = vrot.slane %v4800_v47, 1  ;;  %v289_v60 = vld [vmem:[%s4711_s15 + $0x40] sm:$0x3]  ;;  %v4857_v4 = vld [vmem:[%s4711_s15 + $0x48] sm:$0xff] }
  0x1b   : > { %7714 = vst [vmem:[#allocation6_spill] sm:$0xff] %v4772_v37  ;;  %v4775_v38 = vsel %vm822_vm2, %v828_v34, %v829_v35  ;;  %v4789_v44 = vsel %vm384_vm0, %v391_v31, %v393_v41  ;;  %v4794_v45 = vsel %vm384_vm0, %v451_v33, %v453_v42  ;;  %v396_v52 = vrot.slane %v4803_v48, 1  ;;  %v4836_v61 = vld [vmem:[%s4711_s15 + $0x160] sm:$0x3]  ;;  %v4860_v5 = vld [vmem:[%s4711_s15 + $0x50] sm:$0xff] }
  0x1c   : > { %4214 = vmatmul.msk.f32.gmra.mxu1 %vm467_vm1, %v282_v6  ;;  %7715 = vst [vmem:[#allocation7_spill] sm:$0xff] %v4794_v45  ;;  %v4797_v46 = vsel %vm822_vm2, %v829_v35, %v831_v43  ;;  %v455_v53 = vrot.slane %v4806_v49, 1  ;;  %v456_v54 = vrot.slane %v4809_v50, 1  ;;  %v833_v55 = vrot.slane %v4800_v47, 2  ;;  %v4863_v6 = vld [vmem:[%s4711_s15 + $0x168] sm:$0xff]  ;;  %v4866_v8 = vld [vmem:[%s4711_s15 + $0x170] sm:$0xff] }
  0x1d   : > { %v834_v56 = vrot.slane %v4803_v48, 2  ;;  %v4824_v57 = vsel %vm384_vm0, %v395_v51, %v396_v52  ;;  %v398_v62 = vrot.slane %v289_v60, 1  ;;  %v458_v63 = vrot.slane %v4836_v61, 1  ;;  %v292_v21 = vld [vmem:[%s4711_s15 + $0x58] sm:$0x3]  ;;  %v4914_v34 = vld [vmem:[%s4711_s15 + $0x60] sm:$0xff] }
  0x1e   : > { %v4829_v58 = vsel %vm384_vm0, %v455_v53, %v456_v54  ;;  %v836_v0 = vrot.slane %v289_v60, 2  ;;  %v400_v9 = vrot.slane %v4857_v4, 1  ;;  %v401_v11 = vrot.slane %v4860_v5, 1  ;;  %v4893_v22 = vld [vmem:[%s4711_s15 + $0x178] sm:$0x3]  ;;  %v4917_v35 = vld [vmem:[%s4711_s15 + $0x68] sm:$0xff] }
  0x1f   : > { %4182 = vmatmul.msk.f32.gmra.mxu0 %vm467_vm1, %v389_v23  ;;  %4247 = vmatmul.msk.f32.gmra.mxu2 %vm467_vm1, %v827_v25  ;;  %7716 = vst [vmem:[#allocation8_spill] sm:$0xff] %v4829_v58  ;;  %v4832_v59 = vsel %vm822_vm2, %v833_v55, %v834_v56  ;;  %v4846_v1 = vsel %vm384_vm0, %v396_v52, %v398_v62  ;;  %v460_v12 = vrot.slane %v4863_v6, 1  ;;  %v461_v13 = vrot.slane %v4866_v8, 1  ;;  %v295_v53 = vld [vmem:[%s4711_s15 + $0x70] sm:$0x3]  ;;  %v4953_v62 = vld [vmem:[%s4711_s15 + $0x78] sm:$0xff] }
  0x20   : > { %4206 = vmatmul.msk.f32.gmra.mxu3 %vm467_vm1, %v4741_v24  ;;  %v4851_v2 = vsel %vm384_vm0, %v456_v54, %v458_v63  ;;  %v4854_v3 = vsel %vm822_vm2, %v834_v56, %v836_v0  ;;  %v838_v14 = vrot.slane %v4857_v4, 2  ;;  %v839_v15 = vrot.slane %v4860_v5, 2  ;;  %v4956_v63 = vld [vmem:[%s4711_s15 + $0x80] sm:$0xff] }
  0x21   : > { %7717 = vst [vmem:[#allocation9_spill] sm:$0xff] %v4851_v2  ;;  %v4881_v16 = vsel %vm384_vm0, %v400_v9, %v401_v11  ;;  %v4886_v19 = vsel %vm384_vm0, %v460_v12, %v461_v13  ;;  %v403_v23 = vrot.slane %v292_v21, 1  ;;  %v463_v25 = vrot.slane %v4893_v22, 1 }
  0x22   : > { %7718 = vst [vmem:[#allocation10_spill] sm:$0xff] %v4886_v19  ;;  %v4889_v20 = vsel %vm822_vm2, %v838_v14, %v839_v15  ;;  %v841_v30 = vrot.slane %v292_v21, 2  ;;  %v405_v39 = vrot.slane %v4914_v34, 1  ;;  %v406_v41 = vrot.slane %v4917_v35, 1 }
  0x23   : > { %v4903_v31 = vsel %vm384_vm0, %v401_v11, %v403_v23  ;;  %v4908_v32 = vsel %vm384_vm0, %v461_v13, %v463_v25  ;;  %v843_v42 = vrot.slane %v4914_v34, 2  ;;  %v844_v43 = vrot.slane %v4917_v35, 2 }
  0x24   : > { %4215 = vmatmul.msk.f32.gmra.mxu1 %vm467_vm1, %v4745_v26  ;;  %7719 = vst [vmem:[#allocation11_spill] sm:$0xff] %v4908_v32  ;;  %v4911_v33 = vsel %vm822_vm2, %v839_v15, %v841_v30  ;;  %v4930_v51 = vsel %vm384_vm0, %v405_v39, %v406_v41  ;;  %v408_v54 = vrot.slane %v295_v53, 1  ;;  %v846_v55 = vrot.slane %v295_v53, 2  ;;  %v298_v15 = vld [vmem:[%s4711_s15 + $0x88] sm:$0x3]  ;;  %v4992_v39 = vld [vmem:[%s4711_s15 + $0x90] sm:$0xff] }
  0x25   : > { %v4935_v52 = vsel %vm822_vm2, %v843_v42, %v844_v43  ;;  %v410_v0 = vrot.slane %v4953_v62, 1  ;;  %v411_v9 = vrot.slane %v4956_v63, 1  ;;  %v848_v11 = vrot.slane %v4953_v62, 2 }
  0x26   : > { %v4945_v56 = vsel %vm384_vm0, %v406_v41, %v408_v54  ;;  %v4950_v60 = vsel %vm822_vm2, %v844_v43, %v846_v55  ;;  %v849_v12 = vrot.slane %v4956_v63, 2  ;;  %v413_v21 = vrot.slane %v298_v15, 1  ;;  %v4995_v41 = vld [vmem:[%s4711_s15 + $0x98] sm:$0xff] }
  0x27   : > { %4183 = vmatmul.msk.f32.gmra.mxu0 %vm467_vm1, %v4767_v36  ;;  %4248 = vmatmul.msk.f32.gmra.mxu2 %vm467_vm1, %v4775_v38  ;;  %v4969_v13 = vsel %vm384_vm0, %v410_v0, %v411_v9  ;;  %v851_v23 = vrot.slane %v298_v15, 2  ;;  %v415_v42 = vrot.slane %v4992_v39, 1  ;;  %v416_v43 = vrot.slane %v4995_v41, 1 }
  0x28   : > { %4207 = vmatmul.msk.f32.gmra.mxu3 %vm467_vm1, %v4772_v37  ;;  %v4974_v14 = vsel %vm822_vm2, %v848_v11, %v849_v12  ;;  %v4984_v25 = vsel %vm384_vm0, %v411_v9, %v413_v21  ;;  %v853_v53 = vrot.slane %v4992_v39, 2  ;;  %v854_v54 = vrot.slane %v4995_v41, 2  ;;  %v301_v9 = vld [vmem:[%s4711_s15 + $0xa0] sm:$0x3]  ;;  %v4344_v21 = vld [vmem:[%s7620_s1 + $0x28] sm:$0xff] }
  0x29   : > { %v4989_v30 = vsel %vm822_vm2, %v849_v12, %v851_v23  ;;  %v5008_v55 = vsel %vm384_vm0, %v415_v42, %v416_v43  ;;  %v418_v11 = vrot.slane %v301_v9, 1  ;;  %v4278_v12 = vld [vmem:[%s7620_s1 + $0x18] sm:$0xff]  ;;  %v856_v15 = vrot.slane %v301_v9, 2  ;;  %1450 = vmatpush.msrb.mxu1 %v4344_v21 }
  0x2a   : > { %v5013_v0 = vsel %vm822_vm2, %v853_v53, %v854_v54  ;;  %v5037_v53 = vld [vmem:[%s4711_s15 + $0xa8] sm:$0xff]  ;;  %v304_v21 = vld [vmem:[%s4711_s15 + $0xb8] sm:$0x3] }
  0x2b   : > { %v5029_v23 = vsel %vm384_vm0, %v416_v43, %v418_v11  ;;  %v5034_v42 = vsel %vm822_vm2, %v854_v54, %v856_v15  ;;  %v420_v43 = vrot.slane %v5037_v53, 1  ;;  %v858_v9 = vrot.slane %v5037_v53, 2 }
  0x2c   : > { %4216 = vmatmul.msk.f32.gmra.mxu1 %vm467_vm1, %v4748_v27  ;;  %7720 = vst [vmem:[#allocation12_spill] sm:$0xff] %v5029_v23 }
  0x2d   : > { %7721 = vst [vmem:[#allocation13_spill] sm:$0xff] %v5034_v42 }
  0x2f   : > { %4184 = vmatmul.msk.f32.gmra.mxu0 %vm467_vm1, %v4789_v44  ;;  %4249 = vmatmul.msk.f32.gmra.mxu2 %vm467_vm1, %v4797_v46 }
  0x30   : > { %4208 = vmatmul.msk.f32.gmra.mxu3 %vm467_vm1, %v4794_v45  ;;  %v5079_v45 = vld [vmem:[%s4711_s15 + $0xc8] sm:$0xff] }
  0x31   : > { %v864_v37 = vrot.slane %v5079_v45, 2 }
  0x34   : > { %4217 = vmatmul.msk.f32.gmra.mxu1 %vm467_vm1, %v4800_v47 }
  0x37   : > { %4185 = vmatmul.msk.f32.gmra.mxu0 %vm467_vm1, %v4824_v57  ;;  %4250 = vmatmul.msk.f32.gmra.mxu2 %vm467_vm1, %v4832_v59 }
  0x38   : > { %4209 = vmatmul.msk.f32.gmra.mxu3 %vm467_vm1, %v4829_v58  ;;  %v5076_v58 = vld [vmem:[%s4711_s15 + $0xc0] sm:$0xff] }
  0x39   : > { %7727 = vst [vmem:[#allocation19_spill] sm:$0xff] %v5076_v58 }
  0x3c   : > { %4218 = vmatmul.msk.f32.gmra.mxu1 %vm467_vm1, %v4803_v48 }
  0x3f   : > { %4186 = vmatmul.msk.f32.gmra.mxu0 %vm467_vm1, %v4846_v1  ;;  %4251 = vmatmul.msk.f32.gmra.mxu2 %vm467_vm1, %v4854_v3 }
  0x40   : > { %4210 = vmatmul.msk.f32.gmra.mxu3 %vm467_vm1, %v4851_v2  ;;  %v861_v2 = vrot.slane %v304_v21, 2 }
  0x44   : > { %4219 = vmatmul.msk.f32.gmra.mxu1 %vm467_vm1, %v4857_v4 }
  0x47   : > { %4187 = vmatmul.msk.f32.gmra.mxu0 %vm467_vm1, %v4881_v16  ;;  %4252 = vmatmul.msk.f32.gmra.mxu2 %vm467_vm1, %v4889_v20 }
  0x48   : > { %4211 = vmatmul.msk.f32.gmra.mxu3 %vm467_vm1, %v4886_v19  ;;  %v423_v19 = vrot.slane %v304_v21, 1  ;;  %v863_v21 = vrot.slane %v5076_v58, 2 }
  0x4c   : > { %4220 = vmatmul.msk.f32.gmra.mxu1 %vm467_vm1, %v4860_v5 }
  0x4f   : > { %4188 = vmatmul.msk.f32.gmra.mxu0 %vm467_vm1, %v4903_v31  ;;  %4253 = vmatmul.msk.f32.gmra.mxu2 %vm467_vm1, %v4911_v33 }
  0x50   : > { %4212 = vmatmul.msk.f32.gmra.mxu3 %vm467_vm1, %v4908_v32  ;;  %v5040_v32 = vld [vmem:[%s4711_s15 + $0xb0] sm:$0xff] }
  0x51   : > { %7722 = vst [vmem:[#allocation14_spill] sm:$0xff] %v5040_v32  ;;  %v421_v54 = vrot.slane %v5040_v32, 1  ;;  %v859_v11 = vrot.slane %v5040_v32, 2 }
  0x53   : > { %v5058_v15 = vsel %vm822_vm2, %v858_v9, %v859_v11  ;;  %v5073_v9 = vsel %vm822_vm2, %v859_v11, %v861_v2  ;;  %v883_v2 = vrot.slane %v4716_v7, 2  ;;  %v884_v11 = vrot.slane %v4719_v10, 2 }
  0x54   : > { %4221 = vmatmul.msk.f32.gmra.mxu1 %vm467_vm1, %v4914_v34  ;;  %7724 = vst [vmem:[#allocation16_spill] sm:$0xff] %v5058_v15 }
  0x55   : > { %7726 = vst [vmem:[#allocation18_spill] sm:$0xff] %v5073_v9 }
  0x57   : > { %4189 = vmatmul.msk.f32.gmra.mxu0 %vm467_vm1, %v4930_v51  ;;  %4254 = vmatmul.msk.f32.gmra.mxu2 %vm467_vm1, %v4935_v52 }
  0x58   : > { %4237 = vmatmul.msk.f32.vlgmr.msrb.gmra.mxu3 %vm467_vm1, %v4716_v7  ;;  %v307_v7 = vld [vmem:[%s4711_s15 + $0xd0] sm:$0x3] }
  0x59   : > { %1137 = vmatpush.msrb.mxu3 %v4278_v12  ;;  %v5053_v12 = vsel %vm384_vm0, %v420_v43, %v421_v54  ;;  %v5068_v43 = vsel %vm384_vm0, %v421_v54, %v423_v19  ;;  %v425_v19 = vrot.slane %v5076_v58, 1  ;;  %v426_v54 = vrot.slane %v5079_v45, 1 }
  0x5a   : > { %7723 = vst [vmem:[#allocation15_spill] sm:$0xff] %v5053_v12 }
  0x5b   : > { %7725 = vst [vmem:[#allocation17_spill] sm:$0xff] %v5068_v43 }
  0x5c   : > { %4222 = vmatmul.msk.f32.gmra.mxu1 %vm467_vm1, %v4917_v35 }
  0x5f   : > { %4190 = vmatmul.msk.f32.gmra.mxu0 %vm467_vm1, %v4945_v56  ;;  %4255 = vmatmul.msk.f32.gmra.mxu2 %vm467_vm1, %v4950_v60 }
  0x60   : > { %4238 = vmatmul.msk.f32.gmra.mxu3 %vm467_vm1, %v4719_v10 }
  0x64   : > { %4223 = vmatmul.msk.f32.gmra.mxu1 %vm467_vm1, %v4953_v62 }
  0x67   : > { %4191 = vmatmul.msk.f32.gmra.mxu0 %vm467_vm1, %v4969_v13  ;;  %4256 = vmatmul.msk.f32.gmra.mxu2 %vm467_vm1, %v4974_v14 }
  0x68   : > { %4239 = vmatmul.msk.f32.gmra.mxu3 %vm467_vm1, %v4751_v28 }
  0x6c   : > { %4224 = vmatmul.msk.f32.gmra.mxu1 %vm467_vm1, %v4956_v63 }
  0x6f   : > { %4192 = vmatmul.msk.f32.gmra.mxu0 %vm467_vm1, %v4984_v25  ;;  %4257 = vmatmul.msk.f32.gmra.mxu2 %vm467_vm1, %v4989_v30 }
  0x70   : > { %4240 = vmatmul.msk.f32.gmra.mxu3 %vm467_vm1, %v4754_v29 }
  0x74   : > { %4225 = vmatmul.msk.f32.gmra.mxu1 %vm467_vm1, %v4992_v39 }
  0x77   : > { %4193 = vmatmul.msk.f32.gmra.mxu0 %vm467_vm1, %v5008_v55  ;;  %4258 = vmatmul.msk.f32.gmra.mxu2 %vm467_vm1, %v5013_v0 }
  0x78   : > { %4241 = vmatmul.msk.f32.gmra.mxu3 %vm467_vm1, %v4806_v49 }
  0x7c   : > { %4226 = vmatmul.msk.f32.gmra.mxu1 %vm467_vm1, %v4995_v41 }
  0x7f   : > { %4194 = vmatmul.msk.f32.gmra.mxu0 %vm467_vm1, %v5029_v23  ;;  %4259 = vmatmul.msk.f32.gmra.mxu2 %vm467_vm1, %v5034_v42 }
  0x80   : > { %4242 = vmatmul.msk.f32.gmra.mxu3 %vm467_vm1, %v4809_v50 }
  0x84   : > { %4227 = vmatmul.msk.f32.gmra.mxu1 %vm467_vm1, %v5037_v53 }
  0x87   : > { %4195 = vmatmul.msk.f32.gmra.mxu0 %vm467_vm1, %v5053_v12  ;;  %4260 = vmatmul.msk.f32.gmra.mxu2 %vm467_vm1, %v5058_v15  ;;  %v5102_v12 = vsel %vm822_vm2, %v863_v21, %v864_v37 }
  0x88   : > { %4243 = vmatmul.msk.f32.gmra.mxu3 %vm467_vm1, %v4863_v6  ;;  %7730 = vst [vmem:[#allocation22_spill] sm:$0xff] %v5102_v12 }
  0x8c   : > { %4228 = vmatmul.msk.f32.gmra.mxu1 %vm467_vm1, %v5040_v32 }
  0x8f   : > { %4196 = vmatmul.msk.f32.gmra.mxu0 %vm467_vm1, %v5068_v43  ;;  %4261 = vmatmul.msk.f32.gmra.mxu2 %vm467_vm1, %v5073_v9  ;;  %v5094_v43 = vsel %vm384_vm0, %v425_v19, %v426_v54  ;;  %v5099_v9 = vsel %vm822_vm2, %v883_v2, %v884_v11  ;;  %v428_v19 = vrot.slane %v307_v7, 1  ;;  %v886_v2 = vrot.slane %v4727_v17, 2  ;;  %v5128_v17 = vld [vmem:[%s4711_s15 + $0xd8] sm:$0xff] }
  0x90   : > { %4244 = vmatmul.msk.f32.gmra.mxu3 %vm467_vm1, %v4866_v8  ;;  %7728 = vst [vmem:[#allocation20_spill] sm:$0xff] %v5094_v43 }
  0x91   : > { %v726_v24 = vpop.f32.mrf.mxu1  ;;  %7729 = vst [vmem:[#allocation21_spill] sm:$0xff] %v5099_v9 }
  0x92   : > { %7735 = vst [vmem:[#allocation27_spill] sm:$0xff] %v5128_v17 }
  0x94   : > { %v549_v18 = vpop.f32.mrf.mxu0  ;;  %4229 = vmatmul.msk.f32.gmra.mxu1 %vm467_vm1, %v5076_v58  ;;  %v866_v58 = vrot.slane %v307_v7, 2  ;;  %v868_v7 = vrot.slane %v5128_v17, 2 }
  0x95   : > { %v727_v10 = vadd.f32 %v726_v24, %v549_v18  ;;  %v5131_v24 = vld [vmem:[%s4711_s15 + $0xe0] sm:$0xff] }
  0x96   : > { %v5125_v18 = vsel %vm822_vm2, %v864_v37, %v866_v58  ;;  %v431_v37 = vrot.slane %v5131_v24, 1  ;;  %v888_v58 = vrot.slane %v4751_v28, 2 }
  0x97   : > { %4197 = vmatmul.msk.f32.gmra.mxu0 %vm467_vm1, %v5094_v43  ;;  %4262 = vmatmul.msk.f32.gmra.mxu2 %vm467_vm1, %v5102_v12  ;;  %v5117_v43 = vsel %vm384_vm0, %v426_v54, %v428_v19  ;;  %7734 = vst [vmem:[#allocation26_spill] sm:$0xff] %v5125_v18  ;;  %v430_v54 = vrot.slane %v5128_v17, 1 }
  0x98   : > { %4270 = vmatmul.msk.f32.vlgmr.msra.gmra.mxu3 %vm467_vm1, %v5099_v9  ;;  %7732 = vst [vmem:[#allocation24_spill] sm:$0xff] %v5117_v43  ;;  %v5122_v9 = vsel %vm822_vm2, %v884_v11, %v886_v2  ;;  %v889_v11 = vrot.slane %v4754_v29, 2 }
  0x99   : > { %v729_v15 = vpop.f32.mrf.mxu1  ;;  %7733 = vst [vmem:[#allocation25_spill] sm:$0xff] %v5122_v9 }
  0x9a   : > { %v986_v32 = vpop.f32.mrf.mxu2  ;;  %v5155_v28 = vsel %vm822_vm2, %v888_v58, %v889_v11 }
  0x9b   : > { %v5112_v21 = vpop.f32.mrf.mxu3  ;;  %v5114_v42 = vadd.f32 %v986_v32, %v727_v10  ;;  %v869_v10 = vrot.slane %v5131_v24, 2  ;;  %7738 = vst [vmem:[#allocation30_spill] sm:$0xff] %v5155_v28 }
  0x9c   : > { %v552_v23 = vpop.f32.mrf.mxu0  ;;  %4230 = vmatmul.msk.f32.gmra.mxu1 %vm467_vm1, %v5079_v45 }
  0x9d   : > { %7731 = vst [vmem:[#allocation23_spill] sm:$0xff] %v5114_v42  ;;  %v730_v32 = vadd.f32 %v729_v15, %v552_v23  ;;  %v5150_v23 = vsel %vm384_vm0, %v430_v54, %v431_v37  ;;  %v5158_v29 = vsel %vm822_vm2, %v868_v7, %v869_v10  ;;  %v310_v15 = vld [vmem:[%s4711_s15 + $0xe8] sm:$0x3]  ;;  %v891_v54 = vrot.slane %v4779_v40, 2  ;;  %v5184_v40 = vld [vmem:[%s4711_s15 + $0xf0] sm:$0xff] }
  0x9e   : > { %7737 = vst [vmem:[#allocation29_spill] sm:$0xff] %v5150_v23  ;;  %v871_v58 = vrot.slane %v310_v15, 2 }
  0x9f   : > { %4198 = vmatmul.msk.f32.gmra.mxu0 %vm467_vm1, %v5117_v43  ;;  %4263 = vmatmul.msk.f32.gmra.mxu2 %vm467_vm1, %v5125_v18  ;;  %7739 = vst [vmem:[#allocation31_spill] sm:$0xff] %v5158_v29 }
  0xa0   : > { %4271 = vmatmul.msk.f32.gmra.mxu3 %vm467_vm1, %v5122_v9  ;;  %7744 = vst [vmem:[#allocation36_spill] sm:$0xff] %v5184_v40 }
  0xa1   : > { %v732_v19 = vpop.f32.mrf.mxu1 }
  0xa2   : > { %v989_v9 = vpop.f32.mrf.mxu2 }
  0xa3   : > { %v5145_v2 = vpop.f32.mrf.mxu3  ;;  %v5147_v43 = vadd.f32 %v989_v9, %v730_v32  ;;  %v433_v32 = vrot.slane %v310_v15, 1  ;;  %v894_v15 = vrot.slane %v4809_v50, 2 }
  0xa4   : > { %v555_v42 = vpop.f32.mrf.mxu0  ;;  %4231 = vmatmul.msk.f32.gmra.mxu1 %vm467_vm1, %v5128_v17 }
  0xa5   : > { %7736 = vst [vmem:[#allocation28_spill] sm:$0xff] %v5147_v43  ;;  %v733_v9 = vadd.f32 %v732_v19, %v555_v42  ;;  %v5181_v42 = vsel %vm822_vm2, %v869_v10, %v871_v58  ;;  %v5187_v19 = vld [vmem:[%s4711_s15 + $0xf8] sm:$0xff]  ;;  %v893_v10 = vrot.slane %v4806_v49, 2 }
  0xa6   : > { %7743 = vst [vmem:[#allocation35_spill] sm:$0xff] %v5181_v42 }
  0xa7   : > { %4199 = vmatmul.msk.f32.gmra.mxu0 %vm467_vm1, %v5150_v23  ;;  %4264 = vmatmul.msk.f32.gmra.mxu2 %vm467_vm1, %v5158_v29  ;;  %v5173_v23 = vsel %vm384_vm0, %v431_v37, %v433_v32  ;;  %7745 = vst [vmem:[#allocation37_spill] sm:$0xff] %v5187_v19  ;;  %v435_v37 = vrot.slane %v5184_v40, 1  ;;  %v874_v32 = vrot.slane %v5187_v19, 2  ;;  %v5211_v49 = vsel %vm822_vm2, %v893_v10, %v894_v15 }
  0xa8   : > { %4272 = vmatmul.msk.f32.gmra.mxu3 %vm467_vm1, %v5155_v28  ;;  %7741 = vst [vmem:[#allocation33_spill] sm:$0xff] %v5173_v23  ;;  %v5178_v28 = vsel %vm822_vm2, %v889_v11, %v891_v54  ;;  %v436_v11 = vrot.slane %v5187_v19, 1  ;;  %v896_v10 = vrot.slane %v4836_v61, 2 }
  0xa9   : > { %v735_v43 = vpop.f32.mrf.mxu1  ;;  %7742 = vst [vmem:[#allocation34_spill] sm:$0xff] %v5178_v28 }
  0xaa   : > { %v992_v18 = vpop.f32.mrf.mxu2  ;;  %7748 = vst [vmem:[#allocation40_spill] sm:$0xff] %v5211_v49  ;;  %v5240_v61 = vsel %vm822_vm2, %v894_v15, %v896_v10  ;;  %v899_v10 = vrot.slane %v4866_v8, 2 }
  0xab   : > { %v5168_v7 = vpop.f32.mrf.mxu3  ;;  %v5170_v12 = vadd.f32 %v992_v18, %v733_v9  ;;  %v873_v9 = vrot.slane %v5184_v40, 2  ;;  %7752 = vst [vmem:[#allocation44_spill] sm:$0xff] %v5240_v61 }
  0xac   : > { %v558_v17 = vpop.f32.mrf.mxu0  ;;  %4232 = vmatmul.msk.f32.gmra.mxu1 %vm467_vm1, %v5131_v24 }
  0xad   : > { %7740 = vst [vmem:[#allocation32_spill] sm:$0xff] %v5170_v12  ;;  %v736_v18 = vadd.f32 %v735_v43, %v558_v17  ;;  %v5206_v43 = vsel %vm384_vm0, %v435_v37, %v436_v11  ;;  %v5214_v50 = vsel %vm822_vm2, %v873_v9, %v874_v32  ;;  %v313_v17 = vld [vmem:[%s4711_s15 + $0x100] sm:$0x3]  ;;  %v4410_v37 = vld [vmem:[%s7620_s1 + $0x38] sm:$0xff] }
  0xae   : > { %7747 = vst [vmem:[#allocation39_spill] sm:$0xff] %v5206_v43  ;;  %v876_v9 = vrot.slane %v313_v17, 2  ;;  %1760 = vmatpush.msra.mxu3 %v4410_v37  ;;  %v5246_v37 = vld [vmem:[%s4711_s15 + $0x108] sm:$0xff] }
  0xaf   : > { %4200 = vmatmul.msk.f32.gmra.mxu0 %vm467_vm1, %v5173_v23  ;;  %4265 = vmatmul.msk.f32.gmra.mxu2 %vm467_vm1, %v5181_v42  ;;  %7749 = vst [vmem:[#allocation41_spill] sm:$0xff] %v5214_v50  ;;  %v440_v15 = vrot.slane %v5246_v37, 1 }
  0xb0   : > { %4273 = vmatmul.msk.f32.gmra.mxu3 %vm467_vm1, %v5178_v28  ;;  %7754 = vst [vmem:[#allocation46_spill] sm:$0xff] %v5246_v37 }
  0xb1   : > { %v738_v54 = vpop.f32.mrf.mxu1 }
  0xb2   : > { %v995_v28 = vpop.f32.mrf.mxu2 }
  0xb3   : > { %v5201_v58 = vpop.f32.mrf.mxu3  ;;  %v5203_v23 = vadd.f32 %v995_v28, %v736_v18  ;;  %v438_v18 = vrot.slane %v313_v17, 1  ;;  %v5243_v17 = vsel %vm822_vm2, %v874_v32, %v876_v9  ;;  %v878_v9 = vrot.slane %v5246_v37, 2 }
  0xb4   : > { %v561_v12 = vpop.f32.mrf.mxu0  ;;  %4233 = vmatmul.msk.f32.gmra.mxu1 %vm467_vm1, %v5184_v40  ;;  %7753 = vst [vmem:[#allocation45_spill] sm:$0xff] %v5243_v17 }
  0xb5   : > { %7746 = vst [vmem:[#allocation38_spill] sm:$0xff] %v5203_v23  ;;  %v739_v28 = vadd.f32 %v738_v54, %v561_v12  ;;  %v5232_v12 = vsel %vm384_vm0, %v436_v11, %v438_v18  ;;  %v4377_v54 = vld [vmem:[%s7620_s1 + $0x30] sm:$0xff]  ;;  %v898_v18 = vrot.slane %v4863_v6, 2 }
  0xb6   : > { %7751 = vst [vmem:[#allocation43_spill] sm:$0xff] %v5232_v12  ;;  %1603 = vmatpush.msrb.mxu2 %v4377_v54 }
  0xb7   : > { %4201 = vmatmul.msk.f32.gmra.mxu0 %vm467_vm1, %v5206_v43  ;;  %4266 = vmatmul.msk.f32.gmra.mxu2 %vm467_vm1, %v5214_v50  ;;  %v5276_v6 = vsel %vm822_vm2, %v898_v18, %v899_v10  ;;  %v316_v50 = vld [vmem:[%s4711_s15 + $0x118] sm:$0x3] }
  0xb8   : > { %4274 = vmatmul.msk.f32.gmra.mxu3 %vm467_vm1, %v5211_v49  ;;  %7757 = vst [vmem:[#allocation49_spill] sm:$0xff] %v5276_v6 }
  0xb9   : > { %v741_v23 = vpop.f32.mrf.mxu1 }
  0xba   : > { %v998_v42 = vpop.f32.mrf.mxu2 }
  0xbb   : > { %v5227_v43 = vpop.f32.mrf.mxu3  ;;  %v5229_v40 = vadd.f32 %v998_v42, %v739_v28  ;;  %v5249_v42 = vld [vmem:[%s4711_s15 + $0x110] sm:$0xff]  ;;  %v4443_v28 = vld [vmem:[%s7620_s1 + $0x40] sm:$0xff] }
  0xbc   : > { %v564_v49 = vpop.f32.mrf.mxu0  ;;  %4234 = vmatmul.msk.f32.gmra.mxu1 %vm467_vm1, %v5187_v19  ;;  %v441_v32 = vrot.slane %v5249_v42, 1  ;;  %v879_v54 = vrot.slane %v5249_v42, 2  ;;  %1916 = vmatpush.msra.mxu0 %v4443_v28  ;;  %v901_v28 = vrot.slane %v4893_v22, 2 }
  0xbd   : > { %7750 = vst [vmem:[#allocation42_spill] sm:$0xff] %v5229_v40  ;;  %v742_v11 = vadd.f32 %v741_v23, %v564_v49 }
  0xbe   : > { %v5279_v8 = vsel %vm822_vm2, %v878_v9, %v879_v54 }
  0xbf   : > { %4202 = vmatmul.msk.f32.gmra.mxu0 %vm467_vm1, %v5232_v12  ;;  %4267 = vmatmul.msk.f32.gmra.mxu2 %vm467_vm1, %v5243_v17  ;;  %v5271_v17 = vsel %vm384_vm0, %v440_v15, %v441_v32  ;;  %v443_v15 = vrot.slane %v316_v50, 1 }
  0xc0   : > { %4275 = vmatmul.msk.f32.gmra.mxu3 %vm467_vm1, %v5240_v61  ;;  %7756 = vst [vmem:[#allocation48_spill] sm:$0xff] %v5271_v17 }
  0xc1   : > { %v744_v61 = vpop.f32.mrf.mxu1 }
  0xc2   : > { %v1001_v49 = vpop.f32.mrf.mxu2 }
  0xc3   : > { %v5266_v23 = vpop.f32.mrf.mxu3  ;;  %v5268_v12 = vadd.f32 %v1001_v49, %v742_v11  ;;  %v881_v49 = vrot.slane %v316_v50, 2 }
  0xc4   : > { %v567_v40 = vpop.f32.mrf.mxu0  ;;  %4235 = vmatmul.msk.f32.gmra.mxu1 %vm467_vm1, %v5246_v37 }
  0xc5   : > { %7755 = vst [vmem:[#allocation47_spill] sm:$0xff] %v5268_v12  ;;  %v745_v11 = vadd.f32 %v744_v61, %v567_v40  ;;  %v5302_v40 = vsel %vm822_vm2, %v879_v54, %v881_v49 }
  0xc7   : > { %4203 = vmatmul.msk.f32.gmra.mxu0 %vm467_vm1, %v5271_v17  ;;  %4268 = vmatmul.msk.f32.gmra.mxu2 %vm467_vm1, %v5279_v8  ;;  %v5294_v17 = vsel %vm384_vm0, %v441_v32, %v443_v15 }
  0xc8   : > { %4276 = vmatmul.msk.f32.gmra.mxu3 %vm467_vm1, %v5276_v6  ;;  %7758 = vst [vmem:[#allocation50_spill] sm:$0xff] %v5294_v17  ;;  %v5299_v6 = vsel %vm822_vm2, %v899_v10, %v901_v28 }
  0xc9   : > { %v747_v18 = vpop.f32.mrf.mxu1  ;;  %7759 = vst [vmem:[#allocation51_spill] sm:$0xff] %v5299_v6 }
  0xca   : > { %v1004_v9 = vpop.f32.mrf.mxu2 }
  0xcb   : > { %v5289_v12 = vpop.f32.mrf.mxu3  ;;  %v5291_v19 = vadd.f32 %v1004_v9, %v745_v11 }
  0xcc   : > { %v570_v37 = vpop.f32.mrf.mxu0  ;;  %4236 = vmatmul.msk.f32.gmra.mxu1 %vm467_vm1, %v5249_v42 }
  0xcd   : > { %v748_v22 = vadd.f32 %v747_v18, %v570_v37 }
  0xcf   : > { %4204 = vmatmul.msk.f32.gmra.mxu0 %vm467_vm1, %v5294_v17  ;;  %4269 = vmatmul.msk.f32.gmra.mxu2 %vm467_vm1, %v5302_v40 }
  0xd0   : > { %4277 = vmatmul.msk.f32.gmra.mxu3 %vm467_vm1, %v5299_v6 }
  0xd1   : > { %v750_v50 = vpop.f32.mrf.mxu1 }
  0xd2   : > { %v1007_v32 = vpop.f32.mrf.mxu2 }
  0xd3   : > { %v5310_v61 = vpop.f32.mrf.mxu3  ;;  %v5312_v10 = vadd.f32 %v1007_v32, %v748_v22 }
  0xd4   : > { %v573_v11 = vpop.f32.mrf.mxu0  ;;  %4345 = vmatmul.msk.f32.vlgmr.msrb.gmra.mxu1 %vm467_vm1, %v4775_v38 }
  0xd5   : > { %v751_v54 = vadd.f32 %v750_v50, %v573_v11 }
  0xd7   : > { %4312 = vmatmul.msk.f32.vlgmr.msrb.gmra.mxu0 %vm467_vm1, %v4767_v36  ;;  %4378 = vmatmul.msk.f32.vlgmr.msrb.gmra.mxu2 %vm467_vm1, %v4800_v47 }
  0xd8   : > { %4279 = vmatmul.msk.f32.vlgmr.msrb.gmra.mxu3 %vm467_vm1, %v4745_v26 }
  0xd9   : > { %v753_v37 = vpop.f32.mrf.mxu1 }
  0xda   : > { %v1010_v28 = vpop.f32.mrf.mxu2 }
  0xdb   : > { %v798_v15 = vpop.f32.mrf.mxu3  ;;  %v5325_v9 = vadd.f32 %v1010_v28, %v751_v54 }
  0xdc   : > { %v5323_v49 = vadd.f32 %v798_v15, %v5112_v21  ;;  %v576_v18 = vpop.f32.mrf.mxu0  ;;  %4346 = vmatmul.msk.f32.gmra.mxu1 %vm467_vm1, %v4797_v46 }
  0xdd   : > { %v754_v26 = vadd.f32 %v753_v37, %v576_v18 }
  0xdf   : > { %4313 = vmatmul.msk.f32.gmra.mxu0 %vm467_vm1, %v4789_v44  ;;  %4379 = vmatmul.msk.f32.gmra.mxu2 %vm467_vm1, %v4803_v48 }
  0xe0   : > { %4280 = vmatmul.msk.f32.gmra.mxu3 %vm467_vm1, %v4748_v27 }
  0xe1   : > { %v756_v36 = vpop.f32.mrf.mxu1 }
  0xe2   : > { %v1013_v21 = vpop.f32.mrf.mxu2 }
  0xe3   : > { %v801_v38 = vpop.f32.mrf.mxu3  ;;  %v5338_v32 = vadd.f32 %v1013_v21, %v754_v26 }
  0xe4   : > { %v5336_v22 = vadd.f32 %v801_v38, %v5145_v2  ;;  %v579_v50 = vpop.f32.mrf.mxu0  ;;  %4347 = vmatmul.msk.f32.gmra.mxu1 %vm467_vm1, %v4832_v59 }
  0xe5   : > { %v757_v27 = vadd.f32 %v756_v36, %v579_v50 }
  0xe7   : > { %4314 = vmatmul.msk.f32.gmra.mxu0 %vm467_vm1, %v4824_v57  ;;  %4380 = vmatmul.msk.f32.gmra.mxu2 %vm467_vm1, %v4857_v4 }
  0xe8   : > { %4281 = vmatmul.msk.f32.gmra.mxu3 %vm467_vm1, %v4800_v47 }
  0xe9   : > { %v759_v44 = vpop.f32.mrf.mxu1 }
  0xea   : > { %v1016_v2 = vpop.f32.mrf.mxu2 }
  0xeb   : > { %v804_v46 = vpop.f32.mrf.mxu3  ;;  %v5351_v37 = vadd.f32 %v1016_v2, %v757_v27 }
  0xec   : > { %v5349_v11 = vadd.f32 %v804_v46, %v5168_v7  ;;  %v582_v54 = vpop.f32.mrf.mxu0  ;;  %4348 = vmatmul.msk.f32.gmra.mxu1 %vm467_vm1, %v4854_v3 }
  0xed   : > { %v760_v47 = vadd.f32 %v759_v44, %v582_v54 }
  0xef   : > { %4315 = vmatmul.msk.f32.gmra.mxu0 %vm467_vm1, %v4846_v1  ;;  %4381 = vmatmul.msk.f32.gmra.mxu2 %vm467_vm1, %v4860_v5 }
  0xf0   : > { %4282 = vmatmul.msk.f32.gmra.mxu3 %vm467_vm1, %v4803_v48 }
  0xf1   : > { %v762_v15 = vpop.f32.mrf.mxu1 }
  0xf2   : > { %v1019_v7 = vpop.f32.mrf.mxu2 }
  0xf3   : > { %v807_v28 = vpop.f32.mrf.mxu3  ;;  %v5364_v36 = vadd.f32 %v1019_v7, %v760_v47 }
  0xf4   : > { %v5362_v18 = vadd.f32 %v807_v28, %v5201_v58  ;;  %v585_v26 = vpop.f32.mrf.mxu0  ;;  %4349 = vmatmul.msk.f32.gmra.mxu1 %vm467_vm1, %v4889_v20 }
  0xf5   : > { %v763_v48 = vadd.f32 %v762_v15, %v585_v26 }
  0xf7   : > { %4316 = vmatmul.msk.f32.gmra.mxu0 %vm467_vm1, %v4881_v16  ;;  %4382 = vmatmul.msk.f32.gmra.mxu2 %vm467_vm1, %v4914_v34 }
  0xf8   : > { %4283 = vmatmul.msk.f32.gmra.mxu3 %vm467_vm1, %v4857_v4 }
  0xf9   : > { %v765_v38 = vpop.f32.mrf.mxu1 }
  0xfa   : > { %v1022_v58 = vpop.f32.mrf.mxu2 }
  0xfb   : > { %v810_v21 = vpop.f32.mrf.mxu3  ;;  %v5377_v44 = vadd.f32 %v1022_v58, %v763_v48 }
  0xfc   : > { %v5375_v50 = vadd.f32 %v810_v21, %v5227_v43  ;;  %v588_v27 = vpop.f32.mrf.mxu0  ;;  %4350 = vmatmul.msk.f32.gmra.mxu1 %vm467_vm1, %v4911_v33 }
  0xfd   : > { %v766_v4 = vadd.f32 %v765_v38, %v588_v27 }
  0xff   : > { %4317 = vmatmul.msk.f32.gmra.mxu0 %vm467_vm1, %v4903_v31  ;;  %4383 = vmatmul.msk.f32.gmra.mxu2 %vm467_vm1, %v4917_v35 }
 0x100   : > { %4284 = vmatmul.msk.f32.gmra.mxu3 %vm467_vm1, %v4860_v5 }
 0x101   : > { %v768_v46 = vpop.f32.mrf.mxu1 }
 0x102   : > { %v1025_v43 = vpop.f32.mrf.mxu2 }
 0x103   : > { %v813_v2 = vpop.f32.mrf.mxu3  ;;  %v5390_v15 = vadd.f32 %v1025_v43, %v766_v4 }
 0x104   : > { %v5388_v54 = vadd.f32 %v813_v2, %v5266_v23  ;;  %v591_v47 = vpop.f32.mrf.mxu0  ;;  %4351 = vmatmul.msk.f32.gmra.mxu1 %vm467_vm1, %v4935_v52 }
 0x105   : > { %v769_v5 = vadd.f32 %v768_v46, %v591_v47 }
 0x107   : > { %4318 = vmatmul.msk.f32.gmra.mxu0 %vm467_vm1, %v4930_v51  ;;  %4384 = vmatmul.msk.f32.gmra.mxu2 %vm467_vm1, %v4953_v62 }
 0x108   : > { %4285 = vmatmul.msk.f32.gmra.mxu3 %vm467_vm1, %v4914_v34 }
 0x109   : > { %v771_v28 = vpop.f32.mrf.mxu1 }
 0x10a   : > { %v1028_v23 = vpop.f32.mrf.mxu2 }
 0x10b   : > { %v816_v7 = vpop.f32.mrf.mxu3  ;;  %v5403_v38 = vadd.f32 %v1028_v23, %v769_v5 }
 0x10c   : > { %v5401_v26 = vadd.f32 %v816_v7, %v5289_v12  ;;  %v594_v48 = vpop.f32.mrf.mxu0  ;;  %4352 = vmatmul.msk.f32.gmra.mxu1 %vm467_vm1, %v4950_v60 }
 0x10d   : > { %v772_v34 = vadd.f32 %v771_v28, %v594_v48 }
 0x10f   : > { %4319 = vmatmul.msk.f32.gmra.mxu0 %vm467_vm1, %v4945_v56  ;;  %4385 = vmatmul.msk.f32.gmra.mxu2 %vm467_vm1, %v4956_v63 }
 0x110   : > { %4286 = vmatmul.msk.f32.gmra.mxu3 %vm467_vm1, %v4917_v35 }
 0x111   : > { %v774_v21 = vpop.f32.mrf.mxu1 }
 0x112   : > { %v1031_v12 = vpop.f32.mrf.mxu2 }
 0x113   : > { %v819_v58 = vpop.f32.mrf.mxu3  ;;  %v5416_v46 = vadd.f32 %v1031_v12, %v772_v34 }
 0x114   : > { %v5414_v27 = vadd.f32 %v819_v58, %v5310_v61  ;;  %v597_v4 = vpop.f32.mrf.mxu0  ;;  %4353 = vmatmul.msk.f32.gmra.mxu1 %vm467_vm1, %v4974_v14 }
 0x115   : > { %v775_v35 = vadd.f32 %v774_v21, %v597_v4 }
 0x117   : > { %4320 = vmatmul.msk.f32.gmra.mxu0 %vm467_vm1, %v4969_v13  ;;  %4386 = vmatmul.msk.f32.gmra.mxu2 %vm467_vm1, %v4992_v39 }
 0x118   : > { %4287 = vmatmul.msk.f32.gmra.mxu3 %vm467_vm1, %v4953_v62 }
 0x119   : > { %v777_v2 = vpop.f32.mrf.mxu1 }
 0x11a   : > { %v1034_v61 = vpop.f32.mrf.mxu2 }
 0x11b   : > { %v1058_v43 = vpop.f32.mrf.mxu3  ;;  %v5429_v28 = vadd.f32 %v1034_v61, %v775_v35  ;;  %v7763_v61 = vld [vmem:[#allocation12_spill] sm:$0xff] }
 0x11c   : > { %v5427_v47 = vadd.f32 %v1058_v43, %v5323_v49  ;;  %v600_v5 = vpop.f32.mrf.mxu0  ;;  %4354 = vmatmul.msk.f32.gmra.mxu1 %vm467_vm1, %v4989_v30  ;;  %v7762_v43 = vld [vmem:[#allocation13_spill] sm:$0xff] }
 0x11d   : > { %v778_v62 = vadd.f32 %v777_v2, %v600_v5  ;;  %v7764_v5 = vld [vmem:[#allocation14_spill] sm:$0xff] }
 0x11f   : > { %4321 = vmatmul.msk.f32.gmra.mxu0 %vm467_vm1, %v4984_v25  ;;  %4387 = vmatmul.msk.f32.gmra.mxu2 %vm467_vm1, %v4995_v41 }
 0x120   : > { %4288 = vmatmul.msk.f32.gmra.mxu3 %vm467_vm1, %v4956_v63 }
 0x121   : > { %v780_v7 = vpop.f32.mrf.mxu1 }
 0x122   : > { %v1037_v49 = vpop.f32.mrf.mxu2 }
 0x123   : > { %v1061_v23 = vpop.f32.mrf.mxu3  ;;  %v5442_v21 = vadd.f32 %v1037_v49, %v778_v62 }
 0x124   : > { %v5440_v48 = vadd.f32 %v1061_v23, %v5336_v22  ;;  %v603_v34 = vpop.f32.mrf.mxu0  ;;  %4355 = vmatmul.msk.f32.gmra.mxu1 %vm467_vm1, %v5013_v0 }
 0x125   : > { %v781_v63 = vadd.f32 %v780_v7, %v603_v34 }
 0x126   : > { %7760 = vst [vmem:[#allocation52_spill] sm:$0xff] %v5440_v48 }
 0x127   : > { %4322 = vmatmul.msk.f32.gmra.mxu0 %vm467_vm1, %v5008_v55  ;;  %4388 = vmatmul.msk.f32.gmra.mxu2 %vm467_vm1, %v5037_v53 }
 0x128   : > { %4289 = vmatmul.msk.f32.gmra.mxu3 %vm467_vm1, %v4992_v39 }
 0x129   : > { %v783_v58 = vpop.f32.mrf.mxu1 }
 0x12a   : > { %v1040_v22 = vpop.f32.mrf.mxu2 }
 0x12b   : > { %v1064_v12 = vpop.f32.mrf.mxu3  ;;  %v5455_v2 = vadd.f32 %v1040_v22, %v781_v63  ;;  %v7766_v63 = vld [vmem:[#allocation16_spill] sm:$0xff] }
 0x12c   : > { %v5453_v4 = vadd.f32 %v1064_v12, %v5349_v11  ;;  %v606_v35 = vpop.f32.mrf.mxu0  ;;  %4356 = vmatmul.msk.f32.gmra.mxu1 %vm467_vm1, %v7762_v43  ;;  %v7767_v12 = vld [vmem:[#allocation15_spill] sm:$0xff] }
 0x12d   : > { %v784_v39 = vadd.f32 %v783_v58, %v606_v35  ;;  %v7768_v58 = vld [vmem:[#allocation19_spill] sm:$0xff] }
 0x12e   : > { %7761 = vst [vmem:[#allocation53_spill] sm:$0xff] %v5453_v4 }
 0x12f   : > { %4323 = vmatmul.msk.f32.gmra.mxu0 %vm467_vm1, %v7763_v61  ;;  %4389 = vmatmul.msk.f32.gmra.mxu2 %vm467_vm1, %v7764_v5 }
 0x130   : > { %4290 = vmatmul.msk.f32.gmra.mxu3 %vm467_vm1, %v4995_v41 }
 0x131   : > { %v786_v62 = vpop.f32.mrf.mxu1 }
 0x132   : > { %v1043_v11 = vpop.f32.mrf.mxu2 }
 0x133   : > { %v1067_v7 = vpop.f32.mrf.mxu3  ;;  %v5468_v34 = vadd.f32 %v1043_v11, %v784_v39 }
 0x134   : > { %v5466_v23 = vadd.f32 %v1067_v7, %v5362_v18  ;;  %v609_v49 = vpop.f32.mrf.mxu0  ;;  %4357 = vmatmul.msk.f32.gmra.mxu1 %vm467_vm1, %v7766_v63 }
 0x135   : > { %v787_v41 = vadd.f32 %v786_v62, %v609_v49  ;;  %v7771_v62 = vld [vmem:[#allocation17_spill] sm:$0xff] }
 0x136   : > { %7765 = vst [vmem:[#allocation13_spill] sm:$0xff] %v5466_v23  ;;  %v7770_v23 = vld [vmem:[#allocation18_spill] sm:$0xff] }
 0x137   : > { %4324 = vmatmul.msk.f32.gmra.mxu0 %vm467_vm1, %v7767_v12  ;;  %4390 = vmatmul.msk.f32.gmra.mxu2 %vm467_vm1, %v7768_v58  ;;  %v7787_v12 = vld [vmem:[#allocation28_spill] sm:$0xff] }
 0x138   : > { %4291 = vmatmul.msk.f32.gmra.mxu3 %vm467_vm1, %v5037_v53  ;;  %v4491_v53 = vld [vmem:[%s7622_s3 + $0xf8] sm:$0xff] }
 0x139   : > { %v789_v22 = vpop.f32.mrf.mxu1  ;;  %2298 = vmatpush.msra.mxu1 %v4491_v53  ;;  %v7773_v53 = vld [vmem:[#allocation22_spill] sm:$0xff] }
 0x13a   : > { %v1046_v18 = vpop.f32.mrf.mxu2 }
 0x13b   : > { %v1070_v35 = vpop.f32.mrf.mxu3  ;;  %v5481_v11 = vadd.f32 %v1046_v18, %v787_v41 }
 0x13c   : > { %v5479_v7 = vadd.f32 %v1070_v35, %v5375_v50  ;;  %v612_v39 = vpop.f32.mrf.mxu0  ;;  %4358 = vmatmul.msk.f32.gmra.mxu1 %vm467_vm1, %v7770_v23 }
 0x13d   : > { %v790_v49 = vadd.f32 %v789_v22, %v612_v39  ;;  %v7775_v22 = vld [vmem:[#allocation27_spill] sm:$0xff] }
 0x13e   : > { %7769 = vst [vmem:[#allocation12_spill] sm:$0xff] %v5479_v7 }
 0x13f   : > { %4325 = vmatmul.msk.f32.gmra.mxu0 %vm467_vm1, %v7771_v62  ;;  %4391 = vmatmul.msk.f32.gmra.mxu2 %vm467_vm1, %v5079_v45  ;;  %v7774_v62 = vld [vmem:[#allocation20_spill] sm:$0xff] }
 0x140   : > { %4292 = vmatmul.msk.f32.gmra.mxu3 %vm467_vm1, %v7764_v5 }
 0x141   : > { %v792_v50 = vpop.f32.mrf.mxu1 }
 0x142   : > { %v1049_v35 = vpop.f32.mrf.mxu2 }
 0x143   : > { %v1073_v41 = vpop.f32.mrf.mxu3  ;;  %v5497_v23 = vadd.f32 %v1049_v35, %v790_v49 }
 0x144   : > { %v5495_v18 = vadd.f32 %v1073_v41, %v5388_v54  ;;  %v615_v7 = vpop.f32.mrf.mxu0  ;;  %4359 = vmatmul.msk.f32.gmra.mxu1 %vm467_vm1, %v7773_v53 }
 0x145   : > { %v793_v5 = vadd.f32 %v792_v50, %v615_v7  ;;  %v7778_v7 = vld [vmem:[#allocation24_spill] sm:$0xff] }
 0x146   : > { %7772 = vst [vmem:[#allocation14_spill] sm:$0xff] %v5495_v18  ;;  %v7777_v18 = vld [vmem:[#allocation26_spill] sm:$0xff] }
 0x147   : > { %4326 = vmatmul.msk.f32.gmra.mxu0 %vm467_vm1, %v7774_v62  ;;  %4392 = vmatmul.msk.f32.gmra.mxu2 %vm467_vm1, %v7775_v22  ;;  %v7785_v62 = vld [vmem:[#allocation37_spill] sm:$0xff] }
 0x148   : > { %4293 = vmatmul.msk.f32.gmra.mxu3 %vm467_vm1, %v7768_v58  ;;  %v4490_v58 = vld [vmem:[%s7622_s3 + $0xf0] sm:$0xff] }
 0x149   : > { %v795_v39 = vpop.f32.mrf.mxu1  ;;  %2299 = vmatpush.msra.mxu1 %v4490_v58  ;;  %v7780_v58 = vld [vmem:[#allocation29_spill] sm:$0xff] }
 0x14a   : > { %v1052_v54 = vpop.f32.mrf.mxu2 }
 0x14b   : > { %v1076_v4 = vpop.f32.mrf.mxu3  ;;  %v5510_v35 = vadd.f32 %v1052_v54, %v793_v5 }
 0x14c   : > { %v5508_v41 = vadd.f32 %v1076_v4, %v5401_v26  ;;  %v618_v49 = vpop.f32.mrf.mxu0  ;;  %4360 = vmatmul.msk.f32.gmra.mxu1 %vm467_vm1, %v7777_v18 }
 0x14d   : > { %v796_v50 = vadd.f32 %v795_v39, %v618_v49 }
 0x14e   : > { %7776 = vst [vmem:[#allocation19_spill] sm:$0xff] %v5508_v41 }
 0x14f   : > { %4327 = vmatmul.msk.f32.gmra.mxu0 %vm467_vm1, %v7778_v7  ;;  %4393 = vmatmul.msk.f32.gmra.mxu2 %vm467_vm1, %v5131_v24 }
 0x150   : > { %4294 = vmatmul.msk.f32.gmra.mxu3 %vm467_vm1, %v5079_v45  ;;  %v7781_v45 = vld [vmem:[#allocation36_spill] sm:$0xff] }
 0x151   : > { %v1452_v26 = vpop.f32.mrf.mxu1 }
 0x152   : > { %v1055_v5 = vpop.f32.mrf.mxu2 }
 0x153   : > { %v1079_v4 = vpop.f32.mrf.mxu3  ;;  %v5526_v18 = vadd.f32 %v1055_v5, %v796_v50  ;;  %v7783_v50 = vld [vmem:[#allocation35_spill] sm:$0xff] }
 0x154   : > { %v5524_v54 = vadd.f32 %v1079_v4, %v5414_v27  ;;  %v1296_v41 = vpop.f32.mrf.mxu0  ;;  %4361 = vmatmul.msk.f32.gmra.mxu1 %vm467_vm1, %v5158_v29  ;;  %v7782_v27 = vld [vmem:[#allocation23_spill] sm:$0xff]  ;;  %v7784_v29 = vld [vmem:[#allocation33_spill] sm:$0xff] }
 0x155   : > { %v4489_v5 = vld [vmem:[%s7622_s3 + $0xe8] sm:$0xff] }
 0x156   : > { %7779 = vst [vmem:[#allocation27_spill] sm:$0xff] %v5524_v54  ;;  %2300 = vmatpush.msra.mxu1 %v4489_v5  ;;  %v7788_v5 = vld [vmem:[#allocation41_spill] sm:$0xff] }
 0x157   : > { %4328 = vmatmul.msk.f32.gmra.mxu0 %vm467_vm1, %v7780_v58  ;;  %4394 = vmatmul.msk.f32.gmra.mxu2 %vm467_vm1, %v7781_v45 }
 0x158   : > { %4295 = vmatmul.msk.f32.gmra.mxu3 %vm467_vm1, %v7775_v22 }
 0x159   : > { %v1455_v39 = vpop.f32.mrf.mxu1 }
 0x15a   : > { %v1605_v7 = vpop.f32.mrf.mxu2 }
 0x15b   : > { %v1139_v49 = vpop.f32.mrf.mxu3 }
 0x15c   : > { %v1235_v4 = vadd.f32 %v1139_v49, %v7782_v27  ;;  %v1299_v54 = vpop.f32.mrf.mxu0  ;;  %4362 = vmatmul.msk.f32.gmra.mxu1 %vm467_vm1, %v7783_v50 }
 0x15e   : > { %v1392_v58 = vadd.f32 %v1296_v41, %v1235_v4  ;;  %v7789_v4 = vld [vmem:[#allocation39_spill] sm:$0xff] }
 0x15f   : > { %4329 = vmatmul.msk.f32.gmra.mxu0 %vm467_vm1, %v7784_v29  ;;  %4395 = vmatmul.msk.f32.gmra.mxu2 %vm467_vm1, %v7785_v62  ;;  %v7793_v29 = vld [vmem:[#allocation45_spill] sm:$0xff] }
 0x160   : > { %v1548_v22 = vadd.f32 %v1452_v26, %v1392_v58  ;;  %4296 = vmatmul.msk.f32.gmra.mxu3 %vm467_vm1, %v5131_v24  ;;  %v7790_v24 = vld [vmem:[#allocation46_spill] sm:$0xff] }
 0x161   : > { %v1458_v27 = vpop.f32.mrf.mxu1 }
 0x162   : > { %v5548_v49 = vadd.f32 %v1605_v7, %v1548_v22  ;;  %v1608_v53 = vpop.f32.mrf.mxu2 }
 0x163   : > { %v1142_v50 = vpop.f32.mrf.mxu3 }
 0x164   : > { %7786 = vst [vmem:[#allocation36_spill] sm:$0xff] %v5548_v49  ;;  %v1236_v63 = vadd.f32 %v1142_v50, %v7787_v12  ;;  %v1302_v48 = vpop.f32.mrf.mxu0  ;;  %4363 = vmatmul.msk.f32.gmra.mxu1 %vm467_vm1, %v7788_v5  ;;  %v7792_v12 = vld [vmem:[#allocation32_spill] sm:$0xff] }
 0x166   : > { %v1393_v41 = vadd.f32 %v1299_v54, %v1236_v63  ;;  %v4488_v63 = vld [vmem:[%s7622_s3 + $0xe0] sm:$0xff] }
 0x167   : > { %4330 = vmatmul.msk.f32.gmra.mxu0 %vm467_vm1, %v7789_v4  ;;  %4396 = vmatmul.msk.f32.gmra.mxu2 %vm467_vm1, %v7790_v24 }
 0x168   : > { %v1549_v26 = vadd.f32 %v1455_v39, %v1393_v41  ;;  %4297 = vmatmul.msk.f32.gmra.mxu3 %vm467_vm1, %v7781_v45  ;;  %2301 = vmatpush.msra.mxu1 %v4488_v63  ;;  %v7794_v39 = vld [vmem:[#allocation43_spill] sm:$0xff] }
 0x169   : > { %v1461_v54 = vpop.f32.mrf.mxu1 }
 0x16a   : > { %v5559_v7 = vadd.f32 %v1608_v53, %v1549_v26  ;;  %v1611_v22 = vpop.f32.mrf.mxu2 }
 0x16b   : > { %v1145_v58 = vpop.f32.mrf.mxu3 }
 0x16c   : > { %7791 = vst [vmem:[#allocation23_spill] sm:$0xff] %v5559_v7  ;;  %v1237_v50 = vadd.f32 %v1145_v58, %v7792_v12  ;;  %v1305_v49 = vpop.f32.mrf.mxu0  ;;  %4364 = vmatmul.msk.f32.gmra.mxu1 %vm467_vm1, %v7793_v29  ;;  %v7796_v12 = vld [vmem:[#allocation38_spill] sm:$0xff] }
 0x16e   : > { %v1394_v45 = vadd.f32 %v1302_v48, %v1237_v50  ;;  %v7797_v50 = vld [vmem:[#allocation48_spill] sm:$0xff] }
 0x16f   : > { %4331 = vmatmul.msk.f32.gmra.mxu0 %vm467_vm1, %v7794_v39  ;;  %4397 = vmatmul.msk.f32.gmra.mxu2 %vm467_vm1, %v5249_v42 }
 0x170   : > { %v1550_v53 = vadd.f32 %v1458_v27, %v1394_v45  ;;  %4298 = vmatmul.msk.f32.gmra.mxu3 %vm467_vm1, %v7785_v62  ;;  %v4623_v62 = vld [vmem:[%s4711_s15 + $0x120] sm:$0xff] }
 0x171   : > { %v1464_v27 = vpop.f32.mrf.mxu1 }
 0x172   : > { %v5573_v41 = vadd.f32 %v1611_v22, %v1550_v53  ;;  %v1614_v58 = vpop.f32.mrf.mxu2 }
 0x173   : > { %v1148_v26 = vpop.f32.mrf.mxu3 }
 0x174   : > { %7795 = vst [vmem:[#allocation37_spill] sm:$0xff] %v5573_v41  ;;  %v1238_v7 = vadd.f32 %v1148_v26, %v7796_v12  ;;  %v1308_v29 = vpop.f32.mrf.mxu0  ;;  %4365 = vmatmul.msk.f32.gmra.mxu1 %vm467_vm1, %v5279_v8  ;;  %v7799_v26 = vld [vmem:[#allocation42_spill] sm:$0xff] }
 0x176   : > { %v1395_v48 = vadd.f32 %v1305_v49, %v1238_v7  ;;  %v4487_v49 = vld [vmem:[%s7622_s3 + $0xd8] sm:$0xff] }
 0x177   : > { %4332 = vmatmul.msk.f32.gmra.mxu0 %vm467_vm1, %v7797_v50  ;;  %4398 = vmatmul.msk.f32.gmra.mxu2 %vm467_vm1, %v4623_v62 }
 0x178   : > { %v1551_v63 = vadd.f32 %v1461_v54, %v1395_v48  ;;  %4299 = vmatmul.msk.f32.gmra.mxu3 %vm467_vm1, %v7790_v24  ;;  %2302 = vmatpush.msra.mxu1 %v4487_v49  ;;  %v4624_v54 = vld [vmem:[%s4711_s15 + $0x128] sm:$0xff] }
 0x17a   : > { %v5584_v22 = vadd.f32 %v1614_v58, %v1551_v63  ;;  %v1617_v53 = vpop.f32.mrf.mxu2  ;;  %v1467_v58 = vpop.f32.mrf.mxu1 }
 0x17b   : > { %v1151_v45 = vpop.f32.mrf.mxu3 }
 0x17c   : > { %7798 = vst [vmem:[#allocation28_spill] sm:$0xff] %v5584_v22  ;;  %v1239_v12 = vadd.f32 %v1151_v45, %v7799_v26  ;;  %v1311_v41 = vpop.f32.mrf.mxu0  ;;  %4366 = vmatmul.msk.f32.gmra.mxu1 %vm467_vm1, %v5302_v40  ;;  %v7801_v26 = vld [vmem:[#allocation47_spill] sm:$0xff] }
 0x17e   : > { %v1396_v7 = vadd.f32 %v1308_v29, %v1239_v12  ;;  %v7802_v29 = vld [vmem:[#allocation21_spill] sm:$0xff] }
 0x17f   : > { %4333 = vmatmul.msk.f32.gmra.mxu0 %vm467_vm1, %v5294_v17  ;;  %4399 = vmatmul.msk.f32.gmra.mxu2 %vm467_vm1, %v4624_v54  ;;  %v7803_v17 = vld [vmem:[#allocation4_spill] sm:$0xff] }
 0x180   : > { %v1552_v24 = vadd.f32 %v1464_v27, %v1396_v7  ;;  %4300 = vmatmul.msk.f32.gmra.mxu3 %vm467_vm1, %v5249_v42  ;;  %v4625_v42 = vld [vmem:[%s4711_s15 + $0x138] sm:$0xff] }
 0x182   : > { %v5598_v48 = vadd.f32 %v1617_v53, %v1552_v24  ;;  %v1620_v45 = vpop.f32.mrf.mxu2  ;;  %v1470_v24 = vpop.f32.mrf.mxu1 }
 0x183   : > { %v1154_v63 = vpop.f32.mrf.mxu3 }
 0x184   : > { %7800 = vst [vmem:[#allocation41_spill] sm:$0xff] %v5598_v48  ;;  %v1240_v22 = vadd.f32 %v1154_v63, %v7801_v26  ;;  %v1314_v49 = vpop.f32.mrf.mxu0  ;;  %4367 = vmatmul.msk.f32.gmra.mxu1 %vm467_vm1, %v7802_v29  ;;  %v7805_v48 = vld [vmem:[#allocation25_spill] sm:$0xff] }
 0x186   : > { %v1397_v12 = vadd.f32 %v1311_v41, %v1240_v22  ;;  %v4486_v41 = vld [vmem:[%s7622_s3 + $0xd0] sm:$0xff] }
 0x187   : > { %4334 = vmatmul.msk.f32.gmra.mxu0 %vm467_vm1, %v7803_v17  ;;  %4400 = vmatmul.msk.f32.gmra.mxu2 %vm467_vm1, %v4625_v42 }
 0x188   : > { %v1553_v27 = vadd.f32 %v1467_v58, %v1397_v12  ;;  %4301 = vmatmul.msk.f32.gmra.mxu3 %vm467_vm1, %v4623_v62  ;;  %2303 = vmatpush.msra.mxu1 %v4486_v41  ;;  %v7806_v58 = vld [vmem:[#allocation5_spill] sm:$0xff]  ;;  %v7809_v41 = vld [vmem:[#allocation6_spill] sm:$0xff] }
 0x189   : > { %v4626_v12 = vld [vmem:[%s4711_s15 + $0x140] sm:$0xff] }
 0x18a   : > { %v5608_v53 = vadd.f32 %v1620_v45, %v1553_v27  ;;  %v1623_v22 = vpop.f32.mrf.mxu2 }
 0x18b   : > { %v1157_v7 = vpop.f32.mrf.mxu3 }
 0x18c   : > { %7804 = vst [vmem:[#allocation39_spill] sm:$0xff] %v5608_v53  ;;  %v1241_v63 = vadd.f32 %v1157_v7, %v5291_v19  ;;  %v1317_v26 = vpop.f32.mrf.mxu0  ;;  %4368 = vmatmul.msk.f32.gmra.mxu1 %vm467_vm1, %v7805_v48  ;;  %v7808_v48 = vld [vmem:[#allocation30_spill] sm:$0xff] }
 0x18e   : > { %v1398_v62 = vadd.f32 %v1314_v49, %v1241_v63  ;;  %v1473_v49 = vpop.f32.mrf.mxu1 }
 0x18f   : > { %4335 = vmatmul.msk.f32.gmra.mxu0 %vm467_vm1, %v7806_v58  ;;  %4401 = vmatmul.msk.f32.gmra.mxu2 %vm467_vm1, %v4626_v12 }
 0x190   : > { %v1554_v45 = vadd.f32 %v1470_v24, %v1398_v62  ;;  %4302 = vmatmul.msk.f32.gmra.mxu3 %vm467_vm1, %v4624_v54  ;;  %v4627_v62 = vld [vmem:[%s4711_s15 + $0x150] sm:$0xff] }
 0x192   : > { %v5621_v19 = vadd.f32 %v1623_v22, %v1554_v45  ;;  %v1626_v24 = vpop.f32.mrf.mxu2 }
 0x193   : > { %v1160_v27 = vpop.f32.mrf.mxu3 }
 0x194   : > { %7807 = vst [vmem:[#allocation46_spill] sm:$0xff] %v5621_v19  ;;  %v1242_v7 = vadd.f32 %v1160_v27, %v5312_v10  ;;  %v1320_v53 = vpop.f32.mrf.mxu0  ;;  %4369 = vmatmul.msk.f32.gmra.mxu1 %vm467_vm1, %v7808_v48  ;;  %v7810_v19 = vld [vmem:[#allocation34_spill] sm:$0xff] }
 0x196   : > { %v1399_v63 = vadd.f32 %v1317_v26, %v1242_v7  ;;  %v4485_v26 = vld [vmem:[%s7622_s3 + $0xc8] sm:$0xff] }
 0x197   : > { %4336 = vmatmul.msk.f32.gmra.mxu0 %vm467_vm1, %v7809_v41  ;;  %4402 = vmatmul.msk.f32.gmra.mxu2 %vm467_vm1, %v4627_v62 }
 0x198   : > { %v1555_v54 = vadd.f32 %v1473_v49, %v1399_v63  ;;  %4303 = vmatmul.msk.f32.gmra.mxu3 %vm467_vm1, %v4625_v42  ;;  %2304 = vmatpush.msra.mxu1 %v4485_v26  ;;  %v7811_v42 = vld [vmem:[#allocation7_spill] sm:$0xff]  ;;  %v4628_v49 = vld [vmem:[%s4711_s15 + $0x158] sm:$0xff] }
 0x19a   : > { %v5631_v22 = vadd.f32 %v1626_v24, %v1555_v54  ;;  %v7812_v54 = vld [vmem:[#allocation40_spill] sm:$0xff] }
 0x19b   : > { %v1163_v10 = vpop.f32.mrf.mxu3 }
 0x19c   : > { %v1243_v45 = vadd.f32 %v1163_v10, %v5325_v9  ;;  %v1323_v27 = vpop.f32.mrf.mxu0  ;;  %4370 = vmatmul.msk.f32.gmra.mxu1 %vm467_vm1, %v7810_v19 }
 0x19e   : > { %v5639_v7 = vadd.f32 %v1320_v53, %v1243_v45  ;;  %v7814_v53 = vld [vmem:[#allocation8_spill] sm:$0xff]  ;;  %v4629_v45 = vld [vmem:[%s4711_s15 + $0x168] sm:$0xff] }
 0x19f   : > { %4337 = vmatmul.msk.f32.gmra.mxu0 %vm467_vm1, %v7811_v42  ;;  %4403 = vmatmul.msk.f32.gmra.mxu2 %vm467_vm1, %v4628_v49 }
 0x1a0   : > { %4304 = vmatmul.msk.f32.gmra.mxu3 %vm467_vm1, %v4626_v12 }
 0x1a3   : > { %v1166_v9 = vpop.f32.mrf.mxu3 }
 0x1a4   : > { %v1244_v63 = vadd.f32 %v1166_v9, %v5338_v32  ;;  %v1326_v24 = vpop.f32.mrf.mxu0  ;;  %4371 = vmatmul.msk.f32.gmra.mxu1 %vm467_vm1, %v7812_v54  ;;  %v7815_v9 = vld [vmem:[#allocation44_spill] sm:$0xff]  ;;  %v329_v54 = vld [vmem:[%s4711_s15 + $0x180] sm:$0xff] }
 0x1a6   : > { %v5649_v10 = vadd.f32 %v1323_v27, %v1244_v63  ;;  %v4484_v27 = vld [vmem:[%s7622_s3 + $0xc0] sm:$0xff] }
 0x1a7   : > { %4338 = vmatmul.msk.f32.gmra.mxu0 %vm467_vm1, %v7814_v53  ;;  %4404 = vmatmul.msk.f32.gmra.mxu2 %vm467_vm1, %v4629_v45  ;;  %v7818_v53 = vld [vmem:[#allocation49_spill] sm:$0xff] }
 0x1a8   : > { %7813 = vst [vmem:[#allocation32_spill] sm:$0xff] %v5649_v10  ;;  %4305 = vmatmul.msk.f32.gmra.mxu3 %vm467_vm1, %v4627_v62  ;;  %2305 = vmatpush.msra.mxu1 %v4484_v27  ;;  %v7817_v10 = vld [vmem:[#allocation9_spill] sm:$0xff]  ;;  %v4630_v62 = vld [vmem:[%s4711_s15 + $0x170] sm:$0xff] }
 0x1ab   : > { %v1169_v12 = vpop.f32.mrf.mxu3 }
 0x1ac   : > { %v1245_v26 = vadd.f32 %v1169_v12, %v5351_v37  ;;  %v1329_v32 = vpop.f32.mrf.mxu0  ;;  %4372 = vmatmul.msk.f32.gmra.mxu1 %vm467_vm1, %v7815_v9 }
 0x1ae   : > { %v5662_v63 = vadd.f32 %v1326_v24, %v1245_v26  ;;  %v7820_v24 = vld [vmem:[#allocation10_spill] sm:$0xff] }
 0x1af   : > { %4339 = vmatmul.msk.f32.gmra.mxu0 %vm467_vm1, %v7817_v10  ;;  %4405 = vmatmul.msk.f32.gmra.mxu2 %vm467_vm1, %v4630_v62  ;;  %v330_v10 = vld [vmem:[%s4711_s15 + $0x188] sm:$0xff] }
 0x1b0   : > { %7816 = vst [vmem:[#allocation43_spill] sm:$0xff] %v5662_v63  ;;  %4306 = vmatmul.msk.f32.gmra.mxu3 %vm467_vm1, %v4628_v49 }
 0x1b3   : > { %v1172_v37 = vpop.f32.mrf.mxu3 }
 0x1b4   : > { %v1246_v12 = vadd.f32 %v1172_v37, %v5364_v36  ;;  %v1332_v9 = vpop.f32.mrf.mxu0  ;;  %4373 = vmatmul.msk.f32.gmra.mxu1 %vm467_vm1, %v7818_v53  ;;  %v4483_v36 = vld [vmem:[%s7622_s3 + $0xb8] sm:$0xff]  ;;  %v1425_v37 = vrot.slane %v330_v10, 2 }
 0x1b5   : > { %2306 = vmatpush.msra.mxu1 %v4483_v36 }
 0x1b6   : > { %v5673_v27 = vadd.f32 %v1329_v32, %v1246_v12  ;;  %v1424_v32 = vrot.slane %v329_v54, 2  ;;  %v7822_v12 = vld [vmem:[#allocation11_spill] sm:$0xff] }
 0x1b7   : > { %4340 = vmatmul.msk.f32.gmra.mxu0 %vm467_vm1, %v7820_v24  ;;  %4406 = vmatmul.msk.f32.gmra.mxu2 %vm467_vm1, %v329_v54 }
 0x1b8   : > { %7819 = vst [vmem:[#allocation38_spill] sm:$0xff] %v5673_v27  ;;  %4307 = vmatmul.msk.f32.gmra.mxu3 %vm467_vm1, %v4629_v45  ;;  %v5696_v27 = vsel %vm822_vm2, %v1424_v32, %v1425_v37 }
 0x1b9   : > { %7823 = vst [vmem:[#allocation42_spill] sm:$0xff] %v5696_v27 }
 0x1bb   : > { %v1175_v49 = vpop.f32.mrf.mxu3 }
 0x1bc   : > { %v1247_v26 = vadd.f32 %v1175_v49, %v5377_v44  ;;  %v1335_v63 = vpop.f32.mrf.mxu0  ;;  %4374 = vmatmul.msk.f32.gmra.mxu1 %vm467_vm1, %v5299_v6  ;;  %v1268_v44 = vrot.slane %v329_v54, 1  ;;  %v1269_v49 = vrot.slane %v330_v10, 1  ;;  %v2248_v6 = vld [vmem:[%s7622_s3 + $0x78] sm:$0xff] }
 0x1bd   : > { %2411 = vmatpush.msra.mxu2 %v2248_v6 }
 0x1be   : > { %v5686_v45 = vadd.f32 %v1332_v9, %v1247_v26 }
 0x1bf   : > { %4341 = vmatmul.msk.f32.gmra.mxu0 %vm467_vm1, %v7822_v12  ;;  %4407 = vmatmul.msk.f32.gmra.mxu2 %vm467_vm1, %v330_v10  ;;  %v331_v12 = vld [vmem:[%s4711_s15 + $0x190] sm:$0x3] }
 0x1c0   : > { %7821 = vst [vmem:[#allocation48_spill] sm:$0xff] %v5686_v45  ;;  %4308 = vmatmul.msk.f32.gmra.mxu3 %vm467_vm1, %v4630_v62  ;;  %v5700_v45 = vsel %vm384_vm0, %v1268_v44, %v1269_v49  ;;  %v5706_v62 = vld [vmem:[%s4711_s15 + $0x198] sm:$0xff]  ;;  %v1427_v24 = vrot.slane %v331_v12, 2  ;;  %v1271_v6 = vrot.slane %v331_v12, 1 }
 0x1c3   : > { %v1178_v36 = vpop.f32.mrf.mxu3 }
 0x1c4   : > { %v1248_v9 = vadd.f32 %v1178_v36, %v5390_v15  ;;  %v1338_v26 = vpop.f32.mrf.mxu0  ;;  %4375 = vmatmul.msk.f32.gmra.mxu1 %vm467_vm1, %v5696_v27  ;;  %v5716_v15 = vsel %vm822_vm2, %v1425_v37, %v1427_v24  ;;  %v5720_v27 = vsel %vm384_vm0, %v1269_v49, %v1271_v6 }
 0x1c6   : > { %v5708_v53 = vadd.f32 %v1335_v63, %v1248_v9  ;;  %v5728_v63 = vld [vmem:[%s4711_s15 + $0x1a0] sm:$0xff] }
 0x1c7   : > { %4342 = vmatmul.msk.f32.gmra.mxu0 %vm467_vm1, %v5700_v45  ;;  %4408 = vmatmul.msk.f32.gmra.mxu2 %vm467_vm1, %v5706_v62 }
 0x1c8   : > { %4309 = vmatmul.msk.f32.gmra.mxu3 %vm467_vm1, %v329_v54  ;;  %v4482_v54 = vld [vmem:[%s7622_s3 + $0xb0] sm:$0xff] }
 0x1c9   : > { %2307 = vmatpush.msra.mxu1 %v4482_v54 }
 0x1cb   : > { %v1181_v32 = vpop.f32.mrf.mxu3 }
 0x1cc   : > { %v1249_v44 = vadd.f32 %v1181_v32, %v5403_v38  ;;  %v1341_v36 = vpop.f32.mrf.mxu0  ;;  %4376 = vmatmul.msk.f32.gmra.mxu1 %vm467_vm1, %v5716_v15  ;;  %v2247_v38 = vld [vmem:[%s7622_s3 + $0x70] sm:$0xff]  ;;  %v4481_v32 = vld [vmem:[%s7622_s3 + $0xa8] sm:$0xff] }
 0x1cd   : > { %2412 = vmatpush.msra.mxu2 %v2247_v38  ;;  %2308 = vmatpush.msra.mxu1 %v4481_v32 }
 0x1ce   : > { %v5730_v12 = vadd.f32 %v1338_v26, %v1249_v44 }
 0x1cf   : > { %4343 = vmatmul.msk.f32.gmra.mxu0 %vm467_vm1, %v5720_v27  ;;  %4409 = vmatmul.msk.f32.gmra.mxu2 %vm467_vm1, %v5728_v63 }
 0x1d0   : > { %4310 = vmatmul.msk.f32.gmra.mxu3 %vm467_vm1, %v330_v10 }
 0x1d3   : > { %v1184_v24 = vpop.f32.mrf.mxu3 }
 0x1d4   : > { %v1250_v37 = vadd.f32 %v1184_v24, %v5416_v46  ;;  %v1344_v49 = vpop.f32.mrf.mxu0  ;;  %v5753_v46 = vpop.f32.mrf.mxu1 }
 0x1d6   : > { %v5741_v9 = vadd.f32 %v1341_v36, %v1250_v37  ;;  %v4480_v37 = vld [vmem:[%s7622_s3 + $0xa0] sm:$0xff] }
 0x1d7   : > { %4444 = vmatmul.msk.f32.vlgmr.msra.gmra.mxu0 %vm467_vm1, %v4832_v59  ;;  %2309 = vmatpush.msra.mxu1 %v4480_v37 }
 0x1d8   : > { %4411 = vmatmul.msk.f32.vlgmr.msra.gmra.mxu3 %vm467_vm1, %v4824_v57  ;;  %v2246_v57 = vld [vmem:[%s7622_s3 + $0x68] sm:$0xff] }
 0x1d9   : > { %2413 = vmatpush.msra.mxu2 %v2246_v57 }
 0x1db   : > { %v1187_v10 = vpop.f32.mrf.mxu3 }
 0x1dc   : > { %v1251_v26 = vadd.f32 %v1187_v10, %v5429_v28  ;;  %v1347_v6 = vpop.f32.mrf.mxu0 }
 0x1de   : > { %v5751_v44 = vadd.f32 %v1344_v49, %v1251_v26  ;;  %v5777_v49 = vpop.f32.mrf.mxu2 }
 0x1df   : > { %4445 = vmatmul.msk.f32.gmra.mxu0 %vm467_vm1, %v4854_v3  ;;  %v5769_v3 = vpop.f32.mrf.mxu1 }
 0x1e0   : > { %4412 = vmatmul.msk.f32.gmra.mxu3 %vm467_vm1, %v4846_v1 }
 0x1e3   : > { %v1190_v59 = vpop.f32.mrf.mxu3 }
 0x1e4   : > { %v1252_v28 = vadd.f32 %v1190_v59, %v5442_v21  ;;  %v1350_v36 = vpop.f32.mrf.mxu0  ;;  %v4479_v59 = vld [vmem:[%s7622_s3 + $0x98] sm:$0xff] }
 0x1e5   : > { %2310 = vmatpush.msra.mxu1 %v4479_v59 }
 0x1e6   : > { %v5763_v54 = vadd.f32 %v1347_v6, %v1252_v28 }
 0x1e7   : > { %4446 = vmatmul.msk.f32.gmra.mxu0 %vm467_vm1, %v4889_v20  ;;  %v5786_v20 = vpop.f32.mrf.mxu1 }
 0x1e8   : > { %4413 = vmatmul.msk.f32.gmra.mxu3 %vm467_vm1, %v4881_v16  ;;  %v2245_v16 = vld [vmem:[%s7622_s3 + $0x60] sm:$0xff] }
 0x1e9   : > { %2414 = vmatpush.msra.mxu2 %v2245_v16  ;;  %v4478_v16 = vld [vmem:[%s7622_s3 + $0x90] sm:$0xff] }
 0x1ea   : > { %2311 = vmatpush.msra.mxu1 %v4478_v16 }
 0x1eb   : > { %v1193_v1 = vpop.f32.mrf.mxu3 }
 0x1ec   : > { %v1253_v38 = vadd.f32 %v1193_v1, %v5455_v2  ;;  %v1353_v24 = vpop.f32.mrf.mxu0 }
 0x1ee   : > { %v5775_v21 = vadd.f32 %v1350_v36, %v1253_v38 }
 0x1ef   : > { %4447 = vmatmul.msk.f32.gmra.mxu0 %vm467_vm1, %v4911_v33 }
 0x1f0   : > { %4414 = vmatmul.msk.f32.gmra.mxu3 %vm467_vm1, %v4903_v31  ;;  %v5795_v31 = vpop.f32.mrf.mxu2 }
 0x1f3   : > { %v1196_v2 = vpop.f32.mrf.mxu3 }
 0x1f4   : > { %v1254_v10 = vadd.f32 %v1196_v2, %v5468_v34  ;;  %v1356_v26 = vpop.f32.mrf.mxu0  ;;  %v5801_v34 = vpop.f32.mrf.mxu1 }
 0x1f6   : > { %v5789_v6 = vadd.f32 %v1353_v24, %v1254_v10 }
 0x1f7   : > { %4448 = vmatmul.msk.f32.gmra.mxu0 %vm467_vm1, %v4935_v52 }
 0x1f8   : > { %4415 = vmatmul.msk.f32.gmra.mxu3 %vm467_vm1, %v4930_v51  ;;  %v2244_v51 = vld [vmem:[%s7622_s3 + $0x58] sm:$0xff]  ;;  %v5812_v52 = vpop.f32.mrf.mxu2 }
 0x1f9   : > { %2415 = vmatpush.msra.mxu2 %v2244_v51  ;;  %v4477_v51 = vld [vmem:[%s7622_s3 + $0x88] sm:$0xff] }
 0x1fa   : > { %2312 = vmatpush.msra.mxu1 %v4477_v51  ;;  %v7832_v51 = vld [vmem:[#allocation53_spill] sm:$0xff] }
 0x1fb   : > { %v1199_v33 = vpop.f32.mrf.mxu3 }
 0x1fc   : > { %v1255_v32 = vadd.f32 %v1199_v33, %v5481_v11  ;;  %v1359_v57 = vpop.f32.mrf.mxu0  ;;  %v5817_v24 = vpop.f32.mrf.mxu1 }
 0x1fe   : > { %v5803_v28 = vadd.f32 %v1356_v26, %v1255_v32 }
 0x1ff   : > { %4449 = vmatmul.msk.f32.gmra.mxu0 %vm467_vm1, %v4950_v60 }
 0x200   : > { %4416 = vmatmul.msk.f32.gmra.mxu3 %vm467_vm1, %v4945_v56 }
 0x203   : > { %v1202_v11 = vpop.f32.mrf.mxu3 }
 0x204   : > { %v1256_v36 = vadd.f32 %v1202_v11, %v5497_v23  ;;  %v1362_v1 = vpop.f32.mrf.mxu0  ;;  %v5827_v23 = vpop.f32.mrf.mxu2  ;;  %v2240_v11 = vld [vmem:[%s7622_s3 + $0x38] sm:$0xff] }
 0x206   : > { %v5815_v38 = vadd.f32 %v1359_v57, %v1256_v36 }
 0x207   : > { %4450 = vmatmul.msk.f32.gmra.mxu0 %vm467_vm1, %v4974_v14  ;;  %v5838_v14 = vpop.f32.mrf.mxu1 }
 0x208   : > { %7824 = vst [vmem:[#allocation47_spill] sm:$0xff] %v5815_v38  ;;  %4417 = vmatmul.msk.f32.gmra.mxu3 %vm467_vm1, %v4969_v13  ;;  %v2243_v13 = vld [vmem:[%s7622_s3 + $0x50] sm:$0xff] }
 0x209   : > { %2416 = vmatpush.msra.mxu2 %v2243_v13 }
 0x20b   : > { %v1205_v56 = vpop.f32.mrf.mxu3 }
 0x20c   : > { %v1257_v60 = vadd.f32 %v1205_v56, %v5510_v35  ;;  %v1365_v37 = vpop.f32.mrf.mxu0  ;;  %v5843_v32 = vpop.f32.mrf.mxu2 }
 0x20e   : > { %v5829_v2 = vadd.f32 %v1362_v1, %v1257_v60  ;;  %v2238_v1 = vld [vmem:[%s7622_s3 + $0x28] sm:$0xff]  ;;  %v7828_v60 = vld [vmem:[#allocation52_spill] sm:$0xff] }
 0x20f   : > { %4451 = vmatmul.msk.f32.gmra.mxu0 %vm467_vm1, %v4989_v30  ;;  %v5852_v30 = vpop.f32.mrf.mxu1 }
 0x210   : > { %7825 = vst [vmem:[#allocation21_spill] sm:$0xff] %v5829_v2  ;;  %4418 = vmatmul.msk.f32.gmra.mxu3 %vm467_vm1, %v4984_v25  ;;  %v2242_v25 = vld [vmem:[%s7622_s3 + $0x48] sm:$0xff] }
 0x211   : > { %2417 = vmatpush.msra.mxu2 %v2242_v25  ;;  %v2235_v25 = vld [vmem:[%s7622_s3 + $0x10] sm:$0xff] }
 0x213   : > { %v1208_v35 = vpop.f32.mrf.mxu3 }
 0x214   : > { %v1258_v10 = vadd.f32 %v1208_v35, %v5526_v18  ;;  %v1368_v26 = vpop.f32.mrf.mxu0  ;;  %v5873_v36 = vpop.f32.mrf.mxu2  ;;  %v2236_v35 = vld [vmem:[%s7622_s3 + $0x18] sm:$0xff] }
 0x216   : > { %v5841_v33 = vadd.f32 %v1365_v37, %v1258_v10  ;;  %v7830_v10 = vld [vmem:[#allocation16_spill] sm:$0xff] }
 0x217   : > { %4452 = vmatmul.msk.f32.gmra.mxu0 %vm467_vm1, %v5013_v0  ;;  %v2241_v0 = vld [vmem:[%s7622_s3 + $0x40] sm:$0xff]  ;;  %v5882_v16 = vpop.f32.mrf.mxu1 }
 0x218   : > { %7826 = vst [vmem:[#allocation4_spill] sm:$0xff] %v5841_v33  ;;  %4419 = vmatmul.msk.f32.gmra.mxu3 %vm467_vm1, %v5008_v55  ;;  %2418 = vmatpush.msra.mxu2 %v2241_v0 }
 0x21a   : > { %2419 = vmatpush.msra.mxu2 %v2240_v11 }
 0x21b   : > { %v1211_v57 = vpop.f32.mrf.mxu3 }
 0x21c   : > { %v1259_v18 = vadd.f32 %v1211_v57, %v5427_v47  ;;  %v1371_v59 = vpop.f32.mrf.mxu0  ;;  %v2239_v47 = vld [vmem:[%s7622_s3 + $0x30] sm:$0xff]  ;;  %v2234_v57 = vld [vmem:[%s7622_s3 + $0x8] sm:$0xff] }
 0x21d   : > { %2420 = vmatpush.msra.mxu2 %v2239_v47  ;;  %v4476_v47 = vld [vmem:[%s7622_s3 + $0x80] sm:$0xff] }
 0x21e   : > { %v5861_v55 = vadd.f32 %v1368_v26, %v1259_v18  ;;  %v7831_v26 = vld [vmem:[#allocation15_spill] sm:$0xff]  ;;  %v5899_v18 = vpop.f32.mrf.mxu2  ;;  %2313 = vmatpush.msra.mxu1 %v4476_v47  ;;  %v7838_v47 = vld [vmem:[#allocation22_spill] sm:$0xff] }
 0x21f   : > { %4453 = vmatmul.msk.f32.gmra.mxu0 %vm467_vm1, %v7762_v43  ;;  %2421 = vmatpush.msra.mxu2 %v2238_v1  ;;  %v2233_v1 = vld [vmem:[%s7622_s3] sm:$0xff] }
 0x220   : > { %7827 = vst [vmem:[#allocation5_spill] sm:$0xff] %v5861_v55  ;;  %4420 = vmatmul.msk.f32.gmra.mxu3 %vm467_vm1, %v7763_v61  ;;  %v2237_v61 = vld [vmem:[%s7622_s3 + $0x20] sm:$0xff] }
 0x221   : > { %2422 = vmatpush.msra.mxu2 %v2237_v61  ;;  %v7834_v61 = vld [vmem:[#allocation18_spill] sm:$0xff] }
 0x223   : > { %v1214_v56 = vpop.f32.mrf.mxu3  ;;  %2423 = vmatpush.msra.mxu2 %v2236_v35  ;;  %v7835_v35 = vld [vmem:[#allocation17_spill] sm:$0xff] }
 0x224   : > { %v1260_v37 = vadd.f32 %v1214_v56, %v7828_v60  ;;  %v1374_v43 = vpop.f32.mrf.mxu0  ;;  %v4641_v56 = vmov 0.0  }
 0x225   : > { %2424 = vmatpush.msra.mxu2 %v2235_v25  ;;  %2114 = vst [vmem:[#allocation2] sm:$0xff] %v4641_v56 }
 0x226   : > { %v5884_v13 = vadd.f32 %v1371_v59, %v1260_v37  ;;  %2115 = vst [vmem:[#allocation2 + $0x8] sm:$0xff] %v4641_v56  ;;  %v5914_v37 = vpop.f32.mrf.mxu1 }
 0x227   : > { %4454 = vmatmul.msk.f32.gmra.mxu0 %vm467_vm1, %v7830_v10  ;;  %2425 = vmatpush.msra.mxu2 %v2234_v57  ;;  %2116 = vst [vmem:[#allocation2 + $0x10] sm:$0x3] %v4641_v56 }
 0x228   : > { %7829 = vst [vmem:[#allocation30_spill] sm:$0xff] %v5884_v13  ;;  %4421 = vmatmul.msk.f32.gmra.mxu3 %vm467_vm1, %v7831_v26  ;;  %v7836_v26 = vld [vmem:[#allocation13_spill] sm:$0xff] }
 0x229   : > { %2426 = vmatpush.msra.mxu2 %v2233_v1  ;;  %2117 = vst [vmem:[#allocation2 + $0x18] sm:$0xff] %v4641_v56  ;;  %v7839_v1 = vld [vmem:[#allocation20_spill] sm:$0xff] }
 0x22a   : > { %2427 = vmatmul.f32.vlgmr.msra.gmra.mxu2 %v4641_v56  ;;  %2118 = vst [vmem:[#allocation2 + $0x20] sm:$0xff] %v4641_v56 }
 0x22b   : > { %v1217_v59 = vpop.f32.mrf.mxu3  ;;  %2119 = vst [vmem:[#allocation2 + $0x28] sm:$0x3] %v4641_v56 }
 0x22c   : > { %v1261_v0 = vadd.f32 %v1217_v59, %v7832_v51  ;;  %v1377_v11 = vpop.f32.mrf.mxu0  ;;  %2120 = vst [vmem:[#allocation2 + $0x30] sm:$0xff] %v4641_v56  ;;  %v5930_v51 = vpop.f32.mrf.mxu2 }
 0x22d   : > { %2121 = vst [vmem:[#allocation2 + $0x38] sm:$0xff] %v4641_v56  ;;  %v2249_v59 = vld [vmem:[#allocation2 + $0x1] sm:$0xff] }
 0x22e   : > { %v5910_v60 = vadd.f32 %v1374_v43, %v1261_v0  ;;  %v4507_v43 = vld [vmem:[%s7622_s3 + $0x178] sm:$0xff]  ;;  %2122 = vst [vmem:[#allocation2 + $0x40] sm:$0x3] %v4641_v56  ;;  %2314 = vmatmul.f32.vlgmr.msra.gmra.mxu1 %v2249_v59 }
 0x22f   : > { %4455 = vmatmul.msk.f32.gmra.mxu0 %vm467_vm1, %v7834_v61  ;;  %2573 = vmatpush.msrb.mxu3 %v4507_v43  ;;  %2123 = vst [vmem:[#allocation2 + $0x48] sm:$0xff] %v4641_v56  ;;  %v5943_v61 = vpop.f32.mrf.mxu1  ;;  %v7840_v43 = vld [vmem:[#allocation12_spill] sm:$0xff] }
 0x230   : > { %7833 = vst [vmem:[#allocation6_spill] sm:$0xff] %v5910_v60  ;;  %4422 = vmatmul.msk.f32.gmra.mxu3 %vm467_vm1, %v7835_v35  ;;  %v2250_v35 = vld [vmem:[#allocation2 + $0x9] sm:$0xff] }
 0x231   : > { %2124 = vst [vmem:[#allocation2 + $0x50] sm:$0xff] %v4641_v56  ;;  %v7850_v60 = vld [vmem:[#allocation35_spill] sm:$0xff] }
 0x232   : > { %2430 = vmatmul.f32.gmra.mxu2 %v4641_v56  ;;  %2125 = vst [vmem:[#allocation2 + $0x58] sm:$0x3] %v4641_v56 }
 0x233   : > { %v1220_v10 = vpop.f32.mrf.mxu3  ;;  %2126 = vst [vmem:[#allocation2 + $0x60] sm:$0xff] %v4641_v56 }
 0x234   : > { %v1262_v25 = vadd.f32 %v1220_v10, %v7836_v26  ;;  %v1380_v57 = vpop.f32.mrf.mxu0  ;;  %2127 = vst [vmem:[#allocation2 + $0x68] sm:$0xff] %v4641_v56  ;;  %v5954_v59 = vpop.f32.mrf.mxu2 }
 0x235   : > { %2128 = vst [vmem:[#allocation2 + $0x70] sm:$0x3] %v4641_v56 }
 0x236   : > { %v5933_v0 = vadd.f32 %v1377_v11, %v1262_v25  ;;  %2129 = vst [vmem:[#allocation2 + $0x78] sm:$0xff] %v4641_v56  ;;  %2317 = vmatmul.f32.gmra.mxu1 %v2250_v35 }
 0x237   : > { %4456 = vmatmul.msk.f32.gmra.mxu0 %vm467_vm1, %v7838_v47  ;;  %2130 = vst [vmem:[#allocation2 + $0x80] sm:$0xff] %v4641_v56  ;;  %v7842_v47 = vld [vmem:[#allocation26_spill] sm:$0xff] }
 0x238   : > { %7837 = vst [vmem:[#allocation34_spill] sm:$0xff] %v5933_v0  ;;  %4423 = vmatmul.msk.f32.gmra.mxu3 %vm467_vm1, %v7839_v1  ;;  %v7843_v1 = vld [vmem:[#allocation24_spill] sm:$0xff] }
 0x239   : > { %2131 = vst [vmem:[#allocation2 + $0x88] sm:$0x3] %v4641_v56 }
 0x23a   : > { %2132 = vst [vmem:[#allocation2 + $0x90] sm:$0xff] %v4641_v56 }
 0x23b   : > { %v1223_v11 = vpop.f32.mrf.mxu3  ;;  %2133 = vst [vmem:[#allocation2 + $0x98] sm:$0xff] %v4641_v56 }
 0x23c   : > { %v1263_v10 = vadd.f32 %v1223_v11, %v7840_v43  ;;  %v1383_v26 = vpop.f32.mrf.mxu0  ;;  %2134 = vst [vmem:[#allocation2 + $0xa0] sm:$0x3] %v4641_v56  ;;  %v5967_v11 = vpop.f32.mrf.mxu1  ;;  %v7844_v43 = vld [vmem:[#allocation14_spill] sm:$0xff] }
 0x23d   : > { %2135 = vst [vmem:[#allocation2 + $0xa8] sm:$0xff] %v4641_v56  ;;  %v5988_v0 = vpop.f32.mrf.mxu2 }
 0x23e   : > { %v5951_v25 = vadd.f32 %v1380_v57, %v1263_v10  ;;  %v4523_v57 = vld [vmem:[%s7622_s3 + $0x1f8] sm:$0xff]  ;;  %2136 = vst [vmem:[#allocation2 + $0xb0] sm:$0xff] %v4641_v56 }
 0x23f   : > { %4457 = vmatmul.msk.f32.gmra.mxu0 %vm467_vm1, %v7842_v47  ;;  %2137 = vst [vmem:[#allocation2 + $0xb8] sm:$0x3] %v4641_v56 }
 0x240   : > { %7841 = vst [vmem:[#allocation7_spill] sm:$0xff] %v5951_v25  ;;  %4424 = vmatmul.msk.f32.gmra.mxu3 %vm467_vm1, %v7843_v1  ;;  %2767 = vmatpush.msrb.mxu0 %v4523_v57  ;;  %v4539_v1 = vld [vmem:[%s7622_s3 + $0x278] sm:$0xff]  ;;  %v4506_v25 = vld [vmem:[%s7622_s3 + $0x170] sm:$0xff] }
 0x241   : > { %2138 = vst [vmem:[#allocation2 + $0xc0] sm:$0xff] %v4641_v56  ;;  %2961 = vmatpush.msrb.mxu1 %v4539_v1  ;;  %2574 = vmatpush.msrb.mxu3 %v4506_v25  ;;  %v7848_v25 = vld [vmem:[#allocation19_spill] sm:$0xff] }
 0x242   : > { %2139 = vst [vmem:[#allocation2 + $0xc8] sm:$0xff] %v4641_v56 }
 0x243   : > { %v1226_v35 = vpop.f32.mrf.mxu3  ;;  %2140 = vst [vmem:[#allocation2 + $0xd0] sm:$0x3] %v4641_v56 }
 0x244   : > { %v1264_v10 = vadd.f32 %v1226_v35, %v7844_v43  ;;  %v1386_v47 = vpop.f32.mrf.mxu0  ;;  %v7846_v35 = vld [vmem:[#allocation31_spill] sm:$0xff]  ;;  %2141 = vst [vmem:[#allocation2 + $0xd8] sm:$0xff] %v4641_v56  ;;  %v7847_v43 = vld [vmem:[#allocation29_spill] sm:$0xff] }
 0x245   : > { %2142 = vst [vmem:[#allocation2 + $0xe0] sm:$0xff] %v4641_v56 }
 0x246   : > { %v5979_v57 = vadd.f32 %v1383_v26, %v1264_v10  ;;  %2143 = vst [vmem:[#allocation2 + $0xe8] sm:$0x3] %v4641_v56 }
 0x247   : > { %4458 = vmatmul.msk.f32.gmra.mxu0 %vm467_vm1, %v7846_v35  ;;  %2144 = vst [vmem:[#allocation2 + $0xf0] sm:$0xff] %v4641_v56  ;;  %v4522_v35 = vld [vmem:[%s7622_s3 + $0x1f0] sm:$0xff] }
 0x248   : > { %7845 = vst [vmem:[#allocation52_spill] sm:$0xff] %v5979_v57  ;;  %4425 = vmatmul.msk.f32.gmra.mxu3 %vm467_vm1, %v7847_v43  ;;  %v5998_v43 = vpop.f32.mrf.mxu1  ;;  %2768 = vmatpush.msrb.mxu0 %v4522_v35 }
 0x249   : > { %2145 = vst [vmem:[#allocation2 + $0xf8] sm:$0xff] %v4641_v56 }
 0x24a   : > { %2146 = vst [vmem:[#allocation2 + $0x100] sm:$0x3] %v4641_v56 }
 0x24b   : > { %v1229_v26 = vpop.f32.mrf.mxu3  ;;  %2147 = vst [vmem:[#allocation2 + $0x108] sm:$0xff] %v4641_v56 }
 0x24c   : > { %v1265_v10 = vadd.f32 %v1229_v26, %v7848_v25  ;;  %v1389_v1 = vpop.f32.mrf.mxu0  ;;  %2148 = vst [vmem:[#allocation2 + $0x110] sm:$0xff] %v4641_v56  ;;  %v7851_v26 = vld [vmem:[#allocation33_spill] sm:$0xff]  ;;  %v6012_v25 = vpop.f32.mrf.mxu2 }
 0x24d   : > { %2149 = vst [vmem:[#allocation2 + $0x118] sm:$0x3] %v4641_v56 }
 0x24e   : > { %v6001_v57 = vadd.f32 %v1386_v47, %v1265_v10  ;;  %2150 = vst [vmem:[#allocation2 + $0x120] sm:$0xff] %v4641_v56  ;;  %v7852_v10 = vld [vmem:[#allocation27_spill] sm:$0xff] }
 0x24f   : > { %4459 = vmatmul.msk.f32.gmra.mxu0 %vm467_vm1, %v7850_v60  ;;  %2151 = vst [vmem:[#allocation2 + $0x128] sm:$0xff] %v4641_v56  ;;  %v4538_v60 = vld [vmem:[%s7622_s3 + $0x270] sm:$0xff] }
 0x250   : > { %7849 = vst [vmem:[#allocation16_spill] sm:$0xff] %v6001_v57  ;;  %4426 = vmatmul.msk.f32.gmra.mxu3 %vm467_vm1, %v7851_v26  ;;  %v4505_v26 = vld [vmem:[%s7622_s3 + $0x168] sm:$0xff]  ;;  %2962 = vmatpush.msrb.mxu1 %v4538_v60 }
 0x251   : > { %2152 = vst [vmem:[#allocation2 + $0x130] sm:$0x3] %v4641_v56  ;;  %2575 = vmatpush.msrb.mxu3 %v4505_v26 }
 0x252   : > { %2153 = vst [vmem:[#allocation2 + $0x138] sm:$0xff] %v4641_v56 }
 0x253   : > { %v1232_v47 = vpop.f32.mrf.mxu3  ;;  %2154 = vst [vmem:[#allocation2 + $0x140] sm:$0xff] %v4641_v56 }
 0x254   : > { %v1266_v35 = vadd.f32 %v1232_v47, %v7852_v10  ;;  %v1918_v57 = vpop.f32.mrf.mxu0  ;;  %2155 = vst [vmem:[#allocation2 + $0x148] sm:$0x3] %v4641_v56  ;;  %v6027_v47 = vpop.f32.mrf.mxu1  ;;  %v7854_v10 = vld [vmem:[#allocation36_spill] sm:$0xff] }
 0x255   : > { %2156 = vst [vmem:[#allocation2 + $0x150] sm:$0xff] %v4641_v56  ;;  %v6048_v26 = vpop.f32.mrf.mxu2 }
 0x256   : > { %v6025_v13 = vadd.f32 %v1389_v1, %v1266_v35  ;;  %2157 = vst [vmem:[#allocation2 + $0x158] sm:$0xff] %v4641_v56 }
 0x257   : > { %4460 = vmatmul.msk.f32.gmra.mxu0 %vm467_vm1, %v7788_v5  ;;  %2158 = vst [vmem:[#allocation2 + $0x160] sm:$0x3] %v4641_v56  ;;  %v6043_v5 = vld [vmem:[%s7621_s2] ss:$0 sm:$0xff] }
 0x258   : > { %7853 = vst [vmem:[#allocation15_spill] sm:$0xff] %v6025_v13  ;;  %4427 = vmatmul.msk.f32.gmra.mxu3 %vm467_vm1, %v7789_v4  ;;  %v4521_v4 = vld [vmem:[%s7622_s3 + $0x1e8] sm:$0xff] }
 0x259   : > { %2159 = vst [vmem:[#allocation2 + $0x168] sm:$0xff] %v4641_v56  ;;  %2769 = vmatpush.msrb.mxu0 %v4521_v4 }
 0x25a   : > { %2160 = vst [vmem:[#allocation2 + $0x170] sm:$0xff] %v4641_v56 }
 0x25b   : > { %2161 = vst [vmem:[#allocation2 + $0x178] sm:$0x3] %v4641_v56  ;;  %v1762_v1 = vpop.f32.mrf.mxu3 }
 0x25c   : > { %2162 = vst [vmem:[#allocation2 + $0x180] sm:$0xff] %v4641_v56  ;;  %v1858_v35 = vadd.f32 %v1762_v1, %v7854_v10  ;;  %v1921_v60 = vpop.f32.mrf.mxu0  ;;  %v7855_v1 = vld [vmem:[#allocation45_spill] sm:$0xff]  ;;  %v6059_v55 = vpop.f32.mrf.mxu1 }
 0x25d   : > { %2163 = vst [vmem:[#allocation2 + $0x188] sm:$0xff] %v4641_v56 }
 0x25e   : > { %2164 = vst [vmem:[#allocation2 + $0x190] sm:$0x3] %v4641_v56  ;;  %v2014_v13 = vadd.f32 %v1918_v57, %v1858_v35  ;;  %v7857_v57 = vld [vmem:[#allocation23_spill] sm:$0xff] }
 0x25f   : > { %2165 = vst [vmem:[#allocation2 + $0x198] sm:$0xff] %v4641_v56  ;;  %4461 = vmatmul.msk.f32.gmra.mxu0 %vm467_vm1, %v7855_v1  ;;  %v4537_v1 = vld [vmem:[%s7622_s3 + $0x268] sm:$0xff] }
 0x260   : > { %2166 = vst [vmem:[#allocation2 + $0x1a0] sm:$0xff] %v4641_v56  ;;  %v2050_v10 = vadd.f32 %v6043_v5, %v2014_v13  ;;  %4428 = vmatmul.msk.f32.gmra.mxu3 %vm467_vm1, %v7794_v39  ;;  %v4504_v13 = vld [vmem:[%s7622_s3 + $0x160] sm:$0xff]  ;;  %2963 = vmatpush.msrb.mxu1 %v4537_v1 }
 0x261   : > { %7856 = vst [vmem:[#allocation53_spill] sm:$0xff] %v6059_v55  ;;  %2576 = vmatpush.msrb.mxu3 %v4504_v13  ;;  %v6069_v55 = vpop.f32.mrf.mxu2  ;;  %v7859_v1 = vld [vmem:[#allocation37_spill] sm:$0xff] }
 0x262   : > { %2167 = vst [vmem:[#allocation2 + $0x1a8] sm:$0x3] %v4641_v56  ;;  %v2082_v4 = vmax.f32 %v2050_v10, 0.0 }
 0x263   : > { %v1765_v33 = vpop.f32.mrf.mxu3 }
 0x264   : > { %2169 = vst [vmem:[#allocation2 + $0x19] sm:$0xff] %v2082_v4  ;;  %v1859_v35 = vadd.f32 %v1765_v33, %v7857_v57  ;;  %v1924_v2 = vpop.f32.mrf.mxu0  ;;  %2320 = vmatmul.f32.gmra.mxu1 %v2082_v4  ;;  %v6076_v10 = vpop.f32.mrf.mxu1 }
 0x265   : > { %7858 = vst [vmem:[#allocation18_spill] sm:$0xff] %v6076_v10 }
 0x266   : > { %v2015_v39 = vadd.f32 %v1921_v60, %v1859_v35 }
 0x267   : > { %4462 = vmatmul.msk.f32.gmra.mxu0 %vm467_vm1, %v5279_v8  ;;  %v4520_v8 = vld [vmem:[%s7622_s3 + $0x1e0] sm:$0xff] }
 0x268   : > { %v2051_v33 = vadd.f32 %v6043_v5, %v2015_v39  ;;  %4429 = vmatmul.msk.f32.gmra.mxu3 %vm467_vm1, %v7797_v50  ;;  %2770 = vmatpush.msrb.mxu0 %v4520_v8  ;;  %v7860_v39 = vld [vmem:[#allocation50_spill] sm:$0xff] }
 0x26a   : > { %v2083_v56 = vmax.f32 %v2051_v33, 0.0  ;;  %v6090_v33 = vpop.f32.mrf.mxu2 }
 0x26b   : > { %v1768_v4 = vpop.f32.mrf.mxu3  ;;  %v6078_v57 = vld [vmem:[#allocation2 + $0x18] sm:$0xff]  ;;  %7861 = vst [vmem:[#allocation17_spill] sm:$0xff] %v6090_v33 }
 0x26c   : > { %2170 = vst [vmem:[#allocation2 + $0x21] sm:$0xff] %v2083_v56  ;;  %v1860_v13 = vadd.f32 %v1768_v4, %v7859_v1  ;;  %2433 = vmatmul.f32.gmra.mxu2 %v6078_v57  ;;  %v1927_v60 = vpop.f32.mrf.mxu0  ;;  %2323 = vmatmul.f32.gmra.mxu1 %v2083_v56  ;;  %v7862_v56 = vld [vmem:[#allocation28_spill] sm:$0xff]  ;;  %v6102_v8 = vpop.f32.mrf.mxu1  ;;  %v7864_v33 = vld [vmem:[#allocation41_spill] sm:$0xff] }
 0x26d   : > { %7863 = vst [vmem:[#allocation13_spill] sm:$0xff] %v6102_v8 }
 0x26e   : > { %v2016_v35 = vadd.f32 %v1924_v2, %v1860_v13  ;;  %v4503_v13 = vld [vmem:[%s7622_s3 + $0x158] sm:$0xff] }
 0x26f   : > { %4463 = vmatmul.msk.f32.gmra.mxu0 %vm467_vm1, %v5302_v40  ;;  %v4536_v40 = vld [vmem:[%s7622_s3 + $0x260] sm:$0xff]  ;;  %2577 = vmatpush.msrb.mxu3 %v4503_v13 }
 0x270   : > { %v2052_v50 = vadd.f32 %v6043_v5, %v2016_v35  ;;  %4430 = vmatmul.msk.f32.gmra.mxu3 %vm467_vm1, %v7860_v39  ;;  %2964 = vmatpush.msrb.mxu1 %v4536_v40  ;;  %v7866_v40 = vld [vmem:[#allocation25_spill] sm:$0xff] }
 0x272   : > { %v2084_v4 = vmax.f32 %v2052_v50, 0.0 }
 0x273   : > { %v1771_v1 = vpop.f32.mrf.mxu3  ;;  %v6092_v10 = vld [vmem:[#allocation2 + $0x20] sm:$0xff] }
 0x274   : > { %2171 = vst [vmem:[#allocation2 + $0x31] sm:$0xff] %v2084_v4  ;;  %v1861_v38 = vadd.f32 %v1771_v1, %v7862_v56  ;;  %2436 = vmatmul.f32.gmra.mxu2 %v6092_v10  ;;  %v1930_v2 = vpop.f32.mrf.mxu0  ;;  %2326 = vmatmul.f32.gmra.mxu1 %v2084_v4  ;;  %v6109_v4 = vpop.f32.mrf.mxu2 }
 0x276   : > { %v2017_v35 = vadd.f32 %v1927_v60, %v1861_v38 }
 0x277   : > { %4464 = vmatmul.msk.f32.gmra.mxu0 %vm467_vm1, %v7802_v29  ;;  %v4519_v29 = vld [vmem:[%s7622_s3 + $0x1d8] sm:$0xff] }
 0x278   : > { %v2053_v50 = vadd.f32 %v6043_v5, %v2017_v35  ;;  %4431 = vmatmul.msk.f32.gmra.mxu3 %vm467_vm1, %v7803_v17  ;;  %2771 = vmatpush.msrb.mxu0 %v4519_v29  ;;  %v6118_v17 = vpop.f32.mrf.mxu1  ;;  %v4502_v29 = vld [vmem:[%s7622_s3 + $0x150] sm:$0xff] }
 0x279   : > { %7865 = vst [vmem:[#allocation22_spill] sm:$0xff] %v6118_v17  ;;  %2578 = vmatpush.msrb.mxu3 %v4502_v29  ;;  %v7869_v17 = vld [vmem:[#allocation46_spill] sm:$0xff] }
 0x27a   : > { %v2085_v39 = vmax.f32 %v2053_v50, 0.0 }
 0x27b   : > { %v1774_v1 = vpop.f32.mrf.mxu3  ;;  %v6111_v56 = vld [vmem:[#allocation2 + $0x30] sm:$0xff] }
 0x27c   : > { %2172 = vst [vmem:[#allocation2 + $0x39] sm:$0xff] %v2085_v39  ;;  %v1862_v8 = vadd.f32 %v1774_v1, %v7864_v33  ;;  %2439 = vmatmul.f32.gmra.mxu2 %v6111_v56  ;;  %v1933_v38 = vpop.f32.mrf.mxu0  ;;  %2329 = vmatmul.f32.gmra.mxu1 %v2085_v39  ;;  %v7867_v39 = vld [vmem:[#allocation39_spill] sm:$0xff] }
 0x27e   : > { %v2018_v60 = vadd.f32 %v1930_v2, %v1862_v8  ;;  %v4535_v8 = vld [vmem:[%s7622_s3 + $0x258] sm:$0xff] }
 0x27f   : > { %4465 = vmatmul.msk.f32.gmra.mxu0 %vm467_vm1, %v7866_v40  ;;  %2965 = vmatpush.msrb.mxu1 %v4535_v8 }
 0x280   : > { %v2054_v13 = vadd.f32 %v6043_v5, %v2018_v60  ;;  %4432 = vmatmul.msk.f32.gmra.mxu3 %vm467_vm1, %v7806_v58  ;;  %v6135_v58 = vpop.f32.mrf.mxu2 }
 0x281   : > { %7868 = vst [vmem:[#allocation20_spill] sm:$0xff] %v6135_v58 }
 0x282   : > { %v2086_v33 = vmax.f32 %v2054_v13, 0.0  ;;  %v6142_v13 = vpop.f32.mrf.mxu1 }
 0x283   : > { %v1777_v35 = vpop.f32.mrf.mxu3  ;;  %v6125_v50 = vld [vmem:[#allocation2 + $0x38] sm:$0xff] }
 0x284   : > { %2173 = vst [vmem:[#allocation2 + $0x49] sm:$0xff] %v2086_v33  ;;  %v1863_v1 = vadd.f32 %v1777_v35, %v7867_v39  ;;  %2442 = vmatmul.f32.gmra.mxu2 %v6125_v50  ;;  %v1936_v2 = vpop.f32.mrf.mxu0  ;;  %2332 = vmatmul.f32.gmra.mxu1 %v2086_v33 }
 0x286   : > { %v2019_v60 = vadd.f32 %v1933_v38, %v1863_v1 }
 0x287   : > { %4466 = vmatmul.msk.f32.gmra.mxu0 %vm467_vm1, %v7808_v48  ;;  %v4518_v48 = vld [vmem:[%s7622_s3 + $0x1d0] sm:$0xff] }
 0x288   : > { %v2055_v40 = vadd.f32 %v6043_v5, %v2019_v60  ;;  %4433 = vmatmul.msk.f32.gmra.mxu3 %vm467_vm1, %v7809_v41  ;;  %2772 = vmatpush.msrb.mxu0 %v4518_v48  ;;  %v6151_v41 = vpop.f32.mrf.mxu2  ;;  %v7871_v48 = vld [vmem:[#allocation40_spill] sm:$0xff] }
 0x28a   : > { %v2087_v33 = vmax.f32 %v2055_v40, 0.0  ;;  %v6158_v29 = vpop.f32.mrf.mxu1 }
 0x28b   : > { %v1780_v35 = vpop.f32.mrf.mxu3  ;;  %v6144_v39 = vld [vmem:[#allocation2 + $0x48] sm:$0xff]  ;;  %7870 = vst [vmem:[#allocation12_spill] sm:$0xff] %v6158_v29 }
 0x28c   : > { %2174 = vst [vmem:[#allocation2 + $0x51] sm:$0xff] %v2087_v33  ;;  %v1864_v58 = vadd.f32 %v1780_v35, %v7869_v17  ;;  %2445 = vmatmul.f32.gmra.mxu2 %v6144_v39  ;;  %v1939_v38 = vpop.f32.mrf.mxu0  ;;  %2335 = vmatmul.f32.gmra.mxu1 %v2087_v33 }
 0x28e   : > { %v2020_v1 = vadd.f32 %v1936_v2, %v1864_v58  ;;  %v1556_v58 = vadd.f32 %v5753_v46, %v5639_v7  ;;  %v4517_v46 = vld [vmem:[%s7622_s3 + $0x1c8] sm:$0xff] }
 0x28f   : > { %4467 = vmatmul.msk.f32.gmra.mxu0 %vm467_vm1, %v7810_v19  ;;  %v4534_v19 = vld [vmem:[%s7622_s3 + $0x250] sm:$0xff] }
 0x290   : > { %v2056_v8 = vadd.f32 %v6043_v5, %v2020_v1  ;;  %4434 = vmatmul.msk.f32.gmra.mxu3 %vm467_vm1, %v7811_v42  ;;  %v4501_v42 = vld [vmem:[%s7622_s3 + $0x148] sm:$0xff]  ;;  %2966 = vmatpush.msrb.mxu1 %v4534_v19  ;;  %v7872_v1 = vld [vmem:[#allocation8_spill] sm:$0xff] }
 0x291   : > { %2579 = vmatpush.msrb.mxu3 %v4501_v42  ;;  %2773 = vmatpush.msrb.mxu0 %v4517_v46  ;;  %v7709_v46 = vrot.slane %v5728_v63, 1 }
 0x292   : > { %v2088_v17 = vmax.f32 %v2056_v8, 0.0  ;;  %v6177_v8 = vpop.f32.mrf.mxu2 }
 0x293   : > { %v1783_v60 = vpop.f32.mrf.mxu3  ;;  %v6160_v40 = vld [vmem:[#allocation2 + $0x50] sm:$0xff] }
 0x294   : > { %2175 = vst [vmem:[#allocation2 + $0x61] sm:$0xff] %v2088_v17  ;;  %v1865_v33 = vadd.f32 %v1783_v60, %v5631_v22  ;;  %2448 = vmatmul.f32.gmra.mxu2 %v6160_v40  ;;  %v1942_v2 = vpop.f32.mrf.mxu0  ;;  %2338 = vmatmul.f32.gmra.mxu1 %v2088_v17  ;;  %v1709_v17 = vadd.f32 %v5777_v49, %v1556_v58 }
 0x296   : > { %v2021_v35 = vadd.f32 %v1939_v38, %v1865_v33  ;;  %v6186_v38 = vpop.f32.mrf.mxu1  ;;  %v7873_v33 = vld [vmem:[#allocation32_spill] sm:$0xff] }
 0x297   : > { %4468 = vmatmul.msk.f32.gmra.mxu0 %vm467_vm1, %v7871_v48  ;;  %v1557_v49 = vadd.f32 %v5769_v3, %v7873_v33  ;;  %v7875_v48 = vld [vmem:[#allocation9_spill] sm:$0xff] }
 0x298   : > { %v2057_v22 = vadd.f32 %v6043_v5, %v2021_v35  ;;  %4435 = vmatmul.msk.f32.gmra.mxu3 %vm467_vm1, %v7872_v1  ;;  %v7874_v35 = vld [vmem:[#allocation44_spill] sm:$0xff] }
 0x29a   : > { %v2089_v60 = vmax.f32 %v2057_v22, 0.0  ;;  %v1710_v22 = vadd.f32 %v5795_v31, %v1557_v49  ;;  %v4533_v31 = vld [vmem:[%s7622_s3 + $0x248] sm:$0xff] }
 0x29b   : > { %v1786_v29 = vpop.f32.mrf.mxu3  ;;  %v6180_v19 = vld [vmem:[#allocation2 + $0x60] sm:$0xff]  ;;  %2967 = vmatpush.msrb.mxu1 %v4533_v31  ;;  %v7876_v49 = vld [vmem:[#allocation43_spill] sm:$0xff]  ;;  %v7878_v31 = vrot.slane %v5728_v63, 2 }
 0x29c   : > { %2176 = vst [vmem:[#allocation2 + $0x69] sm:$0xff] %v2089_v60  ;;  %v1866_v42 = vadd.f32 %v1786_v29, %v1709_v17  ;;  %2451 = vmatmul.f32.gmra.mxu2 %v6180_v19  ;;  %v1945_v7 = vpop.f32.mrf.mxu0  ;;  %2341 = vmatmul.f32.gmra.mxu1 %v2089_v60  ;;  %v1734_v17 = vrot.slane %v5706_v62, 1  ;;  %v1890_v60 = vrot.slane %v5706_v62, 2  ;;  %v4500_v62 = vld [vmem:[%s7622_s3 + $0x140] sm:$0xff] }
 0x29d   : > { %2580 = vmatpush.msrb.mxu3 %v4500_v62 }
 0x29e   : > { %v2022_v58 = vadd.f32 %v1942_v2, %v1866_v42  ;;  %v6200_v2 = vpop.f32.mrf.mxu2  ;;  %v6223_v3 = vsel %vm384_vm0, %v1734_v17, %v7709_v46  ;;  %v6228_v62 = vsel %vm822_vm2, %v1890_v60, %v7878_v31  ;;  %v4515_v17 = vld [vmem:[%s7622_s3 + $0x1b8] sm:$0xff]  ;;  %v4498_v60 = vld [vmem:[%s7622_s3 + $0x130] sm:$0xff] }
 0x29f   : > { %4469 = vmatmul.msk.f32.gmra.mxu0 %vm467_vm1, %v7874_v35  ;;  %v7882_v46 = vld [vmem:[#allocation11_spill] sm:$0xff] }
 0x2a0   : > { %v2058_v29 = vadd.f32 %v6043_v5, %v2022_v58  ;;  %4436 = vmatmul.msk.f32.gmra.mxu3 %vm467_vm1, %v7875_v48 }
 0x2a2   : > { %v2090_v1 = vmax.f32 %v2058_v29, 0.0  ;;  %v1558_v29 = vadd.f32 %v5786_v20, %v7876_v49 }
 0x2a3   : > { %v1789_v42 = vpop.f32.mrf.mxu3  ;;  %v6202_v33 = vld [vmem:[#allocation2 + $0x68] sm:$0xff] }
 0x2a4   : > { %2177 = vst [vmem:[#allocation2 + $0x79] sm:$0xff] %v2090_v1  ;;  %v1867_v58 = vadd.f32 %v1789_v42, %v1710_v22  ;;  %2454 = vmatmul.f32.gmra.mxu2 %v6202_v33  ;;  %v1948_v35 = vpop.f32.mrf.mxu0  ;;  %2344 = vmatmul.f32.gmra.mxu1 %v2090_v1  ;;  %v4516_v22 = vld [vmem:[%s7622_s3 + $0x1c0] sm:$0xff]  ;;  %v6216_v42 = vpop.f32.mrf.mxu1  ;;  %v1711_v49 = vadd.f32 %v5812_v52, %v1558_v29  ;;  %v4497_v52 = vld [vmem:[%s7622_s3 + $0x128] sm:$0xff] }
 0x2a5   : > { %v7877_v1 = vld [vmem:[#allocation49_spill] sm:$0xff]  ;;  %2774 = vmatpush.msrb.mxu0 %v4516_v22 }
 0x2a6   : > { %v2023_v48 = vadd.f32 %v1945_v7, %v1867_v58  ;;  %v7879_v7 = vld [vmem:[#allocation10_spill] sm:$0xff]  ;;  %v4499_v58 = vld [vmem:[%s7622_s3 + $0x138] sm:$0xff]  ;;  %v6252_v29 = vpop.f32.mrf.mxu2 }
 0x2a7   : > { %4470 = vmatmul.msk.f32.gmra.mxu0 %vm467_vm1, %v7877_v1  ;;  %2581 = vmatpush.msrb.mxu3 %v4499_v58 }
 0x2a8   : > { %v2059_v20 = vadd.f32 %v6043_v5, %v2023_v48  ;;  %4437 = vmatmul.msk.f32.gmra.mxu3 %vm467_vm1, %v7879_v7  ;;  %2775 = vmatpush.msrb.mxu0 %v4515_v17  ;;  %v4514_v48 = vld [vmem:[%s7622_s3 + $0x1b0] sm:$0xff]  ;;  %v7880_v17 = vld [vmem:[#allocation38_spill] sm:$0xff] }
 0x2a9   : > { %2582 = vmatpush.msrb.mxu3 %v4498_v60  ;;  %v1559_v60 = vadd.f32 %v5801_v34, %v7880_v17  ;;  %v4495_v34 = vld [vmem:[%s7622_s3 + $0x118] sm:$0xff] }
 0x2aa   : > { %v2091_v1 = vmax.f32 %v2059_v20, 0.0  ;;  %2776 = vmatpush.msrb.mxu0 %v4514_v48  ;;  %v4513_v20 = vld [vmem:[%s7622_s3 + $0x1a8] sm:$0xff]  ;;  %v4512_v48 = vld [vmem:[%s7622_s3 + $0x1a0] sm:$0xff] }
 0x2ab   : > { %v1792_v22 = vpop.f32.mrf.mxu3  ;;  %v6246_v31 = vld [vmem:[#allocation2 + $0x78] sm:$0xff]  ;;  %2583 = vmatpush.msrb.mxu3 %v4497_v52 }
 0x2ac   : > { %2178 = vst [vmem:[#allocation2 + $0x81] sm:$0xff] %v2091_v1  ;;  %v1868_v7 = vadd.f32 %v1792_v22, %v1711_v49  ;;  %2457 = vmatmul.f32.gmra.mxu2 %v6246_v31  ;;  %v1951_v58 = vpop.f32.mrf.mxu0  ;;  %2347 = vmatmul.f32.gmra.mxu1 %v2091_v1  ;;  %v4496_v1 = vld [vmem:[%s7622_s3 + $0x120] sm:$0xff]  ;;  %v7881_v22 = vld [vmem:[#allocation51_spill] sm:$0xff] }
 0x2ad   : > { %2584 = vmatpush.msrb.mxu3 %v4496_v1  ;;  %2777 = vmatpush.msrb.mxu0 %v4513_v20  ;;  %v4511_v1 = vld [vmem:[%s7622_s3 + $0x198] sm:$0xff] }
 0x2ae   : > { %v2024_v49 = vadd.f32 %v1948_v35, %v1868_v7  ;;  %v6273_v35 = vpop.f32.mrf.mxu1  ;;  %v1712_v7 = vadd.f32 %v5827_v23, %v1559_v60  ;;  %v4532_v23 = vld [vmem:[%s7622_s3 + $0x240] sm:$0xff]  ;;  %v4493_v60 = vld [vmem:[%s7622_s3 + $0x108] sm:$0xff] }
 0x2af   : > { %4471 = vmatmul.msk.f32.gmra.mxu0 %vm467_vm1, %v7881_v22  ;;  %7883 = vst [vmem:[#allocation26_spill] sm:$0xff] %v6273_v35  ;;  %2585 = vmatpush.msrb.mxu3 %v4495_v34  ;;  %v7885_v35 = vld [vmem:[#allocation42_spill] sm:$0xff] }
 0x2b0   : > { %v2060_v52 = vadd.f32 %v6043_v5, %v2024_v49  ;;  %4438 = vmatmul.msk.f32.gmra.mxu3 %vm467_vm1, %v7882_v46  ;;  %2778 = vmatpush.msrb.mxu0 %v4512_v48  ;;  %v4494_v46 = vld [vmem:[%s7622_s3 + $0x110] sm:$0xff] }
 0x2b1   : > { %2586 = vmatpush.msrb.mxu3 %v4494_v46  ;;  %2968 = vmatpush.msrb.mxu1 %v4532_v23  ;;  %v4510_v48 = vld [vmem:[%s7622_s3 + $0x190] sm:$0xff] }
 0x2b2   : > { %v2092_v17 = vmax.f32 %v2060_v52, 0.0  ;;  %2779 = vmatpush.msrb.mxu0 %v4511_v1  ;;  %v7884_v52 = vld [vmem:[#allocation48_spill] sm:$0xff]  ;;  %v4509_v1 = vld [vmem:[%s7622_s3 + $0x188] sm:$0xff] }
 0x2b3   : > { %v1795_v20 = vpop.f32.mrf.mxu3  ;;  %v6282_v49 = vld [vmem:[#allocation2 + $0x80] sm:$0xff]  ;;  %2587 = vmatpush.msrb.mxu3 %v4493_v60 }
 0x2b4   : > { %2179 = vst [vmem:[#allocation2 + $0x91] sm:$0xff] %v2092_v17  ;;  %v1869_v22 = vadd.f32 %v1795_v20, %v1712_v7  ;;  %2460 = vmatmul.f32.gmra.mxu2 %v6282_v49  ;;  %v1954_v34 = vpop.f32.mrf.mxu0  ;;  %2350 = vmatmul.f32.gmra.mxu1 %v2092_v17  ;;  %v1560_v7 = vadd.f32 %v5817_v24, %v7884_v52  ;;  %v4492_v17 = vld [vmem:[%s7622_s3 + $0x100] sm:$0xff]  ;;  %v6299_v20 = vpop.f32.mrf.mxu2 }
 0x2b5   : > { %2780 = vmatpush.msrb.mxu0 %v4510_v48  ;;  %2588 = vmatpush.msrb.mxu3 %v4492_v17 }
 0x2b6   : > { %v2025_v46 = vadd.f32 %v1951_v58, %v1869_v22  ;;  %v1713_v24 = vadd.f32 %v5843_v32, %v1560_v7  ;;  %v4508_v22 = vld [vmem:[%s7622_s3 + $0x180] sm:$0xff]  ;;  %v1561_v32 = vadd.f32 %v5838_v14, %v5708_v53 }
 0x2b7   : > { %4472 = vmatmul.msk.f32.gmra.mxu0 %vm467_vm1, %v7885_v35  ;;  %v6313_v35 = vpop.f32.mrf.mxu1 }
 0x2b8   : > { %v2061_v23 = vadd.f32 %v6043_v5, %v2025_v46  ;;  %4439 = vmatmul.msk.f32.gmra.mxu3 %vm467_vm1, %v5700_v45  ;;  %2781 = vmatpush.msrb.mxu0 %v4509_v1  ;;  %v1714_v1 = vadd.f32 %v5873_v36, %v1561_v32  ;;  %v334_v36 = vld [vmem:[%s4711_s15 + $0x1a8] sm:$0x3]  ;;  %s4606_s15 = sshll.u32 %s7980_s27, 8 }
 0x2b9   : > { %v1893_v32 = vrot.slane %v334_v36, 2  ;;  %s7464_s9 = scalar_lea.vmem %s7626_s7, %s4606_s15 }
 0x2ba   : > { %v2093_v58 = vmax.f32 %v2061_v23, 0.0  ;;  %2782 = vmatpush.msrb.mxu0 %v4508_v22  ;;  %v1562_v22 = vadd.f32 %v5852_v30, %v5730_v12 }
 0x2bb   : > { %v1798_v60 = vpop.f32.mrf.mxu3  ;;  %v6315_v52 = vld [vmem:[#allocation2 + $0x90] sm:$0xff] }
 0x2bc   : > { %2180 = vst [vmem:[#allocation2 + $0x99] sm:$0xff] %v2093_v58  ;;  %v1870_v46 = vadd.f32 %v1798_v60, %v1713_v24  ;;  %2463 = vmatmul.f32.gmra.mxu2 %v6315_v52  ;;  %v1957_v45 = vpop.f32.mrf.mxu0  ;;  %2353 = vmatmul.f32.gmra.mxu1 %v2093_v58  ;;  %v6325_v17 = vpop.f32.mrf.mxu2 }
 0x2be   : > { %v2026_v48 = vadd.f32 %v1954_v34, %v1870_v46 }
 0x2bf   : > { %4473 = vmatmul.msk.f32.gmra.mxu0 %vm467_vm1, %v5716_v15  ;;  %v4531_v15 = vld [vmem:[%s7622_s3 + $0x238] sm:$0xff]  ;;  %v6337_v34 = vpop.f32.mrf.mxu1 }
 0x2c0   : > { %v2062_v7 = vadd.f32 %v6043_v5, %v2026_v48  ;;  %4440 = vmatmul.msk.f32.gmra.mxu3 %vm467_vm1, %v5720_v27  ;;  %v4555_v27 = vld [vmem:[%s7622_s3 + $0x2f8] sm:$0xff]  ;;  %2969 = vmatpush.msrb.mxu1 %v4531_v15  ;;  %v1737_v48 = vrot.slane %v334_v36, 1 }
 0x2c1   : > { %3155 = vmatpush.msrb.mxu2 %v4555_v27  ;;  %v1563_v27 = vadd.f32 %v5882_v16, %v5741_v9  ;;  %v4530_v9 = vld [vmem:[%s7622_s3 + $0x230] sm:$0xff] }
 0x2c2   : > { %v2094_v23 = vmax.f32 %v2062_v7, 0.0  ;;  %v1715_v7 = vadd.f32 %v5899_v18, %v1562_v22  ;;  %v4554_v16 = vld [vmem:[%s7622_s3 + $0x2f0] sm:$0xff]  ;;  %2970 = vmatpush.msrb.mxu1 %v4530_v9 }
 0x2c3   : > { %v1801_v24 = vpop.f32.mrf.mxu3  ;;  %v6328_v58 = vld [vmem:[#allocation2 + $0x98] sm:$0xff]  ;;  %3156 = vmatpush.msrb.mxu2 %v4554_v16 }
 0x2c4   : > { %2181 = vst [vmem:[#allocation2 + $0xa9] sm:$0xff] %v2094_v23  ;;  %v1871_v53 = vadd.f32 %v1801_v24, %v1714_v1  ;;  %2466 = vmatmul.f32.gmra.mxu2 %v6328_v58  ;;  %v1960_v14 = vpop.f32.mrf.mxu0  ;;  %2356 = vmatmul.f32.gmra.mxu1 %v2094_v23  ;;  %v6348_v23 = vpop.f32.mrf.mxu2 }
 0x2c6   : > { %v2027_v60 = vadd.f32 %v1957_v45, %v1871_v53 }
 0x2c7   : > { %4474 = vmatmul.msk.f32.gmra.mxu0 %vm467_vm1, %v6228_v62  ;;  %v7886_v62 = vrot.slane %v5728_v63, 2  ;;  %v6359_v53 = vpop.f32.mrf.mxu1 }
 0x2c8   : > { %v2063_v46 = vadd.f32 %v6043_v5, %v2027_v60  ;;  %4441 = vmatmul.msk.f32.gmra.mxu3 %vm467_vm1, %v6223_v3  ;;  %v7887_v3 = vrot.slane %v5728_v63, 1  ;;  %v1716_v60 = vadd.f32 %v5930_v51, %v1563_v27  ;;  %v2524_v51 = vld [vmem:[#allocation2 + $0x2] sm:$0xff] }
 0x2c9   : > { %v1894_v45 = vsel %vm822_vm2, %v7886_v62, %v1893_v32 }
 0x2ca   : > { %v2095_v1 = vmax.f32 %v2063_v46, 0.0  ;;  %v1738_v18 = vsel %vm384_vm0, %v7887_v3, %v1737_v48 }
 0x2cb   : > { %v1804_v24 = vpop.f32.mrf.mxu3  ;;  %v6350_v15 = vld [vmem:[#allocation2 + $0xa8] sm:$0xff] }
 0x2cc   : > { %2182 = vst [vmem:[#allocation2 + $0xb1] sm:$0xff] %v2095_v1  ;;  %v1872_v12 = vadd.f32 %v1804_v24, %v1715_v7  ;;  %2469 = vmatmul.f32.gmra.mxu2 %v6350_v15  ;;  %v1963_v30 = vpop.f32.mrf.mxu0  ;;  %2359 = vmatmul.f32.gmra.mxu1 %v2095_v1  ;;  %v1564_v1 = vadd.f32 %v5914_v37, %v5751_v44  ;;  %v2525_v37 = vld [vmem:[#allocation2 + $0xa] sm:$0xff] }
 0x2ce   : > { %v2028_v36 = vadd.f32 %v1960_v14, %v1872_v12  ;;  %v6376_v14 = vpop.f32.mrf.mxu2 }
 0x2cf   : > { %4475 = vmatmul.msk.f32.gmra.mxu0 %vm467_vm1, %v1894_v45  ;;  %v6381_v12 = vpop.f32.mrf.mxu1  ;;  %v1717_v45 = vadd.f32 %v5954_v59, %v1564_v1  ;;  %v6408_v1 = vld [vmem:[#allocation2 + $0x1a] sm:$0xff] }
 0x2d0   : > { %v2064_v22 = vadd.f32 %v6043_v5, %v2028_v36  ;;  %4442 = vmatmul.msk.f32.gmra.mxu3 %vm467_vm1, %v1738_v18 }
 0x2d2   : > { %v2096_v46 = vmax.f32 %v2064_v22, 0.0 }
 0x2d3   : > { %v1807_v32 = vpop.f32.mrf.mxu3  ;;  %v6367_v7 = vld [vmem:[#allocation2 + $0xb0] sm:$0xff] }
 0x2d4   : > { %2183 = vst [vmem:[#allocation2 + $0xc1] sm:$0xff] %v2096_v46  ;;  %v1873_v63 = vadd.f32 %v1807_v32, %v1716_v60  ;;  %2472 = vmatmul.f32.gmra.mxu2 %v6367_v7  ;;  %v1966_v48 = vpop.f32.mrf.mxu0  ;;  %2362 = vmatmul.f32.gmra.mxu1 %v2096_v46 }
 0x2d6   : > { %v2029_v24 = vadd.f32 %v1963_v30, %v1873_v63  ;;  %v6388_v44 = vpop.f32.mrf.mxu2 }
 0x2d7   : > { %2783 = vmatmul.f32.vlgmr.msrb.gmra.mxu0 %v6078_v57  ;;  %v1565_v57 = vadd.f32 %v5943_v61, %v5763_v54  ;;  %v4529_v54 = vld [vmem:[%s7622_s3 + $0x228] sm:$0xff] }
 0x2d8   : > { %v2065_v62 = vadd.f32 %v6043_v5, %v2029_v24  ;;  %2589 = vmatmul.f32.vlgmr.msrb.gmra.mxu3 %v2524_v51  ;;  %v4553_v61 = vld [vmem:[%s7622_s3 + $0x2e8] sm:$0xff]  ;;  %2971 = vmatpush.msrb.mxu1 %v4529_v54 }
 0x2d9   : > { %v1718_v46 = vadd.f32 %v5988_v0, %v1565_v57  ;;  %3157 = vmatpush.msrb.mxu2 %v4553_v61  ;;  %v1566_v0 = vadd.f32 %v5967_v11, %v5775_v21  ;;  %v6419_v57 = vld [vmem:[#allocation2 + $0x22] sm:$0xff]  ;;  %v6438_v61 = vld [vmem:[#allocation2 + $0x32] sm:$0xff] }
 0x2da   : > { %v2097_v3 = vmax.f32 %v2065_v62, 0.0 }
 0x2db   : > { %v1810_v18 = vpop.f32.mrf.mxu3  ;;  %v6385_v27 = vld [vmem:[#allocation2 + $0xc0] sm:$0xff] }
 0x2dc   : > { %2184 = vst [vmem:[#allocation2 + $0xc9] sm:$0xff] %v2097_v3  ;;  %v1874_v36 = vadd.f32 %v1810_v18, %v1717_v45  ;;  %2475 = vmatmul.f32.gmra.mxu2 %v6385_v27  ;;  %v1969_v22 = vpop.f32.mrf.mxu0  ;;  %2365 = vmatmul.f32.gmra.mxu1 %v2097_v3  ;;  %v1719_v45 = vadd.f32 %v6012_v25, %v1566_v0 }
 0x2de   : > { %v2030_v30 = vadd.f32 %v1966_v48, %v1874_v36  ;;  %v6406_v48 = vpop.f32.mrf.mxu2 }
 0x2df   : > { %2786 = vmatmul.f32.gmra.mxu0 %v6092_v10 }
 0x2e0   : > { %v2066_v59 = vadd.f32 %v6043_v5, %v2030_v30  ;;  %2592 = vmatmul.f32.gmra.mxu3 %v2525_v37 }
 0x2e1   : > { %v2321_v60 = vpop.f32.mrf.mxu1 }
 0x2e2   : > { %v2098_v32 = vmax.f32 %v2066_v59, 0.0 }
 0x2e3   : > { %v1813_v63 = vpop.f32.mrf.mxu3  ;;  %v6395_v9 = vld [vmem:[#allocation2 + $0xc8] sm:$0xff] }
 0x2e4   : > { %2185 = vst [vmem:[#allocation2 + $0xd9] sm:$0xff] %v2098_v32  ;;  %v1875_v16 = vadd.f32 %v1813_v63, %v1718_v46  ;;  %2478 = vmatmul.f32.gmra.mxu2 %v6395_v9  ;;  %v1972_v51 = vpop.f32.mrf.mxu0  ;;  %2368 = vmatmul.f32.gmra.mxu1 %v2098_v32 }
 0x2e6   : > { %v2031_v10 = vadd.f32 %v1969_v22, %v1875_v16 }
 0x2e7   : > { %2789 = vmatmul.f32.gmra.mxu0 %v6111_v56  ;;  %v1567_v56 = vadd.f32 %v5998_v43, %v5789_v6 }
 0x2e8   : > { %v2067_v24 = vadd.f32 %v6043_v5, %v2031_v10  ;;  %2595 = vmatmul.f32.gmra.mxu3 %v6408_v1 }
 0x2e9   : > { %v2324_v62 = vpop.f32.mrf.mxu1  ;;  %v1720_v46 = vadd.f32 %v6048_v26, %v1567_v56  ;;  %v1568_v26 = vadd.f32 %v6027_v47, %v5803_v28 }
 0x2ea   : > { %v2099_v3 = vmax.f32 %v2067_v24, 0.0 }
 0x2eb   : > { %v1816_v18 = vpop.f32.mrf.mxu3  ;;  %v6414_v36 = vld [vmem:[#allocation2 + $0xd8] sm:$0xff] }
 0x2ec   : > { %2186 = vst [vmem:[#allocation2 + $0xe1] sm:$0xff] %v2099_v3  ;;  %v1876_v21 = vadd.f32 %v1816_v18, %v1719_v45  ;;  %2481 = vmatmul.f32.gmra.mxu2 %v6414_v36  ;;  %v1975_v11 = vpop.f32.mrf.mxu0  ;;  %2371 = vmatmul.f32.gmra.mxu1 %v2099_v3  ;;  %v1721_v45 = vadd.f32 %v6069_v55, %v1568_v26 }
 0x2ee   : > { %v2032_v22 = vadd.f32 %v1972_v51, %v1876_v21 }
 0x2ef   : > { %v2434_v37 = vpop.f32.mrf.mxu2  ;;  %2792 = vmatmul.f32.gmra.mxu0 %v6125_v50  ;;  %v4528_v50 = vld [vmem:[%s7622_s3 + $0x220] sm:$0xff] }
 0x2f0   : > { %v2068_v25 = vadd.f32 %v6043_v5, %v2032_v22  ;;  %v6423_v30 = vadd.f32 %v2434_v37, %v2321_v60  ;;  %2598 = vmatmul.f32.gmra.mxu3 %v6419_v57  ;;  %v4552_v60 = vld [vmem:[%s7622_s3 + $0x2e0] sm:$0xff]  ;;  %2972 = vmatpush.msrb.mxu1 %v4528_v50 }
 0x2f1   : > { %v2327_v59 = vpop.f32.mrf.mxu1  ;;  %3158 = vmatpush.msrb.mxu2 %v4552_v60  ;;  %v6451_v37 = vld [vmem:[#allocation2 + $0x3a] sm:$0xff] }
 0x2f2   : > { %v2100_v32 = vmax.f32 %v2068_v25, 0.0 }
 0x2f3   : > { %v1819_v63 = vpop.f32.mrf.mxu3  ;;  %v6427_v16 = vld [vmem:[#allocation2 + $0xe0] sm:$0xff] }
 0x2f4   : > { %2187 = vst [vmem:[#allocation2 + $0xf1] sm:$0xff] %v2100_v32  ;;  %v1877_v6 = vadd.f32 %v1819_v63, %v1720_v46  ;;  %2484 = vmatmul.f32.gmra.mxu2 %v6427_v16  ;;  %v1978_v43 = vpop.f32.mrf.mxu0  ;;  %2374 = vmatmul.f32.gmra.mxu1 %v2100_v32  ;;  %v7890_v32 = vld [vmem:[#allocation17_spill] sm:$0xff] }
 0x2f6   : > { %v2033_v51 = vadd.f32 %v1975_v11, %v1877_v6  ;;  %v7889_v11 = vld [vmem:[#allocation53_spill] sm:$0xff] }
 0x2f7   : > { %v2437_v54 = vpop.f32.mrf.mxu2  ;;  %2795 = vmatmul.f32.gmra.mxu0 %v6144_v39  ;;  %v7888_v39 = vld [vmem:[#allocation47_spill] sm:$0xff] }
 0x2f8   : > { %v2069_v0 = vadd.f32 %v6043_v5, %v2033_v51  ;;  %v6442_v10 = vadd.f32 %v2437_v54, %v2324_v62  ;;  %2601 = vmatmul.f32.gmra.mxu3 %v6438_v61  ;;  %v1569_v56 = vadd.f32 %v7889_v11, %v7888_v39  ;;  %v7891_v51 = vld [vmem:[#allocation21_spill] sm:$0xff]  ;;  %v7892_v54 = vld [vmem:[#allocation18_spill] sm:$0xff] }
 0x2f9   : > { %v2330_v24 = vpop.f32.mrf.mxu1 }
 0x2fa   : > { %v2101_v3 = vmax.f32 %v2069_v0, 0.0  ;;  %v1722_v63 = vadd.f32 %v7890_v32, %v1569_v56  ;;  %v1570_v0 = vadd.f32 %v7892_v54, %v7891_v51  ;;  %v7895_v51 = vld [vmem:[#allocation20_spill] sm:$0xff] }
 0x2fb   : > { %v1822_v18 = vpop.f32.mrf.mxu3  ;;  %v6446_v21 = vld [vmem:[#allocation2 + $0xf0] sm:$0xff] }
 0x2fc   : > { %2188 = vst [vmem:[#allocation2 + $0xf9] sm:$0xff] %v2101_v3  ;;  %v1878_v28 = vadd.f32 %v1822_v18, %v1721_v45  ;;  %2487 = vmatmul.f32.gmra.mxu2 %v6446_v21  ;;  %v1981_v47 = vpop.f32.mrf.mxu0  ;;  %2377 = vmatmul.f32.gmra.mxu1 %v2101_v3  ;;  %v6470_v18 = vld [vmem:[#allocation2 + $0x4a] sm:$0xff]  ;;  %v1723_v56 = vadd.f32 %v6109_v4, %v1570_v0 }
 0x2fe   : > { %v2034_v62 = vadd.f32 %v1978_v43, %v1878_v28 }
 0x2ff   : > { %v2440_v22 = vpop.f32.mrf.mxu2  ;;  %2798 = vmatmul.f32.gmra.mxu0 %v6160_v40  ;;  %v4527_v40 = vld [vmem:[%s7622_s3 + $0x218] sm:$0xff] }
 0x300   : > { %v2070_v55 = vadd.f32 %v6043_v5, %v2034_v62  ;;  %v6455_v25 = vadd.f32 %v2440_v22, %v2327_v59  ;;  %2604 = vmatmul.f32.gmra.mxu3 %v6451_v37  ;;  %v4551_v59 = vld [vmem:[%s7622_s3 + $0x2d8] sm:$0xff]  ;;  %2973 = vmatpush.msrb.mxu1 %v4527_v40 }
 0x301   : > { %v2333_v46 = vpop.f32.mrf.mxu1  ;;  %3159 = vmatpush.msrb.mxu2 %v4551_v59 }
 0x302   : > { %v2102_v6 = vmax.f32 %v2070_v55, 0.0 }
 0x303   : > { %v1825_v50 = vpop.f32.mrf.mxu3  ;;  %v6459_v60 = vld [vmem:[#allocation2 + $0xf8] sm:$0xff] }
 0x304   : > { %2189 = vst [vmem:[#allocation2 + $0x109] sm:$0xff] %v2102_v6  ;;  %v1879_v43 = vadd.f32 %v1825_v50, %v1722_v63  ;;  %2490 = vmatmul.f32.gmra.mxu2 %v6459_v60  ;;  %v1984_v26 = vpop.f32.mrf.mxu0  ;;  %2380 = vmatmul.f32.gmra.mxu1 %v2102_v6  ;;  %v7894_v63 = vld [vmem:[#allocation13_spill] sm:$0xff] }
 0x306   : > { %v2035_v45 = vadd.f32 %v1981_v47, %v1879_v43  ;;  %v6483_v43 = vld [vmem:[#allocation2 + $0x52] sm:$0xff] }
 0x307   : > { %v2443_v3 = vpop.f32.mrf.mxu2  ;;  %2801 = vmatmul.f32.gmra.mxu0 %v6180_v19  ;;  %v7893_v19 = vld [vmem:[#allocation4_spill] sm:$0xff] }
 0x308   : > { %v2071_v28 = vadd.f32 %v6043_v5, %v2035_v45  ;;  %v6474_v39 = vadd.f32 %v2443_v3, %v2330_v24  ;;  %2607 = vmatmul.f32.gmra.mxu3 %v6470_v18  ;;  %v1571_v6 = vadd.f32 %v7894_v63, %v7893_v19  ;;  %v6502_v63 = vld [vmem:[#allocation2 + $0x62] sm:$0xff] }
 0x309   : > { %v2336_v11 = vpop.f32.mrf.mxu1 }
 0x30a   : > { %v2103_v62 = vmax.f32 %v2071_v28, 0.0  ;;  %v1724_v54 = vadd.f32 %v7895_v51, %v1571_v6 }
 0x30b   : > { %v1828_v22 = vpop.f32.mrf.mxu3  ;;  %v6478_v55 = vld [vmem:[#allocation2 + $0x108] sm:$0xff] }
 0x30c   : > { %2190 = vst [vmem:[#allocation2 + $0x111] sm:$0xff] %v2103_v62  ;;  %v1880_v47 = vadd.f32 %v1828_v22, %v1723_v56  ;;  %2493 = vmatmul.f32.gmra.mxu2 %v6478_v55  ;;  %v1987_v32 = vpop.f32.mrf.mxu0  ;;  %2383 = vmatmul.f32.gmra.mxu1 %v2103_v62  ;;  %v7896_v56 = vld [vmem:[#allocation5_spill] sm:$0xff]  ;;  %v7897_v62 = vld [vmem:[#allocation22_spill] sm:$0xff] }
 0x30d   : > { %v1572_v22 = vadd.f32 %v7897_v62, %v7896_v56 }
 0x30e   : > { %v2036_v24 = vadd.f32 %v1984_v26, %v1880_v47 }
 0x30f   : > { %v2446_v50 = vpop.f32.mrf.mxu2  ;;  %2804 = vmatmul.f32.gmra.mxu0 %v6202_v33  ;;  %v4526_v33 = vld [vmem:[%s7622_s3 + $0x210] sm:$0xff] }
 0x310   : > { %v2072_v4 = vadd.f32 %v6043_v5, %v2036_v24  ;;  %v6487_v40 = vadd.f32 %v2446_v50, %v2333_v46  ;;  %2610 = vmatmul.f32.gmra.mxu3 %v6483_v43  ;;  %v4550_v46 = vld [vmem:[%s7622_s3 + $0x2d0] sm:$0xff]  ;;  %2974 = vmatpush.msrb.mxu1 %v4526_v33 }
 0x311   : > { %v2339_v59 = vpop.f32.mrf.mxu1  ;;  %3160 = vmatpush.msrb.mxu2 %v4550_v46  ;;  %v6515_v46 = vld [vmem:[#allocation2 + $0x6a] sm:$0xff] }
 0x312   : > { %v2104_v0 = vmax.f32 %v2072_v4, 0.0  ;;  %v1725_v4 = vadd.f32 %v6151_v41, %v1572_v22 }
 0x313   : > { %v1831_v45 = vpop.f32.mrf.mxu3  ;;  %v6491_v3 = vld [vmem:[#allocation2 + $0x110] sm:$0xff] }
 0x314   : > { %2191 = vst [vmem:[#allocation2 + $0x121] sm:$0xff] %v2104_v0  ;;  %v1881_v26 = vadd.f32 %v1831_v45, %v1724_v54  ;;  %2496 = vmatmul.f32.gmra.mxu2 %v6491_v3  ;;  %v1990_v28 = vpop.f32.mrf.mxu0  ;;  %2386 = vmatmul.f32.gmra.mxu1 %v2104_v0 }
 0x316   : > { %v2037_v47 = vadd.f32 %v1987_v32, %v1881_v26 }
 0x317   : > { %v2449_v19 = vpop.f32.mrf.mxu2  ;;  %2807 = vmatmul.f32.gmra.mxu0 %v6246_v31  ;;  %v7898_v31 = vld [vmem:[#allocation30_spill] sm:$0xff] }
 0x318   : > { %v2073_v6 = vadd.f32 %v6043_v5, %v2037_v47  ;;  %v6506_v24 = vadd.f32 %v2449_v19, %v2336_v11  ;;  %2613 = vmatmul.f32.gmra.mxu3 %v6502_v63  ;;  %v1573_v26 = vadd.f32 %v6142_v13, %v7898_v31  ;;  %v6540_v31 = vld [vmem:[%s7621_s2] ss:$0 sm:$0xff] }
 0x319   : > { %v2342_v50 = vpop.f32.mrf.mxu1 }
 0x31a   : > { %v2105_v51 = vmax.f32 %v2073_v6, 0.0  ;;  %v1726_v22 = vadd.f32 %v6177_v8, %v1573_v26  ;;  %v7899_v8 = vld [vmem:[#allocation6_spill] sm:$0xff] }
 0x31b   : > { %v1834_v54 = vpop.f32.mrf.mxu3  ;;  %v6510_v0 = vld [vmem:[#allocation2 + $0x120] sm:$0xff] }
 0x31c   : > { %2192 = vst [vmem:[#allocation2 + $0x129] sm:$0xff] %v2105_v51  ;;  %v1882_v32 = vadd.f32 %v1834_v54, %v1725_v4  ;;  %2499 = vmatmul.f32.gmra.mxu2 %v6510_v0  ;;  %v1993_v45 = vpop.f32.mrf.mxu0  ;;  %2389 = vmatmul.f32.gmra.mxu1 %v2105_v51 }
 0x31e   : > { %v2038_v11 = vadd.f32 %v1990_v28, %v1882_v32  ;;  %v6534_v32 = vld [vmem:[#allocation2 + $0x7a] sm:$0xff] }
 0x31f   : > { %v2452_v33 = vpop.f32.mrf.mxu2  ;;  %2810 = vmatmul.f32.gmra.mxu0 %v6282_v49  ;;  %v4549_v49 = vld [vmem:[%s7622_s3 + $0x2c8] sm:$0xff] }
 0x320   : > { %v2074_v41 = vadd.f32 %v6043_v5, %v2038_v11  ;;  %v6519_v56 = vadd.f32 %v2452_v33, %v2339_v59  ;;  %2616 = vmatmul.f32.gmra.mxu3 %v6515_v46  ;;  %v4525_v5 = vld [vmem:[%s7622_s3 + $0x208] sm:$0xff]  ;;  %3161 = vmatpush.msrb.mxu2 %v4549_v49  ;;  %v7900_v59 = vld [vmem:[#allocation12_spill] sm:$0xff] }
 0x321   : > { %v2345_v62 = vpop.f32.mrf.mxu1  ;;  %2975 = vmatpush.msrb.mxu1 %v4525_v5  ;;  %v1574_v4 = vadd.f32 %v7900_v59, %v7899_v8  ;;  %v4546_v8 = vld [vmem:[%s7622_s3 + $0x2b0] sm:$0xff] }
 0x322   : > { %v2106_v47 = vmax.f32 %v2074_v41, 0.0 }
 0x323   : > { %v1837_v19 = vpop.f32.mrf.mxu3  ;;  %v6523_v6 = vld [vmem:[#allocation2 + $0x128] sm:$0xff]  ;;  %v1727_v41 = vadd.f32 %v6200_v2, %v1574_v4 }
 0x324   : > { %2193 = vst [vmem:[#allocation2 + $0x139] sm:$0xff] %v2106_v47  ;;  %v1883_v13 = vadd.f32 %v1837_v19, %v1726_v22  ;;  %2502 = vmatmul.f32.gmra.mxu2 %v6523_v6  ;;  %v1996_v28 = vpop.f32.mrf.mxu0  ;;  %2392 = vmatmul.f32.gmra.mxu1 %v2106_v47  ;;  %v4548_v22 = vld [vmem:[%s7622_s3 + $0x2c0] sm:$0xff] }
 0x325   : > { %3162 = vmatpush.msrb.mxu2 %v4548_v22  ;;  %v7901_v2 = vld [vmem:[#allocation34_spill] sm:$0xff] }
 0x326   : > { %v2039_v51 = vadd.f32 %v1993_v45, %v1883_v13  ;;  %v4547_v13 = vld [vmem:[%s7622_s3 + $0x2b8] sm:$0xff]  ;;  %v1575_v5 = vadd.f32 %v6186_v38, %v7901_v2  ;;  %v6561_v4 = vld [vmem:[#allocation2 + $0x82] sm:$0xff] }
 0x327   : > { %v2455_v54 = vpop.f32.mrf.mxu2  ;;  %2813 = vmatmul.f32.gmra.mxu0 %v6315_v52  ;;  %3163 = vmatpush.msrb.mxu2 %v4547_v13  ;;  %v4545_v38 = vld [vmem:[%s7622_s3 + $0x2a8] sm:$0xff]  ;;  %v4543_v13 = vld [vmem:[%s7622_s3 + $0x298] sm:$0xff] }
 0x328   : > { %v2075_v26 = vadd.f32 %v6540_v31, %v2039_v51  ;;  %v6543_v11 = vadd.f32 %v2455_v54, %v2342_v50  ;;  %2619 = vmatmul.f32.gmra.mxu3 %v6534_v32  ;;  %v7902_v2 = vld [vmem:[#allocation7_spill] sm:$0xff] }
 0x329   : > { %v2348_v33 = vpop.f32.mrf.mxu1  ;;  %3164 = vmatpush.msrb.mxu2 %v4546_v8  ;;  %v4542_v8 = vld [vmem:[%s7622_s3 + $0x290] sm:$0xff] }
 0x32a   : > { %v2107_v45 = vmax.f32 %v2075_v26, 0.0  ;;  %v1728_v26 = vadd.f32 %v6252_v29, %v1575_v5  ;;  %v4571_v29 = vld [vmem:[%s7622_s3 + $0x378] sm:$0xff]  ;;  %v1576_v5 = vadd.f32 %v6216_v42, %v7902_v2  ;;  %v4541_v42 = vld [vmem:[%s7622_s3 + $0x288] sm:$0xff] }
 0x32b   : > { %v1840_v52 = vpop.f32.mrf.mxu3  ;;  %v6550_v47 = vld [vmem:[#allocation2 + $0x138] sm:$0xff]  ;;  %3165 = vmatpush.msrb.mxu2 %v4545_v38  ;;  %3350 = vmatpush.msra.mxu3 %v4571_v29  ;;  %v7904_v2 = vld [vmem:[#allocation26_spill] sm:$0xff] }
 0x32c   : > { %2194 = vst [vmem:[#allocation2 + $0x141] sm:$0xff] %v2107_v45  ;;  %v1884_v19 = vadd.f32 %v1840_v52, %v1727_v41  ;;  %2505 = vmatmul.f32.gmra.mxu2 %v6550_v47  ;;  %v1999_v50 = vpop.f32.mrf.mxu0  ;;  %2395 = vmatmul.f32.gmra.mxu1 %v2107_v45  ;;  %v4587_v29 = vld [vmem:[%s7622_s3 + $0x3f8] sm:$0xff] }
 0x32d   : > { %3544 = vmatpush.msra.mxu0 %v4587_v29  ;;  %v7905_v29 = vld [vmem:[#allocation16_spill] sm:$0xff] }
 0x32e   : > { %v2040_v49 = vadd.f32 %v1996_v28, %v1884_v19 }
 0x32f   : > { %v2458_v59 = vpop.f32.mrf.mxu2  ;;  %2816 = vmatmul.f32.gmra.mxu0 %v6328_v58  ;;  %v4524_v58 = vld [vmem:[%s7622_s3 + $0x200] sm:$0xff] }
 0x330   : > { %v2076_v51 = vadd.f32 %v6540_v31, %v2040_v49  ;;  %v6565_v54 = vadd.f32 %v2458_v59, %v2345_v62  ;;  %2622 = vmatmul.f32.gmra.mxu3 %v6561_v4  ;;  %v4544_v62 = vld [vmem:[%s7622_s3 + $0x2a0] sm:$0xff]  ;;  %2976 = vmatpush.msrb.mxu1 %v4524_v58 }
 0x331   : > { %v2351_v28 = vpop.f32.mrf.mxu1  ;;  %3166 = vmatpush.msrb.mxu2 %v4544_v62 }
 0x332   : > { %v2108_v41 = vmax.f32 %v2076_v51, 0.0  ;;  %v6592_v51 = vld [vmem:[#allocation2 + $0x92] sm:$0xff] }
 0x333   : > { %v1843_v45 = vpop.f32.mrf.mxu3  ;;  %v6578_v22 = vld [vmem:[#allocation2 + $0x140] sm:$0xff]  ;;  %3167 = vmatpush.msrb.mxu2 %v4543_v13  ;;  %v7903_v13 = vld [vmem:[#allocation52_spill] sm:$0xff] }
 0x334   : > { %2195 = vst [vmem:[#allocation2 + $0x151] sm:$0xff] %v2108_v41  ;;  %v1885_v52 = vadd.f32 %v1843_v45, %v1728_v26  ;;  %2508 = vmatmul.f32.gmra.mxu2 %v6578_v22  ;;  %v2002_v19 = vpop.f32.mrf.mxu0  ;;  %2398 = vmatmul.f32.gmra.mxu1 %v2108_v41  ;;  %v1729_v41 = vadd.f32 %v6299_v20, %v1576_v5  ;;  %v4603_v20 = vld [vmem:[%s7622_s3 + $0x478] sm:$0xff] }
 0x335   : > { %3168 = vmatpush.msrb.mxu2 %v4542_v8  ;;  %3738 = vmatpush.msra.mxu1 %v4603_v20  ;;  %v1577_v5 = vadd.f32 %v7904_v2, %v7903_v13  ;;  %v1578_v20 = vadd.f32 %v6313_v35, %v7905_v29 }
 0x336   : > { %v2041_v49 = vadd.f32 %v1999_v50, %v1885_v52 }
 0x337   : > { %v2461_v59 = vpop.f32.mrf.mxu2  ;;  %2819 = vmatmul.f32.gmra.mxu0 %v6350_v15  ;;  %3169 = vmatpush.msrb.mxu2 %v4541_v42  ;;  %v4540_v15 = vld [vmem:[%s7622_s3 + $0x280] sm:$0xff]  ;;  %v1731_v35 = vadd.f32 %v6348_v23, %v1578_v20  ;;  %v6652_v20 = vld [vmem:[#allocation2 + $0xb2] sm:$0xff] }
 0x338   : > { %v2077_v38 = vadd.f32 %v6540_v31, %v2041_v49  ;;  %v6596_v26 = vadd.f32 %v2461_v59, %v2348_v33  ;;  %2625 = vmatmul.f32.gmra.mxu3 %v6592_v51  ;;  %v6617_v59 = vld [vmem:[#allocation2 + $0x9a] sm:$0xff] }
 0x339   : > { %v2354_v50 = vpop.f32.mrf.mxu1  ;;  %3170 = vmatpush.msrb.mxu2 %v4540_v15  ;;  %v1730_v15 = vadd.f32 %v6325_v17, %v1577_v5 }
 0x33a   : > { %v2109_v58 = vmax.f32 %v2077_v38, 0.0 }
 0x33b   : > { %v1846_v62 = vpop.f32.mrf.mxu3  ;;  %v6606_v45 = vld [vmem:[#allocation2 + $0x150] sm:$0xff] }
 0x33c   : > { %2196 = vst [vmem:[#allocation2 + $0x159] sm:$0xff] %v2109_v58  ;;  %v1886_v33 = vadd.f32 %v1846_v62, %v1729_v41  ;;  %2511 = vmatmul.f32.gmra.mxu2 %v6606_v45  ;;  %v2005_v52 = vpop.f32.mrf.mxu0  ;;  %2401 = vmatmul.f32.gmra.mxu1 %v2109_v58  ;;  %v4570_v41 = vld [vmem:[%s7622_s3 + $0x370] sm:$0xff] }
 0x33d   : > { %3351 = vmatpush.msra.mxu3 %v4570_v41 }
 0x33e   : > { %v2042_v49 = vadd.f32 %v2002_v19, %v1886_v33 }
 0x33f   : > { %v2464_v8 = vpop.f32.mrf.mxu2  ;;  %2822 = vmatmul.f32.gmra.mxu0 %v6367_v7 }
 0x340   : > { %v2078_v38 = vadd.f32 %v6540_v31, %v2042_v49  ;;  %v6621_v42 = vadd.f32 %v2464_v8, %v2351_v28  ;;  %2628 = vmatmul.f32.gmra.mxu3 %v6617_v59  ;;  %v6633_v49 = vld [vmem:[#allocation2 + $0xaa] sm:$0xff] }
 0x341   : > { %v2357_v58 = vpop.f32.mrf.mxu1  ;;  %v4586_v8 = vld [vmem:[%s7622_s3 + $0x3f0] sm:$0xff] }
 0x342   : > { %v2110_v19 = vmax.f32 %v2078_v38, 0.0  ;;  %3545 = vmatpush.msra.mxu0 %v4586_v8 }
 0x343   : > { %v1849_v62 = vpop.f32.mrf.mxu3  ;;  %v6628_v33 = vld [vmem:[#allocation2 + $0x158] sm:$0xff] }
 0x344   : > { %2197 = vst [vmem:[#allocation2 + $0x169] sm:$0xff] %v2110_v19  ;;  %v1887_v7 = vadd.f32 %v1849_v62, %v1730_v15  ;;  %2514 = vmatmul.f32.gmra.mxu2 %v6628_v33  ;;  %v2008_v28 = vpop.f32.mrf.mxu0  ;;  %2404 = vmatmul.f32.gmra.mxu1 %v2110_v19  ;;  %v4602_v19 = vld [vmem:[%s7622_s3 + $0x470] sm:$0xff] }
 0x345   : > { %3739 = vmatpush.msra.mxu1 %v4602_v19  ;;  %v7906_v62 = vld [vmem:[#allocation15_spill] sm:$0xff] }
 0x346   : > { %v2043_v13 = vadd.f32 %v2005_v52, %v1887_v7  ;;  %v1579_v7 = vadd.f32 %v6337_v34, %v7906_v62  ;;  %v6666_v62 = vld [vmem:[#allocation2 + $0xc2] sm:$0xff] }
 0x347   : > { %v2467_v2 = vpop.f32.mrf.mxu2  ;;  %2825 = vmatmul.f32.gmra.mxu0 %v6385_v27 }
 0x348   : > { %v2079_v17 = vadd.f32 %v6540_v31, %v2043_v13  ;;  %v6637_v5 = vadd.f32 %v2467_v2, %v2354_v50  ;;  %2631 = vmatmul.f32.gmra.mxu3 %v6633_v49  ;;  %v1732_v34 = vadd.f32 %v6376_v14, %v1579_v7  ;;  %v4585_v7 = vld [vmem:[%s7622_s3 + $0x3e8] sm:$0xff] }
 0x349   : > { %v2360_v38 = vpop.f32.mrf.mxu1  ;;  %3546 = vmatpush.msra.mxu0 %v4585_v7  ;;  %v6701_v7 = vld [vmem:[#allocation2 + $0xda] sm:$0xff] }
 0x34a   : > { %v2111_v52 = vmax.f32 %v2079_v17, 0.0  ;;  %v4569_v17 = vld [vmem:[%s7622_s3 + $0x368] sm:$0xff] }
 0x34b   : > { %v1852_v41 = vpop.f32.mrf.mxu3  ;;  %v6644_v15 = vld [vmem:[#allocation2 + $0x168] sm:$0xff]  ;;  %3352 = vmatpush.msra.mxu3 %v4569_v17 }
 0x34c   : > { %2198 = vst [vmem:[#allocation2 + $0x171] sm:$0xff] %v2111_v52  ;;  %v1888_v27 = vadd.f32 %v1852_v41, %v1731_v35  ;;  %2517 = vmatmul.f32.gmra.mxu2 %v6644_v15  ;;  %v2011_v50 = vpop.f32.mrf.mxu0  ;;  %2407 = vmatmul.f32.gmra.mxu1 %v2111_v52  ;;  %v2912_v41 = vld [vmem:[#allocation2 + $0x19] sm:$0xff] }
 0x34e   : > { %v2044_v29 = vadd.f32 %v2008_v28, %v1888_v27 }
 0x34f   : > { %v2470_v23 = vpop.f32.mrf.mxu2  ;;  %2828 = vmatmul.f32.gmra.mxu0 %v6395_v9 }
 0x350   : > { %v2080_v13 = vadd.f32 %v6540_v31, %v2044_v29  ;;  %v6656_v2 = vadd.f32 %v2470_v23, %v2357_v58  ;;  %2634 = vmatmul.f32.gmra.mxu3 %v6652_v20 }
 0x351   : > { %v2363_v8 = vpop.f32.mrf.mxu1 }
 0x352   : > { %v2112_v28 = vmax.f32 %v2080_v13, 0.0 }
 0x353   : > { %v1855_v35 = vpop.f32.mrf.mxu3  ;;  %v6663_v52 = vld [vmem:[#allocation2 + $0x170] sm:$0xff] }
 0x354   : > { %2199 = vst [vmem:[#allocation2 + $0x181] sm:$0xff] %v2112_v28  ;;  %v1889_v9 = vadd.f32 %v1855_v35, %v1732_v34  ;;  %2520 = vmatmul.f32.gmra.mxu2 %v6663_v52  ;;  %v2784_v58 = vpop.f32.mrf.mxu0  ;;  %2977 = vmatmul.f32.vlgmr.msrb.gmra.mxu1 %v2912_v41  ;;  %v2913_v34 = vld [vmem:[#allocation2 + $0x21] sm:$0xff]  ;;  %v6684_v41 = vld [vmem:[#allocation2 + $0xca] sm:$0xff] }
 0x356   : > { %v2045_v27 = vadd.f32 %v2011_v50, %v1889_v9  ;;  %v2429_v50 = vadd.f32 %v6388_v44, %v6359_v53  ;;  %v4568_v44 = vld [vmem:[%s7622_s3 + $0x360] sm:$0xff]  ;;  %v2432_v9 = vadd.f32 %v6406_v48, %v6381_v12 }
 0x357   : > { %v2473_v19 = vpop.f32.mrf.mxu2  ;;  %2831 = vmatmul.f32.gmra.mxu0 %v6414_v36  ;;  %3353 = vmatpush.msra.mxu3 %v4568_v44  ;;  %v4584_v12 = vld [vmem:[%s7622_s3 + $0x3e0] sm:$0xff]  ;;  %v6729_v44 = vld [vmem:[#allocation2 + $0x49] sm:$0xff] }
 0x358   : > { %v2081_v29 = vadd.f32 %v6540_v31, %v2045_v27  ;;  %v6670_v14 = vadd.f32 %v2473_v19, %v2360_v38  ;;  %2637 = vmatmul.f32.gmra.mxu3 %v6666_v62  ;;  %v4601_v38 = vld [vmem:[%s7622_s3 + $0x468] sm:$0xff]  ;;  %v6695_v27 = vld [vmem:[#allocation2 + $0x31] sm:$0xff]  ;;  %3547 = vmatpush.msra.mxu0 %v4584_v12 }
 0x359   : > { %v2366_v23 = vpop.f32.mrf.mxu1  ;;  %3740 = vmatpush.msra.mxu1 %v4601_v38  ;;  %v6745_v12 = vld [vmem:[#allocation2 + $0x51] sm:$0xff] }
 0x35a   : > { %v2113_v13 = vmax.f32 %v2081_v29, 0.0 }
 0x35b   : > { %v2590_v17 = vpop.f32.mrf.mxu3 }
 0x35c   : > { %2200 = vst [vmem:[#allocation2 + $0x189] sm:$0xff] %v2113_v13  ;;  %v2686_v36 = vadd.f32 %v2590_v17, %v2429_v50  ;;  %3171 = vmatmul.f32.vlgmr.msrb.gmra.mxu2 %v6408_v1  ;;  %v2787_v31 = vpop.f32.mrf.mxu0  ;;  %2980 = vmatmul.f32.gmra.mxu1 %v2913_v34  ;;  %v6710_v13 = vld [vmem:[#allocation2 + $0x39] sm:$0xff] }
 0x35e   : > { %v6682_v28 = vadd.f32 %v2784_v58, %v2686_v36 }
 0x35f   : > { %v2476_v35 = vpop.f32.mrf.mxu2  ;;  %2834 = vmatmul.f32.gmra.mxu0 %v6427_v16 }
 0x360   : > { %v6687_v53 = vadd.f32 %v2476_v35, %v2363_v8  ;;  %2640 = vmatmul.f32.gmra.mxu3 %v6684_v41 }
 0x361   : > { %v2369_v1 = vpop.f32.mrf.mxu1 }
 0x363   : > { %v2593_v58 = vpop.f32.mrf.mxu3 }
 0x364   : > { %v2687_v19 = vadd.f32 %v2593_v58, %v2432_v9  ;;  %3174 = vmatmul.f32.gmra.mxu2 %v6419_v57  ;;  %v2790_v16 = vpop.f32.mrf.mxu0  ;;  %2983 = vmatmul.f32.gmra.mxu1 %v6695_v27 }
 0x366   : > { %v6699_v8 = vadd.f32 %v2787_v31, %v2687_v19  ;;  %v6720_v31 = vld [vmem:[#allocation2 + $0xe2] sm:$0xff]  ;;  %v6736_v19 = vld [vmem:[#allocation2 + $0xf2] sm:$0xff] }
 0x367   : > { %v2479_v29 = vpop.f32.mrf.mxu2  ;;  %2837 = vmatmul.f32.gmra.mxu0 %v6446_v21  ;;  %v4600_v21 = vld [vmem:[%s7622_s3 + $0x460] sm:$0xff] }
 0x368   : > { %v6704_v50 = vadd.f32 %v2479_v29, %v2366_v23  ;;  %2643 = vmatmul.f32.gmra.mxu3 %v6701_v7  ;;  %3741 = vmatpush.msra.mxu1 %v4600_v21  ;;  %v6755_v21 = vld [vmem:[#allocation2 + $0xfa] sm:$0xff] }
 0x369   : > { %v2372_v48 = vpop.f32.mrf.mxu1 }
 0x36b   : > { %v2596_v57 = vpop.f32.mrf.mxu3 }
 0x36c   : > { %v2688_v17 = vadd.f32 %v2596_v57, %v6423_v30  ;;  %3177 = vmatmul.f32.gmra.mxu2 %v6438_v61  ;;  %v2793_v34 = vpop.f32.mrf.mxu0  ;;  %2986 = vmatmul.f32.gmra.mxu1 %v6710_v13  ;;  %v4567_v30 = vld [vmem:[%s7622_s3 + $0x358] sm:$0xff] }
 0x36d   : > { %3354 = vmatpush.msra.mxu3 %v4567_v30 }
 0x36e   : > { %v6718_v23 = vadd.f32 %v2790_v16, %v2688_v17 }
 0x36f   : > { %v2482_v36 = vpop.f32.mrf.mxu2  ;;  %2840 = vmatmul.f32.gmra.mxu0 %v6459_v60 }
 0x370   : > { %v6723_v38 = vadd.f32 %v2482_v36, %v2369_v1  ;;  %2646 = vmatmul.f32.gmra.mxu3 %v6720_v31 }
 0x371   : > { %v2375_v61 = vpop.f32.mrf.mxu1 }
 0x373   : > { %v2599_v35 = vpop.f32.mrf.mxu3 }
 0x374   : > { %v2689_v9 = vadd.f32 %v2599_v35, %v6442_v10  ;;  %3180 = vmatmul.f32.gmra.mxu2 %v6451_v37  ;;  %v2796_v58 = vpop.f32.mrf.mxu0  ;;  %2989 = vmatmul.f32.gmra.mxu1 %v6729_v44  ;;  %v4583_v10 = vld [vmem:[%s7622_s3 + $0x3d8] sm:$0xff]  ;;  %v6764_v35 = vld [vmem:[#allocation2 + $0x61] sm:$0xff] }
 0x375   : > { %3548 = vmatpush.msra.mxu0 %v4583_v10 }
 0x376   : > { %v6734_v60 = vadd.f32 %v2793_v34, %v2689_v9 }
 0x377   : > { %v2485_v1 = vpop.f32.mrf.mxu2  ;;  %2843 = vmatmul.f32.gmra.mxu0 %v6478_v55  ;;  %v4599_v55 = vld [vmem:[%s7622_s3 + $0x458] sm:$0xff] }
 0x378   : > { %v6739_v16 = vadd.f32 %v2485_v1, %v2372_v48  ;;  %2649 = vmatmul.f32.gmra.mxu3 %v6736_v19  ;;  %3742 = vmatpush.msra.mxu1 %v4599_v55  ;;  %v6771_v1 = vld [vmem:[#allocation2 + $0x10a] sm:$0xff] }
 0x379   : > { %v2378_v29 = vpop.f32.mrf.mxu1 }
 0x37b   : > { %v2602_v37 = vpop.f32.mrf.mxu3 }
 0x37c   : > { %v2690_v57 = vadd.f32 %v2602_v37, %v6455_v25  ;;  %3183 = vmatmul.f32.gmra.mxu2 %v6470_v18  ;;  %v2799_v17 = vpop.f32.mrf.mxu0  ;;  %2992 = vmatmul.f32.gmra.mxu1 %v6745_v12  ;;  %v4566_v25 = vld [vmem:[%s7622_s3 + $0x350] sm:$0xff] }
 0x37d   : > { %3355 = vmatpush.msra.mxu3 %v4566_v25  ;;  %v6790_v25 = vld [vmem:[#allocation2 + $0x112] sm:$0xff] }
 0x37e   : > { %v6753_v48 = vadd.f32 %v2796_v58, %v2690_v57  ;;  %v6780_v57 = vld [vmem:[#allocation2 + $0x69] sm:$0xff] }
 0x37f   : > { %v2488_v34 = vpop.f32.mrf.mxu2  ;;  %2846 = vmatmul.f32.gmra.mxu0 %v6491_v3 }
 0x380   : > { %v6758_v36 = vadd.f32 %v2488_v34, %v2375_v61  ;;  %2652 = vmatmul.f32.gmra.mxu3 %v6755_v21 }
 0x381   : > { %v2381_v18 = vpop.f32.mrf.mxu1 }
 0x383   : > { %v2605_v30 = vpop.f32.mrf.mxu3 }
 0x384   : > { %v2691_v9 = vadd.f32 %v2605_v30, %v6474_v39  ;;  %3186 = vmatmul.f32.gmra.mxu2 %v6483_v43  ;;  %v2802_v58 = vpop.f32.mrf.mxu0  ;;  %2995 = vmatmul.f32.gmra.mxu1 %v6764_v35  ;;  %v4582_v39 = vld [vmem:[%s7622_s3 + $0x3d0] sm:$0xff] }
 0x385   : > { %3549 = vmatpush.msra.mxu0 %v4582_v39 }
 0x386   : > { %v6769_v3 = vadd.f32 %v2799_v17, %v2691_v9 }
 0x387   : > { %v2491_v61 = vpop.f32.mrf.mxu2  ;;  %2849 = vmatmul.f32.gmra.mxu0 %v6510_v0  ;;  %v4598_v0 = vld [vmem:[%s7622_s3 + $0x450] sm:$0xff] }
 0x388   : > { %v6774_v10 = vadd.f32 %v2491_v61, %v2378_v29  ;;  %2655 = vmatmul.f32.gmra.mxu3 %v6771_v1  ;;  %3743 = vmatpush.msra.mxu1 %v4598_v0  ;;  %v6799_v61 = vld [vmem:[#allocation2 + $0x79] sm:$0xff] }
 0x389   : > { %v2384_v37 = vpop.f32.mrf.mxu1 }
 0x38b   : > { %v2608_v43 = vpop.f32.mrf.mxu3 }
 0x38c   : > { %v2692_v17 = vadd.f32 %v2608_v43, %v6487_v40  ;;  %3189 = vmatmul.f32.gmra.mxu2 %v6502_v63  ;;  %v2805_v55 = vpop.f32.mrf.mxu0  ;;  %2998 = vmatmul.f32.gmra.mxu1 %v6780_v57  ;;  %v4565_v40 = vld [vmem:[%s7622_s3 + $0x348] sm:$0xff] }
 0x38d   : > { %3356 = vmatpush.msra.mxu3 %v4565_v40  ;;  %v6806_v43 = vld [vmem:[#allocation2 + $0x122] sm:$0xff] }
 0x38e   : > { %v6788_v29 = vadd.f32 %v2802_v58, %v2692_v17 }
 0x38f   : > { %v2494_v34 = vpop.f32.mrf.mxu2  ;;  %2852 = vmatmul.f32.gmra.mxu0 %v6523_v6 }
 0x390   : > { %v6793_v30 = vadd.f32 %v2494_v34, %v2381_v18  ;;  %2658 = vmatmul.f32.gmra.mxu3 %v6790_v25  ;;  %v6815_v34 = vld [vmem:[#allocation2 + $0x81] sm:$0xff] }
 0x391   : > { %v2387_v63 = vpop.f32.mrf.mxu1 }
 0x393   : > { %v2611_v9 = vpop.f32.mrf.mxu3 }
 0x394   : > { %v2693_v58 = vadd.f32 %v2611_v9, %v6506_v24  ;;  %3192 = vmatmul.f32.gmra.mxu2 %v6515_v46  ;;  %v2808_v39 = vpop.f32.mrf.mxu0  ;;  %3001 = vmatmul.f32.gmra.mxu1 %v6799_v61  ;;  %v4581_v24 = vld [vmem:[%s7622_s3 + $0x3c8] sm:$0xff] }
 0x395   : > { %3550 = vmatpush.msra.mxu0 %v4581_v24 }
 0x396   : > { %v6804_v6 = vadd.f32 %v2805_v55, %v2693_v58  ;;  %v6825_v58 = vld [vmem:[#allocation2 + $0x12a] sm:$0xff] }
 0x397   : > { %v2497_v18 = vpop.f32.mrf.mxu2  ;;  %2855 = vmatmul.f32.gmra.mxu0 %v6550_v47  ;;  %v4597_v47 = vld [vmem:[%s7622_s3 + $0x448] sm:$0xff] }
 0x398   : > { %v6809_v17 = vadd.f32 %v2497_v18, %v2384_v37  ;;  %2661 = vmatmul.f32.gmra.mxu3 %v6806_v43  ;;  %3744 = vmatpush.msra.mxu1 %v4597_v47  ;;  %v6841_v47 = vld [vmem:[#allocation2 + $0x13a] sm:$0xff] }
 0x399   : > { %v2390_v0 = vpop.f32.mrf.mxu1 }
 0x39b   : > { %v2614_v46 = vpop.f32.mrf.mxu3 }
 0x39c   : > { %v2694_v55 = vadd.f32 %v2614_v46, %v6519_v56  ;;  %3195 = vmatmul.f32.gmra.mxu2 %v6534_v32  ;;  %v2811_v40 = vpop.f32.mrf.mxu0  ;;  %3004 = vmatmul.f32.gmra.mxu1 %v6815_v34  ;;  %v4564_v56 = vld [vmem:[%s7622_s3 + $0x340] sm:$0xff]  ;;  %v6834_v46 = vld [vmem:[#allocation2 + $0x91] sm:$0xff] }
 0x39d   : > { %3357 = vmatpush.msra.mxu3 %v4564_v56 }
 0x39e   : > { %v6823_v37 = vadd.f32 %v2808_v39, %v2694_v55 }
 0x39f   : > { %v2500_v9 = vpop.f32.mrf.mxu2  ;;  %2858 = vmatmul.f32.gmra.mxu0 %v6578_v22 }
 0x3a0   : > { %7907 = vst [vmem:[#allocation24_spill] sm:$0xff] %v6823_v37  ;;  %v6828_v18 = vadd.f32 %v2500_v9, %v2387_v63  ;;  %2664 = vmatmul.f32.gmra.mxu3 %v6825_v58 }
 0x3a1   : > { %v2393_v32 = vpop.f32.mrf.mxu1 }
 0x3a3   : > { %v2617_v24 = vpop.f32.mrf.mxu3 }
 0x3a4   : > { %v2695_v39 = vadd.f32 %v2617_v24, %v6543_v11  ;;  %3198 = vmatmul.f32.gmra.mxu2 %v6561_v4  ;;  %v2814_v55 = vpop.f32.mrf.mxu0  ;;  %3007 = vmatmul.f32.gmra.mxu1 %v6834_v46  ;;  %v4580_v11 = vld [vmem:[%s7622_s3 + $0x3c0] sm:$0xff]  ;;  %v4563_v4 = vld [vmem:[%s7622_s3 + $0x338] sm:$0xff] }
 0x3a5   : > { %3551 = vmatpush.msra.mxu0 %v4580_v11  ;;  %3358 = vmatpush.msra.mxu3 %v4563_v4  ;;  %v4578_v11 = vld [vmem:[%s7622_s3 + $0x3b0] sm:$0xff]  ;;  %v4596_v4 = vld [vmem:[%s7622_s3 + $0x440] sm:$0xff] }
 0x3a6   : > { %v6839_v22 = vadd.f32 %v2811_v40, %v2695_v39  ;;  %v4579_v40 = vld [vmem:[%s7622_s3 + $0x3b8] sm:$0xff]  ;;  %3745 = vmatpush.msra.mxu1 %v4596_v4  ;;  %v6896_v4 = vld [vmem:[#allocation2 + $0xa9] sm:$0xff] }
 0x3a7   : > { %v2503_v63 = vpop.f32.mrf.mxu2  ;;  %2861 = vmatmul.f32.gmra.mxu0 %v6606_v45 }
 0x3a8   : > { %7908 = vst [vmem:[#allocation14_spill] sm:$0xff] %v6839_v22  ;;  %v6844_v9 = vadd.f32 %v2503_v63, %v2390_v0  ;;  %2667 = vmatmul.f32.gmra.mxu3 %v6841_v47  ;;  %v6856_v0 = vld [vmem:[#allocation2 + $0x99] sm:$0xff]  ;;  %3552 = vmatpush.msra.mxu0 %v4579_v40  ;;  %v4562_v63 = vld [vmem:[%s7622_s3 + $0x330] sm:$0xff]  ;;  %v6878_v22 = vld [vmem:[#allocation2 + $0x142] sm:$0xff] }
 0x3a9   : > { %v2396_v56 = vpop.f32.mrf.mxu1  ;;  %3359 = vmatpush.msra.mxu3 %v4562_v63  ;;  %v4560_v63 = vld [vmem:[%s7622_s3 + $0x320] sm:$0xff] }
 0x3aa   : > { %3553 = vmatpush.msra.mxu0 %v4578_v11 }
 0x3ab   : > { %v2620_v45 = vpop.f32.mrf.mxu3 }
 0x3ac   : > { %v2696_v24 = vadd.f32 %v2620_v45, %v6565_v54  ;;  %3201 = vmatmul.f32.gmra.mxu2 %v6592_v51  ;;  %v2817_v39 = vpop.f32.mrf.mxu0  ;;  %3010 = vmatmul.f32.gmra.mxu1 %v6856_v0  ;;  %v4561_v54 = vld [vmem:[%s7622_s3 + $0x328] sm:$0xff] }
 0x3ad   : > { %v4577_v51 = vld [vmem:[%s7622_s3 + $0x3a8] sm:$0xff]  ;;  %3360 = vmatpush.msra.mxu3 %v4561_v54 }
 0x3ae   : > { %v6876_v40 = vadd.f32 %v2814_v55, %v2696_v24  ;;  %3554 = vmatpush.msra.mxu0 %v4577_v51  ;;  %v4576_v55 = vld [vmem:[%s7622_s3 + $0x3a0] sm:$0xff]  ;;  %v4559_v24 = vld [vmem:[%s7622_s3 + $0x318] sm:$0xff] }
 0x3af   : > { %v2506_v45 = vpop.f32.mrf.mxu2  ;;  %2864 = vmatmul.f32.gmra.mxu0 %v6628_v33  ;;  %3361 = vmatpush.msra.mxu3 %v4560_v63  ;;  %v4575_v33 = vld [vmem:[%s7622_s3 + $0x398] sm:$0xff]  ;;  %v4557_v63 = vld [vmem:[%s7622_s3 + $0x308] sm:$0xff] }
 0x3b0   : > { %7909 = vst [vmem:[#allocation31_spill] sm:$0xff] %v6876_v40  ;;  %v6881_v37 = vadd.f32 %v2506_v45, %v2393_v32  ;;  %2670 = vmatmul.f32.gmra.mxu3 %v6878_v22  ;;  %3555 = vmatpush.msra.mxu0 %v4576_v55  ;;  %v4558_v45 = vld [vmem:[%s7622_s3 + $0x310] sm:$0xff] }
 0x3b1   : > { %v2399_v11 = vpop.f32.mrf.mxu1  ;;  %3362 = vmatpush.msra.mxu3 %v4559_v24  ;;  %v4574_v55 = vld [vmem:[%s7622_s3 + $0x390] sm:$0xff] }
 0x3b2   : > { %3556 = vmatpush.msra.mxu0 %v4575_v33  ;;  %v6912_v24 = vld [vmem:[#allocation2 + $0x152] sm:$0xff] }
 0x3b3   : > { %v2623_v32 = vpop.f32.mrf.mxu3  ;;  %3363 = vmatpush.msra.mxu3 %v4558_v45  ;;  %v6927_v45 = vld [vmem:[#allocation2 + $0xb1] sm:$0xff] }
 0x3b4   : > { %v2697_v54 = vadd.f32 %v2623_v32, %v6596_v26  ;;  %3204 = vmatmul.f32.gmra.mxu2 %v6617_v59  ;;  %v2820_v51 = vpop.f32.mrf.mxu0  ;;  %3013 = vmatmul.f32.gmra.mxu1 %v6896_v4  ;;  %v4573_v32 = vld [vmem:[%s7622_s3 + $0x388] sm:$0xff] }
 0x3b5   : > { %3364 = vmatpush.msra.mxu3 %v4557_v63  ;;  %3557 = vmatpush.msra.mxu0 %v4574_v55  ;;  %v4595_v55 = vld [vmem:[%s7622_s3 + $0x438] sm:$0xff] }
 0x3b6   : > { %v6910_v26 = vadd.f32 %v2817_v39, %v2697_v54  ;;  %v4556_v39 = vld [vmem:[%s7622_s3 + $0x300] sm:$0xff]  ;;  %3746 = vmatpush.msra.mxu1 %v4595_v55 }
 0x3b7   : > { %v2509_v59 = vpop.f32.mrf.mxu2  ;;  %2867 = vmatmul.f32.gmra.mxu0 %v6644_v15  ;;  %3365 = vmatpush.msra.mxu3 %v4556_v39  ;;  %v4572_v15 = vld [vmem:[%s7622_s3 + $0x380] sm:$0xff] }
 0x3b8   : > { %7910 = vst [vmem:[#allocation29_spill] sm:$0xff] %v6910_v26  ;;  %v6918_v40 = vadd.f32 %v2509_v59, %v2396_v56  ;;  %2673 = vmatmul.f32.gmra.mxu3 %v6912_v24  ;;  %3558 = vmatpush.msra.mxu0 %v4573_v32  ;;  %v6937_v39 = vld [vmem:[#allocation2 + $0x15a] sm:$0xff] }
 0x3b9   : > { %v2402_v33 = vpop.f32.mrf.mxu1  ;;  %7912 = vst [vmem:[#allocation35_spill] sm:$0xff] %v6937_v39 }
 0x3ba   : > { %3559 = vmatpush.msra.mxu0 %v4572_v15  ;;  %v6946_v15 = vld [vmem:[#allocation2 + $0xc1] sm:$0xff] }
 0x3bb   : > { %v2626_v54 = vpop.f32.mrf.mxu3 }
 0x3bc   : > { %v2698_v56 = vadd.f32 %v2626_v54, %v6621_v42  ;;  %3207 = vmatmul.f32.gmra.mxu2 %v6633_v49  ;;  %v2823_v63 = vpop.f32.mrf.mxu0  ;;  %3016 = vmatmul.f32.gmra.mxu1 %v6927_v45  ;;  %v3966_v42 = vld [vmem:[%s7624_s5 + $0x78] sm:$0xff] }
 0x3bd   : > { %3971 = vmatpush.msra.mxu2 %v3966_v42 }
 0x3be   : > { %v6935_v59 = vadd.f32 %v2820_v51, %v2698_v56 }
 0x3bf   : > { %v2512_v32 = vpop.f32.mrf.mxu2  ;;  %2870 = vmatmul.f32.gmra.mxu0 %v6663_v52  ;;  %v2748_v52 = vld [vmem:[#allocation2 + $0x180] sm:$0xff] }
 0x3c0   : > { %7911 = vst [vmem:[#allocation19_spill] sm:$0xff] %v6935_v59  ;;  %v6940_v26 = vadd.f32 %v2512_v32, %v2399_v11  ;;  %2676 = vmatmul.f32.gmra.mxu3 %v6937_v39  ;;  %v6953_v32 = vld [vmem:[#allocation2 + $0x16a] sm:$0xff] }
 0x3c1   : > { %v2405_v49 = vpop.f32.mrf.mxu1  ;;  %v6958_v39 = vld [vmem:[#allocation2 + $0xc9] sm:$0xff] }
 0x3c2   : > { %7913 = vst [vmem:[#allocation33_spill] sm:$0xff] %v6940_v26 }
 0x3c3   : > { %v2629_v54 = vpop.f32.mrf.mxu3 }
 0x3c4   : > { %v2699_v51 = vadd.f32 %v2629_v54, %v6637_v5  ;;  %3210 = vmatmul.f32.gmra.mxu2 %v6652_v20  ;;  %v2826_v56 = vpop.f32.mrf.mxu0  ;;  %3019 = vmatmul.f32.gmra.mxu1 %v6946_v15 }
 0x3c6   : > { %v6951_v11 = vadd.f32 %v2823_v63, %v2699_v51  ;;  %v4594_v63 = vld [vmem:[%s7622_s3 + $0x430] sm:$0xff] }
 0x3c7   : > { %v2515_v55 = vpop.f32.mrf.mxu2  ;;  %2873 = vmatmul.f32.gmra.mxu0 %v2748_v52  ;;  %3747 = vmatpush.msra.mxu1 %v4594_v63  ;;  %v6970_v52 = vld [vmem:[#allocation2 + $0x172] sm:$0xff] }
 0x3c8   : > { %7914 = vst [vmem:[#allocation27_spill] sm:$0xff] %v6951_v11  ;;  %v6955_v59 = vadd.f32 %v2515_v55, %v2402_v33  ;;  %2679 = vmatmul.f32.gmra.mxu3 %v6953_v32  ;;  %v6966_v33 = vld [vmem:[#allocation2 + $0x188] sm:$0xff]  ;;  %v6979_v63 = vld [vmem:[#allocation2 + $0xd9] sm:$0xff] }
 0x3c9   : > { %v2408_v42 = vpop.f32.mrf.mxu1  ;;  %7915 = vst [vmem:[#allocation36_spill] sm:$0xff] %v6966_v33 }
 0x3cb   : > { %v2632_v26 = vpop.f32.mrf.mxu3 }
 0x3cc   : > { %v2700_v5 = vadd.f32 %v2632_v26, %v6656_v2  ;;  %3213 = vmatmul.f32.gmra.mxu2 %v6666_v62  ;;  %v2829_v20 = vpop.f32.mrf.mxu0  ;;  %3022 = vmatmul.f32.gmra.mxu1 %v6958_v39  ;;  %v3965_v62 = vld [vmem:[%s7624_s5 + $0x70] sm:$0xff] }
 0x3cd   : > { %3972 = vmatpush.msra.mxu2 %v3965_v62 }
 0x3ce   : > { %v6968_v54 = vadd.f32 %v2826_v56, %v2700_v5 }
 0x3cf   : > { %v2518_v51 = vpop.f32.mrf.mxu2  ;;  %2876 = vmatmul.f32.gmra.mxu0 %v6966_v33 }
 0x3d0   : > { %7916 = vst [vmem:[#allocation45_spill] sm:$0xff] %v6968_v54  ;;  %v6973_v2 = vadd.f32 %v2518_v51, %v2405_v49  ;;  %2682 = vmatmul.f32.gmra.mxu3 %v6970_v52  ;;  %v3301_v54 = vld [vmem:[#allocation2 + $0x30] sm:$0xff] }
 0x3d1   : > { %v2978_v26 = vpop.f32.mrf.mxu1 }
 0x3d2   : > { %7917 = vst [vmem:[#allocation23_spill] sm:$0xff] %v6973_v2  ;;  %v6989_v2 = vld [vmem:[#allocation2 + $0xe1] sm:$0xff] }
 0x3d3   : > { %v2635_v55 = vpop.f32.mrf.mxu3 }
 0x3d4   : > { %v2701_v56 = vadd.f32 %v2635_v55, %v6670_v14  ;;  %3216 = vmatmul.f32.gmra.mxu2 %v6684_v41  ;;  %v2832_v5 = vpop.f32.mrf.mxu0  ;;  %3025 = vmatmul.f32.gmra.mxu1 %v6979_v63  ;;  %v3302_v55 = vld [vmem:[#allocation2 + $0x38] sm:$0xff] }
 0x3d6   : > { %v6984_v49 = vadd.f32 %v2829_v20, %v2701_v56  ;;  %v4593_v20 = vld [vmem:[%s7622_s3 + $0x428] sm:$0xff] }
 0x3d7   : > { %v2521_v51 = vpop.f32.mrf.mxu2  ;;  %3560 = vmatmul.f32.vlgmr.msra.gmra.mxu0 %v6695_v27  ;;  %3748 = vmatpush.msra.mxu1 %v4593_v20  ;;  %v3074_v27 = vadd.f32 %v2978_v26, %v6682_v28  ;;  %v3303_v20 = vld [vmem:[#allocation2 + $0x48] sm:$0xff] }
 0x3d8   : > { %v6987_v11 = vadd.f32 %v2521_v51, %v2408_v42  ;;  %3366 = vmatmul.f32.vlgmr.msra.gmra.mxu3 %v3301_v54  ;;  %v7006_v51 = vld [vmem:[#allocation2 + $0xf1] sm:$0xff] }
 0x3d9   : > { %v2981_v62 = vpop.f32.mrf.mxu1 }
 0x3db   : > { %v2638_v33 = vpop.f32.mrf.mxu3 }
 0x3dc   : > { %v2702_v14 = vadd.f32 %v2638_v33, %v6687_v53  ;;  %3219 = vmatmul.f32.gmra.mxu2 %v6701_v7  ;;  %v2835_v41 = vpop.f32.mrf.mxu0  ;;  %3028 = vmatmul.f32.gmra.mxu1 %v6989_v2  ;;  %v3964_v53 = vld [vmem:[%s7624_s5 + $0x68] sm:$0xff] }
 0x3dd   : > { %3973 = vmatpush.msra.mxu2 %v3964_v53  ;;  %v7017_v53 = vld [vmem:[#allocation2 + $0xf9] sm:$0xff] }
 0x3de   : > { %v6998_v42 = vadd.f32 %v2832_v5, %v2702_v14 }
 0x3df   : > { %v3172_v54 = vpop.f32.mrf.mxu2  ;;  %3563 = vmatmul.f32.gmra.mxu0 %v6710_v13  ;;  %v3075_v13 = vadd.f32 %v2981_v62, %v6699_v8  ;;  %v4592_v8 = vld [vmem:[%s7622_s3 + $0x420] sm:$0xff] }
 0x3e0   : > { %v7001_v56 = vadd.f32 %v3172_v54, %v3074_v27  ;;  %3369 = vmatmul.f32.gmra.mxu3 %v3302_v55  ;;  %3749 = vmatpush.msra.mxu1 %v4592_v8 }
 0x3e1   : > { %v2984_v7 = vpop.f32.mrf.mxu1 }
 0x3e3   : > { %v2641_v33 = vpop.f32.mrf.mxu3 }
 0x3e4   : > { %v2703_v28 = vadd.f32 %v2641_v33, %v6704_v50  ;;  %3222 = vmatmul.f32.gmra.mxu2 %v6720_v31  ;;  %v2838_v26 = vpop.f32.mrf.mxu0  ;;  %3031 = vmatmul.f32.gmra.mxu1 %v7006_v51  ;;  %v3304_v33 = vld [vmem:[#allocation2 + $0x50] sm:$0xff] }
 0x3e6   : > { %v7012_v5 = vadd.f32 %v2835_v41, %v2703_v28 }
 0x3e7   : > { %v3175_v14 = vpop.f32.mrf.mxu2  ;;  %3566 = vmatmul.f32.gmra.mxu0 %v6729_v44  ;;  %v3076_v44 = vadd.f32 %v2984_v7, %v6718_v23 }
 0x3e8   : > { %v7015_v27 = vadd.f32 %v3175_v14, %v3075_v13  ;;  %3372 = vmatmul.f32.gmra.mxu3 %v3303_v20  ;;  %v7034_v14 = vld [vmem:[#allocation2 + $0x109] sm:$0xff] }
 0x3e9   : > { %v2987_v54 = vpop.f32.mrf.mxu1 }
 0x3eb   : > { %v2644_v55 = vpop.f32.mrf.mxu3 }
 0x3ec   : > { %v2704_v50 = vadd.f32 %v2644_v55, %v6723_v38  ;;  %3225 = vmatmul.f32.gmra.mxu2 %v6736_v19  ;;  %v2841_v31 = vpop.f32.mrf.mxu0  ;;  %3034 = vmatmul.f32.gmra.mxu1 %v7017_v53  ;;  %v3963_v38 = vld [vmem:[%s7624_s5 + $0x60] sm:$0xff] }
 0x3ed   : > { %3974 = vmatpush.msra.mxu2 %v3963_v38  ;;  %v3305_v55 = vld [vmem:[#allocation2 + $0x60] sm:$0xff] }
 0x3ee   : > { %v7026_v62 = vadd.f32 %v2838_v26, %v2704_v50 }
 0x3ef   : > { %v3178_v41 = vpop.f32.mrf.mxu2  ;;  %3569 = vmatmul.f32.gmra.mxu0 %v6745_v12  ;;  %v3077_v12 = vadd.f32 %v2987_v54, %v6734_v60  ;;  %v4591_v60 = vld [vmem:[%s7622_s3 + $0x418] sm:$0xff] }
 0x3f0   : > { %v7029_v28 = vadd.f32 %v3178_v41, %v3076_v44  ;;  %3375 = vmatmul.f32.gmra.mxu3 %v3304_v33  ;;  %v7045_v41 = vld [vmem:[#allocation2 + $0x111] sm:$0xff]  ;;  %3750 = vmatpush.msra.mxu1 %v4591_v60  ;;  %v3306_v33 = vld [vmem:[#allocation2 + $0x68] sm:$0xff] }
 0x3f1   : > { %v2990_v19 = vpop.f32.mrf.mxu1  ;;  %v7073_v60 = vld [vmem:[#allocation2 + $0x129] sm:$0xff] }
 0x3f3   : > { %v2647_v13 = vpop.f32.mrf.mxu3 }
 0x3f4   : > { %v2705_v23 = vadd.f32 %v2647_v13, %v6739_v16  ;;  %3228 = vmatmul.f32.gmra.mxu2 %v6755_v21  ;;  %v2844_v7 = vpop.f32.mrf.mxu0  ;;  %3037 = vmatmul.f32.gmra.mxu1 %v7034_v14 }
 0x3f6   : > { %v7040_v26 = vadd.f32 %v2841_v31, %v2705_v23  ;;  %v7062_v23 = vld [vmem:[#allocation2 + $0x121] sm:$0xff] }
 0x3f7   : > { %v3181_v20 = vpop.f32.mrf.mxu2  ;;  %3572 = vmatmul.f32.gmra.mxu0 %v6764_v35  ;;  %v3078_v35 = vadd.f32 %v2990_v19, %v6753_v48 }
 0x3f8   : > { %v7043_v50 = vadd.f32 %v3181_v20, %v3077_v12  ;;  %3378 = vmatmul.f32.gmra.mxu3 %v3305_v55  ;;  %v3307_v20 = vld [vmem:[#allocation2 + $0x78] sm:$0xff] }
 0x3f9   : > { %v2993_v8 = vpop.f32.mrf.mxu1 }
 0x3fb   : > { %v2650_v44 = vpop.f32.mrf.mxu3 }
 0x3fc   : > { %v2706_v16 = vadd.f32 %v2650_v44, %v6758_v36  ;;  %3231 = vmatmul.f32.gmra.mxu2 %v6771_v1  ;;  %v2847_v21 = vpop.f32.mrf.mxu0  ;;  %3040 = vmatmul.f32.gmra.mxu1 %v7045_v41  ;;  %v3962_v36 = vld [vmem:[%s7624_s5 + $0x58] sm:$0xff] }
 0x3fd   : > { %3975 = vmatpush.msra.mxu2 %v3962_v36  ;;  %v7092_v36 = vld [vmem:[#allocation2 + $0x139] sm:$0xff] }
 0x3fe   : > { %v7054_v54 = vadd.f32 %v2844_v7, %v2706_v16 }
 0x3ff   : > { %v3184_v31 = vpop.f32.mrf.mxu2  ;;  %3575 = vmatmul.f32.gmra.mxu0 %v6780_v57  ;;  %v3079_v57 = vadd.f32 %v2993_v8, %v6769_v3  ;;  %v4590_v3 = vld [vmem:[%s7622_s3 + $0x410] sm:$0xff] }
 0x400   : > { %7918 = vst [vmem:[#allocation37_spill] sm:$0xff] %v7054_v54  ;;  %v7057_v38 = vadd.f32 %v3184_v31, %v3078_v35  ;;  %3381 = vmatmul.f32.gmra.mxu3 %v3306_v33  ;;  %3751 = vmatpush.msra.mxu1 %v4590_v3  ;;  %v3308_v35 = vld [vmem:[#allocation2 + $0x80] sm:$0xff] }
 0x401   : > { %v2996_v1 = vpop.f32.mrf.mxu1 }
 0x403   : > { %v2653_v13 = vpop.f32.mrf.mxu3 }
 0x404   : > { %v2707_v48 = vadd.f32 %v2653_v13, %v6774_v10  ;;  %3234 = vmatmul.f32.gmra.mxu2 %v6790_v25  ;;  %v2850_v19 = vpop.f32.mrf.mxu0  ;;  %3043 = vmatmul.f32.gmra.mxu1 %v7062_v23 }
 0x406   : > { %v7068_v7 = vadd.f32 %v2847_v21, %v2707_v48 }
 0x407   : > { %v3187_v12 = vpop.f32.mrf.mxu2  ;;  %3578 = vmatmul.f32.gmra.mxu0 %v6799_v61  ;;  %v3080_v61 = vadd.f32 %v2996_v1, %v6788_v29 }
 0x408   : > { %7919 = vst [vmem:[#allocation50_spill] sm:$0xff] %v7068_v7  ;;  %v7071_v55 = vadd.f32 %v3187_v12, %v3079_v57  ;;  %3384 = vmatmul.f32.gmra.mxu3 %v3307_v20 }
 0x409   : > { %v2999_v44 = vpop.f32.mrf.mxu1 }
 0x40b   : > { %v2656_v16 = vpop.f32.mrf.mxu3 }
 0x40c   : > { %v2708_v10 = vadd.f32 %v2656_v16, %v6793_v30  ;;  %3237 = vmatmul.f32.gmra.mxu2 %v6806_v43  ;;  %v2853_v25 = vpop.f32.mrf.mxu0  ;;  %3046 = vmatmul.f32.gmra.mxu1 %v7073_v60  ;;  %v3961_v30 = vld [vmem:[%s7624_s5 + $0x50] sm:$0xff] }
 0x40d   : > { %3976 = vmatpush.msra.mxu2 %v3961_v30 }
 0x40e   : > { %v7082_v8 = vadd.f32 %v2850_v19, %v2708_v10  ;;  %v3309_v19 = vld [vmem:[#allocation2 + $0x90] sm:$0xff] }
 0x40f   : > { %v3190_v21 = vpop.f32.mrf.mxu2  ;;  %3581 = vmatmul.f32.gmra.mxu0 %v6815_v34  ;;  %v3081_v34 = vadd.f32 %v2999_v44, %v6804_v6  ;;  %v4589_v6 = vld [vmem:[%s7622_s3 + $0x408] sm:$0xff]  ;;  %v3310_v44 = vld [vmem:[#allocation2 + $0x98] sm:$0xff] }
 0x410   : > { %7920 = vst [vmem:[#allocation28_spill] sm:$0xff] %v7082_v8  ;;  %v7085_v31 = vadd.f32 %v3190_v21, %v3080_v61  ;;  %3387 = vmatmul.f32.gmra.mxu3 %v3308_v35  ;;  %3752 = vmatpush.msra.mxu1 %v4589_v6 }
 0x411   : > { %v7090_v43 = vpop.f32.mrf.mxu1 }
 0x413   : > { %v2659_v33 = vpop.f32.mrf.mxu3 }
 0x414   : > { %v2709_v29 = vadd.f32 %v2659_v33, %v6809_v17  ;;  %3240 = vmatmul.f32.gmra.mxu2 %v6825_v58  ;;  %v2856_v1 = vpop.f32.mrf.mxu0  ;;  %3049 = vmatmul.f32.gmra.mxu1 %v7092_v36  ;;  %v7105_v17 = vld [vmem:[#allocation2 + $0x141] sm:$0xff]  ;;  %v7131_v33 = vld [vmem:[#allocation2 + $0x159] sm:$0xff] }
 0x416   : > { %v7098_v13 = vadd.f32 %v2853_v25, %v2709_v29  ;;  %v7121_v25 = vld [vmem:[#allocation2 + $0x151] sm:$0xff] }
 0x417   : > { %v3193_v48 = vpop.f32.mrf.mxu2  ;;  %3584 = vmatmul.f32.gmra.mxu0 %v6834_v46 }
 0x418   : > { %7921 = vst [vmem:[#allocation41_spill] sm:$0xff] %v7098_v13  ;;  %v7101_v57 = vadd.f32 %v3193_v48, %v3081_v34  ;;  %3390 = vmatmul.f32.gmra.mxu3 %v3309_v19  ;;  %v7147_v48 = vld [vmem:[#allocation2 + $0x169] sm:$0xff]  ;;  %v4632_v13 = vld [vmem:[#allocation2] sm:$0xff] }
 0x419   : > { %v7103_v12 = vpop.f32.mrf.mxu1 }
 0x41b   : > { %v2662_v20 = vpop.f32.mrf.mxu3 }
 0x41c   : > { %v2710_v58 = vadd.f32 %v2662_v20, %v6828_v18  ;;  %3243 = vmatmul.f32.gmra.mxu2 %v6841_v47  ;;  %v2859_v16 = vpop.f32.mrf.mxu0  ;;  %3052 = vmatmul.f32.gmra.mxu1 %v7105_v17  ;;  %v3960_v18 = vld [vmem:[%s7624_s5 + $0x48] sm:$0xff] }
 0x41d   : > { %3977 = vmatpush.msra.mxu2 %v3960_v18  ;;  %v7925_v20 = vld [vmem:[#allocation35_spill] sm:$0xff]  ;;  %v7157_v18 = vld [vmem:[#allocation2 + $0x171] sm:$0xff] }
 0x41e   : > { %v7113_v46 = vadd.f32 %v2856_v1, %v2710_v58 }
 0x41f   : > { %3587 = vmatmul.f32.gmra.mxu0 %v6856_v0  ;;  %v3311_v0 = vld [vmem:[#allocation2 + $0xa8] sm:$0xff] }
 0x420   : > { %7922 = vst [vmem:[#allocation25_spill] sm:$0xff] %v7113_v46  ;;  %3393 = vmatmul.f32.gmra.mxu3 %v3310_v44 }
 0x421   : > { %v7119_v10 = vpop.f32.mrf.mxu1 }
 0x423   : > { %v2665_v47 = vpop.f32.mrf.mxu3 }
 0x424   : > { %v2711_v3 = vadd.f32 %v2665_v47, %v6844_v9  ;;  %3246 = vmatmul.f32.gmra.mxu2 %v6878_v22  ;;  %v2862_v61 = vpop.f32.mrf.mxu0  ;;  %3055 = vmatmul.f32.gmra.mxu1 %v7121_v25  ;;  %v4588_v22 = vld [vmem:[%s7622_s3 + $0x400] sm:$0xff] }
 0x425   : > { %3753 = vmatpush.msra.mxu1 %v4588_v22  ;;  %v7927_v47 = vld [vmem:[#allocation33_spill] sm:$0xff]  ;;  %v7170_v22 = vld [vmem:[#allocation2 + $0x181] sm:$0xff] }
 0x426   : > { %v7126_v21 = vadd.f32 %v2859_v16, %v2711_v3  ;;  %v3313_v16 = vld [vmem:[#allocation2 + $0xc0] sm:$0xff] }
 0x427   : > { %3590 = vmatmul.f32.gmra.mxu0 %v6896_v4  ;;  %v3312_v4 = vld [vmem:[#allocation2 + $0xb0] sm:$0xff] }
 0x428   : > { %7923 = vst [vmem:[#allocation39_spill] sm:$0xff] %v7126_v21  ;;  %3396 = vmatmul.f32.gmra.mxu3 %v3311_v0  ;;  %v3702_v21 = vld [vmem:[#allocation2 + $0xca] sm:$0xff] }
 0x429   : > { %v7129_v35 = vpop.f32.mrf.mxu1 }
 0x42b   : > { %v2668_v30 = vpop.f32.mrf.mxu3 }
 0x42c   : > { %v2712_v29 = vadd.f32 %v2668_v30, %v6881_v37  ;;  %3249 = vmatmul.f32.gmra.mxu2 %v6912_v24  ;;  %3058 = vmatmul.f32.gmra.mxu1 %v7131_v33  ;;  %v2865_v9 = vpop.f32.mrf.mxu0  ;;  %v3959_v37 = vld [vmem:[%s7624_s5 + $0x40] sm:$0xff] }
 0x42d   : > { %3978 = vmatpush.msra.mxu2 %v3959_v37 }
 0x42e   : > { %v7139_v1 = vadd.f32 %v2862_v61, %v2712_v29  ;;  %v3314_v61 = vld [vmem:[#allocation2 + $0xc8] sm:$0xff] }
 0x42f   : > { %3593 = vmatmul.f32.gmra.mxu0 %v6927_v45 }
 0x430   : > { %7924 = vst [vmem:[#allocation46_spill] sm:$0xff] %v7139_v1  ;;  %3399 = vmatmul.f32.gmra.mxu3 %v3312_v4 }
 0x431   : > { %v7145_v34 = vpop.f32.mrf.mxu1 }
 0x433   : > { %v2671_v24 = vpop.f32.mrf.mxu3 }
 0x434   : > { %v2713_v19 = vadd.f32 %v2671_v24, %v6918_v40  ;;  %3252 = vmatmul.f32.gmra.mxu2 %v7925_v20  ;;  %3061 = vmatmul.f32.gmra.mxu1 %v7147_v48  ;;  %v2868_v45 = vpop.f32.mrf.mxu0  ;;  %v7182_v20 = vld [vmem:[#allocation2 + $0x189] sm:$0xff] }
 0x436   : > { %v7152_v58 = vadd.f32 %v2865_v9, %v2713_v19  ;;  %v7180_v19 = vld [vmem:[#allocation2 + $0x182] sm:$0xff] }
 0x437   : > { %3596 = vmatmul.f32.gmra.mxu0 %v6946_v15  ;;  %v3958_v15 = vld [vmem:[%s7624_s5 + $0x38] sm:$0xff] }
 0x438   : > { %7926 = vst [vmem:[#allocation40_spill] sm:$0xff] %v7152_v58  ;;  %3402 = vmatmul.f32.gmra.mxu3 %v3313_v16  ;;  %3979 = vmatpush.msra.mxu2 %v3958_v15  ;;  %v3316_v16 = vld [vmem:[#allocation2 + $0xe0] sm:$0xff] }
 0x439   : > { %v7155_v6 = vpop.f32.mrf.mxu1 }
 0x43b   : > { %v2674_v44 = vpop.f32.mrf.mxu3 }
 0x43c   : > { %v2714_v3 = vadd.f32 %v2674_v44, %v7927_v47  ;;  %3255 = vmatmul.f32.gmra.mxu2 %v6953_v32  ;;  %3064 = vmatmul.f32.gmra.mxu1 %v7157_v18  ;;  %v2871_v0 = vpop.f32.mrf.mxu0 }
 0x43e   : > { %v7162_v40 = vadd.f32 %v2868_v45, %v2714_v3  ;;  %v7930_v45 = vld [vmem:[#allocation23_spill] sm:$0xff] }
 0x43f   : > { %3599 = vmatmul.f32.gmra.mxu0 %v6958_v39  ;;  %v3315_v39 = vld [vmem:[#allocation2 + $0xd8] sm:$0xff]  ;;  %v7195_v3 = vld [vmem:[#allocation2 + $0x18a] sm:$0xff] }
 0x440   : > { %7928 = vst [vmem:[#allocation8_spill] sm:$0xff] %v7162_v40  ;;  %3405 = vmatmul.f32.gmra.mxu3 %v3314_v61  ;;  %v3689_v61 = vld [vmem:[#allocation2 + $0x32] sm:$0xff]  ;;  %v3327_v40 = vld [vmem:[#allocation2 + $0x168] sm:$0xff] }
 0x441   : > { %v7168_v30 = vpop.f32.mrf.mxu1 }
 0x443   : > { %v2677_v29 = vpop.f32.mrf.mxu3 }
 0x444   : > { %v2715_v32 = vadd.f32 %v2677_v29, %v6955_v59  ;;  %3258 = vmatmul.f32.gmra.mxu2 %v6970_v52  ;;  %3067 = vmatmul.f32.gmra.mxu1 %v7170_v22  ;;  %v2874_v37 = vpop.f32.mrf.mxu0 }
 0x446   : > { %v7175_v9 = vadd.f32 %v2871_v0, %v2715_v32 }
 0x447   : > { %3602 = vmatmul.f32.gmra.mxu0 %v6979_v63  ;;  %v3957_v63 = vld [vmem:[%s7624_s5 + $0x30] sm:$0xff] }
 0x448   : > { %7929 = vst [vmem:[#allocation32_spill] sm:$0xff] %v7175_v9  ;;  %3408 = vmatmul.f32.gmra.mxu3 %v3315_v39  ;;  %3980 = vmatpush.msra.mxu2 %v3957_v63  ;;  %v3690_v39 = vld [vmem:[#allocation2 + $0x3a] sm:$0xff]  ;;  %v7213_v63 = vpop.f32.mrf.mxu2 }
 0x449   : > { %v7178_v4 = vpop.f32.mrf.mxu1  ;;  %v3326_v9 = vld [vmem:[#allocation2 + $0x158] sm:$0xff] }
 0x44b   : > { %v2680_v24 = vpop.f32.mrf.mxu3 }
 0x44c   : > { %v2716_v59 = vadd.f32 %v2680_v24, %v7930_v45  ;;  %3261 = vmatmul.f32.gmra.mxu2 %v7180_v19  ;;  %3070 = vmatmul.f32.gmra.mxu1 %v7182_v20  ;;  %v2877_v0 = vpop.f32.mrf.mxu0  ;;  %v3691_v45 = vld [vmem:[#allocation2 + $0x4a] sm:$0xff] }
 0x44e   : > { %v7187_v52 = vadd.f32 %v2874_v37, %v2716_v59  ;;  %v3318_v37 = vld [vmem:[#allocation2 + $0xf8] sm:$0xff]  ;;  %v3319_v59 = vld [vmem:[#allocation2 + $0x108] sm:$0xff] }
 0x44f   : > { %3605 = vmatmul.f32.gmra.mxu0 %v6989_v2  ;;  %v3317_v2 = vld [vmem:[#allocation2 + $0xf0] sm:$0xff] }
 0x450   : > { %7931 = vst [vmem:[#allocation44_spill] sm:$0xff] %v7187_v52  ;;  %3411 = vmatmul.f32.gmra.mxu3 %v3316_v16  ;;  %v3692_v16 = vld [vmem:[#allocation2 + $0x52] sm:$0xff] }
 0x451   : > { %v7193_v44 = vpop.f32.mrf.mxu1 }
 0x453   : > { %v2683_v47 = vpop.f32.mrf.mxu3 }
 0x454   : > { %v2717_v15 = vadd.f32 %v2683_v47, %v6987_v11  ;;  %3264 = vmatmul.f32.gmra.mxu2 %v7195_v3  ;;  %3754 = vmatmul.f32.vlgmr.msra.gmra.mxu1 %v3689_v61  ;;  %v3956_v11 = vld [vmem:[%s7624_s5 + $0x28] sm:$0xff]  ;;  %v3955_v47 = vld [vmem:[%s7624_s5 + $0x20] sm:$0xff] }
 0x455   : > { %3981 = vmatpush.msra.mxu2 %v3956_v11  ;;  %v3954_v11 = vld [vmem:[%s7624_s5 + $0x18] sm:$0xff] }
 0x456   : > { %v7199_v29 = vadd.f32 %v2877_v0, %v2717_v15  ;;  %v3693_v15 = vld [vmem:[#allocation2 + $0x62] sm:$0xff] }
 0x457   : > { %3608 = vmatmul.f32.gmra.mxu0 %v7006_v51  ;;  %3982 = vmatpush.msra.mxu2 %v3955_v47  ;;  %v3321_v0 = vld [vmem:[#allocation2 + $0x120] sm:$0xff] }
 0x458   : > { %7932 = vst [vmem:[#allocation9_spill] sm:$0xff] %v7199_v29  ;;  %3414 = vmatmul.f32.gmra.mxu3 %v3317_v2 }
 0x459   : > { %v7202_v32 = vpop.f32.mrf.mxu1  ;;  %3983 = vmatpush.msra.mxu2 %v3954_v11  ;;  %v3697_v11 = vld [vmem:[#allocation2 + $0x92] sm:$0xff] }
 0x45b   : > { %v7241_v47 = vpop.f32.mrf.mxu3 }
 0x45c   : > { %3757 = vmatmul.f32.gmra.mxu1 %v3690_v39  ;;  %v3694_v39 = vld [vmem:[#allocation2 + $0x6a] sm:$0xff] }
 0x45f   : > { %3611 = vmatmul.f32.gmra.mxu0 %v7017_v53  ;;  %v3320_v53 = vld [vmem:[#allocation2 + $0x110] sm:$0xff] }
 0x460   : > { %3417 = vmatmul.f32.gmra.mxu3 %v3318_v37 }
 0x461   : > { %v7208_v24 = vpop.f32.mrf.mxu1 }
 0x464   : > { %3760 = vmatmul.f32.gmra.mxu1 %v3691_v45 }
 0x467   : > { %3614 = vmatmul.f32.gmra.mxu0 %v7034_v14  ;;  %v7221_v14 = vpop.f32.mrf.mxu2 }
 0x468   : > { %3420 = vmatmul.f32.gmra.mxu3 %v3319_v59  ;;  %v3695_v59 = vld [vmem:[#allocation2 + $0x7a] sm:$0xff] }
 0x469   : > { %v7211_v51 = vpop.f32.mrf.mxu1 }
 0x46a   : > { %7933 = vst [vmem:[#allocation43_spill] sm:$0xff] %v7211_v51  ;;  %v3706_v51 = vld [vmem:[#allocation2 + $0xfa] sm:$0xff] }
 0x46c   : > { %3763 = vmatmul.f32.gmra.mxu1 %v3692_v16  ;;  %v7235_v16 = vpop.f32.mrf.mxu0 }
 0x46f   : > { %3617 = vmatmul.f32.gmra.mxu0 %v7045_v41  ;;  %v3322_v41 = vld [vmem:[#allocation2 + $0x128] sm:$0xff]  ;;  %v7227_v37 = vpop.f32.mrf.mxu2 }
 0x470   : > { %3423 = vmatmul.f32.gmra.mxu3 %v3320_v53 }
 0x471   : > { %v7219_v61 = vpop.f32.mrf.mxu1 }
 0x472   : > { %7934 = vst [vmem:[#allocation49_spill] sm:$0xff] %v7219_v61 }
 0x474   : > { %3766 = vmatmul.f32.gmra.mxu1 %v3693_v15  ;;  %v3696_v15 = vld [vmem:[#allocation2 + $0x82] sm:$0xff] }
 0x477   : > { %3620 = vmatmul.f32.gmra.mxu0 %v7062_v23  ;;  %v3323_v23 = vld [vmem:[#allocation2 + $0x138] sm:$0xff] }
 0x478   : > { %3426 = vmatmul.f32.gmra.mxu3 %v3321_v0  ;;  %v3324_v0 = vld [vmem:[#allocation2 + $0x140] sm:$0xff] }
 0x479   : > { %v7224_v2 = vpop.f32.mrf.mxu1 }
 0x47a   : > { %7935 = vst [vmem:[#allocation10_spill] sm:$0xff] %v7224_v2 }
 0x47c   : > { %3769 = vmatmul.f32.gmra.mxu1 %v3694_v39  ;;  %v3953_v39 = vld [vmem:[%s7624_s5 + $0x10] sm:$0xff] }
 0x47d   : > { %3984 = vmatpush.msra.mxu2 %v3953_v39 }
 0x47f   : > { %3623 = vmatmul.f32.gmra.mxu0 %v7073_v60  ;;  %v7239_v60 = vpop.f32.mrf.mxu2 }
 0x480   : > { %3429 = vmatmul.f32.gmra.mxu3 %v3322_v41  ;;  %v7249_v41 = vpop.f32.mrf.mxu0 }
 0x481   : > { %v7232_v45 = vpop.f32.mrf.mxu1 }
 0x482   : > { %7936 = vst [vmem:[#allocation38_spill] sm:$0xff] %v7232_v45 }
 0x484   : > { %3772 = vmatmul.f32.gmra.mxu1 %v3695_v59 }
 0x487   : > { %3626 = vmatmul.f32.gmra.mxu0 %v7092_v36  ;;  %v7251_v59 = vpop.f32.mrf.mxu2 }
 0x488   : > { %3432 = vmatmul.f32.gmra.mxu3 %v3323_v23  ;;  %v7253_v23 = vpop.f32.mrf.mxu3  ;;  %v7258_v29 = vpop.f32.mrf.mxu0 }
 0x489   : > { %v7237_v53 = vpop.f32.mrf.mxu1 }
 0x48a   : > { %7937 = vst [vmem:[#allocation51_spill] sm:$0xff] %v7237_v53 }
 0x48c   : > { %3775 = vmatmul.f32.gmra.mxu1 %v3696_v15  ;;  %v3325_v15 = vld [vmem:[#allocation2 + $0x150] sm:$0xff] }
 0x48f   : > { %3629 = vmatmul.f32.gmra.mxu0 %v7105_v17  ;;  %v7260_v52 = vpop.f32.mrf.mxu2 }
 0x490   : > { %3435 = vmatmul.f32.gmra.mxu3 %v3324_v0  ;;  %v3698_v0 = vld [vmem:[#allocation2 + $0x9a] sm:$0xff]  ;;  %v7262_v39 = vpop.f32.mrf.mxu3 }
 0x491   : > { %v7247_v36 = vpop.f32.mrf.mxu1 }
 0x492   : > { %7938 = vst [vmem:[#allocation11_spill] sm:$0xff] %v7247_v36 }
 0x494   : > { %3778 = vmatmul.f32.gmra.mxu1 %v3697_v11  ;;  %v3952_v11 = vld [vmem:[%s7624_s5 + $0x8] sm:$0xff] }
 0x495   : > { %3985 = vmatpush.msra.mxu2 %v3952_v11  ;;  %v3951_v11 = vld [vmem:[%s7624_s5] sm:$0xff] }
 0x497   : > { %3632 = vmatmul.f32.gmra.mxu0 %v7121_v25  ;;  %v7273_v58 = vpop.f32.mrf.mxu2  ;;  %3986 = vmatpush.msra.mxu2 %v3951_v11  ;;  %v7944_v11 = vld [vmem:[#allocation36_spill] sm:$0xff] }
 0x498   : > { %3438 = vmatmul.f32.gmra.mxu3 %v3325_v15  ;;  %v3699_v15 = vld [vmem:[#allocation2 + $0xaa] sm:$0xff]  ;;  %v7275_v1 = vpop.f32.mrf.mxu3 }
 0x499   : > { %v7256_v17 = vpop.f32.mrf.mxu1 }
 0x49a   : > { %7939 = vst [vmem:[#allocation48_spill] sm:$0xff] %v7256_v17  ;;  %v3328_v17 = vld [vmem:[#allocation2 + $0x170] sm:$0xff] }
 0x49c   : > { %3781 = vmatmul.f32.gmra.mxu1 %v3698_v0  ;;  %v7270_v0 = vpop.f32.mrf.mxu0 }
 0x49f   : > { %3635 = vmatmul.f32.gmra.mxu0 %v7131_v33 }
 0x4a0   : > { %3441 = vmatmul.f32.gmra.mxu3 %v3326_v9  ;;  %v3700_v9 = vld [vmem:[#allocation2 + $0xb2] sm:$0xff] }
 0x4a1   : > { %v7268_v25 = vpop.f32.mrf.mxu1 }
 0x4a2   : > { %7940 = vst [vmem:[#allocation42_spill] sm:$0xff] %v7268_v25  ;;  %v7287_v25 = vpop.f32.mrf.mxu2 }
 0x4a4   : > { %3784 = vmatmul.f32.gmra.mxu1 %v3699_v15  ;;  %v7283_v15 = vpop.f32.mrf.mxu0 }
 0x4a7   : > { %3638 = vmatmul.f32.gmra.mxu0 %v7147_v48 }
 0x4a8   : > { %3444 = vmatmul.f32.gmra.mxu3 %v3327_v40  ;;  %v7289_v40 = vpop.f32.mrf.mxu3 }
 0x4a9   : > { %v7277_v33 = vpop.f32.mrf.mxu1 }
 0x4aa   : > { %7941 = vst [vmem:[#allocation47_spill] sm:$0xff] %v7277_v33  ;;  %v3701_v33 = vld [vmem:[#allocation2 + $0xc2] sm:$0xff]  ;;  %v7296_v36 = vpop.f32.mrf.mxu2 }
 0x4ac   : > { %3787 = vmatmul.f32.gmra.mxu1 %v3700_v9  ;;  %v3329_v9 = vld [vmem:[#allocation2 + $0x180] sm:$0xff] }
 0x4af   : > { %3641 = vmatmul.f32.gmra.mxu0 %v7157_v18 }
 0x4b0   : > { %3447 = vmatmul.f32.gmra.mxu3 %v3328_v17  ;;  %v7294_v17 = vpop.f32.mrf.mxu0  ;;  %v7298_v46 = vpop.f32.mrf.mxu3 }
 0x4b1   : > { %v7285_v48 = vpop.f32.mrf.mxu1 }
 0x4b2   : > { %7942 = vst [vmem:[#allocation53_spill] sm:$0xff] %v7285_v48 }
 0x4b4   : > { %3790 = vmatmul.f32.gmra.mxu1 %v3701_v33  ;;  %v3703_v33 = vld [vmem:[#allocation2 + $0xda] sm:$0xff] }
 0x4b7   : > { %3644 = vmatmul.f32.gmra.mxu0 %v7170_v22  ;;  %v3525_v22 = vld [vmem:[#allocation2 + $0x199] sm:$0xff] }
 0x4b8   : > { %3450 = vmatmul.f32.gmra.mxu3 %v3329_v9  ;;  %v7304_v9 = vpop.f32.mrf.mxu0  ;;  %v7308_v53 = vpop.f32.mrf.mxu3 }
 0x4b9   : > { %v7292_v18 = vpop.f32.mrf.mxu1 }
 0x4ba   : > { %7943 = vst [vmem:[#allocation17_spill] sm:$0xff] %v7292_v18  ;;  %v7306_v18 = vpop.f32.mrf.mxu2 }
 0x4bc   : > { %3793 = vmatmul.f32.gmra.mxu1 %v3702_v21  ;;  %v3704_v21 = vld [vmem:[#allocation2 + $0xe2] sm:$0xff] }
 0x4bf   : > { %3647 = vmatmul.f32.gmra.mxu0 %v7182_v20  ;;  %v3463_v20 = vadd.f32 %v7241_v47, %v7001_v56  ;;  %v3705_v56 = vld [vmem:[#allocation2 + $0xf2] sm:$0xff]  ;;  %v3464_v47 = vadd.f32 %v7253_v23, %v7015_v27 }
 0x4c0   : > { %3453 = vmatmul.f32.gmra.mxu3 %v7944_v11  ;;  %v3526_v11 = vld [vmem:[#allocation2 + $0x1a1] sm:$0xff]  ;;  %v7318_v8 = vpop.f32.mrf.mxu3 }
 0x4c1   : > { %v7302_v48 = vpop.f32.mrf.mxu1 }
 0x4c2   : > { %7945 = vst [vmem:[#allocation21_spill] sm:$0xff] %v7302_v48  ;;  %v7314_v48 = vpop.f32.mrf.mxu0 }
 0x4c4   : > { %3796 = vmatmul.f32.gmra.mxu1 %v3703_v33  ;;  %v7316_v33 = vpop.f32.mrf.mxu2 }
 0x4c7   : > { %3650 = vmatmul.f32.gmra.mxu0 %v3525_v22  ;;  %v3657_v22 = vadd.f32 %v7235_v16, %v3463_v20 }
 0x4c8   : > { %3456 = vmatmul.f32.gmra.mxu3 %v4632_v13  ;;  %v7332_v54 = vpop.f32.mrf.mxu3 }
 0x4c9   : > { %v7310_v45 = vpop.f32.mrf.mxu1 }
 0x4ca   : > { %7946 = vst [vmem:[#allocation18_spill] sm:$0xff] %v7310_v45  ;;  %v7324_v45 = vld [vmem:[%s7623_s4] ss:$0 sm:$0xff]  ;;  %v7338_v23 = vpop.f32.mrf.mxu0 }
 0x4cc   : > { %3799 = vmatmul.f32.gmra.mxu1 %v3704_v21  ;;  %v7330_v16 = vpop.f32.mrf.mxu2 }
 0x4cf   : > { %3653 = vmatmul.f32.gmra.mxu0 %v3526_v11 }
 0x4d0   : > { %3459 = vmatmul.f32.gmra.mxu3 %v4632_v13  ;;  %v3658_v13 = vadd.f32 %v7249_v41, %v3464_v47  ;;  %v3707_v47 = vld [vmem:[#allocation2 + $0x10a] sm:$0xff] }
 0x4d1   : > { %v3755_v2 = vpop.f32.mrf.mxu1 }
 0x4d2   : > { %v3851_v7 = vadd.f32 %v3755_v2, %v3657_v22  ;;  %v3465_v2 = vadd.f32 %v7262_v39, %v7029_v28  ;;  %v7345_v28 = vpop.f32.mrf.mxu3 }
 0x4d4   : > { %v3887_v21 = vadd.f32 %v7324_v45, %v3851_v7  ;;  %3802 = vmatmul.f32.gmra.mxu1 %v3705_v56  ;;  %v3659_v7 = vadd.f32 %v7258_v29, %v3465_v2  ;;  %v3708_v2 = vld [vmem:[#allocation2 + $0x112] sm:$0xff] }
 0x4d6   : > { %v3919_v11 = vmax.f32 %v3887_v21, 0.0  ;;  %v7342_v21 = vpop.f32.mrf.mxu2 }
 0x4d8   : > { %3987 = vmatmul.f32.vlgmr.msra.gmra.mxu2 %v3919_v11 }
 0x4d9   : > { %v3758_v61 = vpop.f32.mrf.mxu1 }
 0x4da   : > { %v3852_v20 = vadd.f32 %v3758_v61, %v3658_v13  ;;  %v3466_v61 = vadd.f32 %v7275_v1, %v7043_v50 }
 0x4dc   : > { %v3888_v22 = vadd.f32 %v7324_v45, %v3852_v20  ;;  %3805 = vmatmul.f32.gmra.mxu1 %v3706_v51  ;;  %v3660_v39 = vadd.f32 %v7270_v0, %v3466_v61  ;;  %v7348_v20 = vpop.f32.mrf.mxu0  ;;  %v3468_v61 = vadd.f32 %v7298_v46, %v7071_v55 }
 0x4de   : > { %v3920_v27 = vmax.f32 %v3888_v22, 0.0  ;;  %v3467_v22 = vadd.f32 %v7289_v40, %v7057_v38  ;;  %v7353_v1 = vpop.f32.mrf.mxu2 }
 0x4e0   : > { %3990 = vmatmul.f32.gmra.mxu2 %v3920_v27 }
 0x4e1   : > { %v3761_v41 = vpop.f32.mrf.mxu1 }
 0x4e2   : > { %v3853_v56 = vadd.f32 %v3761_v41, %v3659_v7  ;;  %v7355_v7 = vpop.f32.mrf.mxu3  ;;  %v3661_v41 = vadd.f32 %v7283_v15, %v3467_v22  ;;  %v3469_v22 = vadd.f32 %v7308_v53, %v7085_v31 }
 0x4e4   : > { %v3889_v11 = vadd.f32 %v7324_v45, %v3853_v56  ;;  %3808 = vmatmul.f32.gmra.mxu1 %v3707_v47  ;;  %v3709_v47 = vld [vmem:[#allocation2 + $0x122] sm:$0xff]  ;;  %v7361_v38 = vpop.f32.mrf.mxu0 }
 0x4e6   : > { %v3921_v51 = vmax.f32 %v3889_v11, 0.0 }
 0x4e8   : > { %3993 = vmatmul.f32.gmra.mxu2 %v3921_v51  ;;  %v7363_v51 = vpop.f32.mrf.mxu2 }
 0x4e9   : > { %v3764_v29 = vpop.f32.mrf.mxu1 }
 0x4ea   : > { %v3854_v13 = vadd.f32 %v3764_v29, %v3660_v39  ;;  %v3662_v39 = vadd.f32 %v7294_v17, %v3468_v61  ;;  %v7366_v29 = vpop.f32.mrf.mxu3  ;;  %v3470_v61 = vadd.f32 %v7318_v8, %v7101_v57 }
 0x4ec   : > { %v3890_v50 = vadd.f32 %v7324_v45, %v3854_v13  ;;  %3811 = vmatmul.f32.gmra.mxu1 %v3708_v2  ;;  %v3710_v2 = vld [vmem:[#allocation2 + $0x12a] sm:$0xff] }
 0x4ee   : > { %v3922_v27 = vmax.f32 %v3890_v50, 0.0  ;;  %v7371_v50 = vpop.f32.mrf.mxu0 }
 0x4f0   : > { %3996 = vmatmul.f32.gmra.mxu2 %v3922_v27  ;;  %v3663_v27 = vadd.f32 %v7304_v9, %v3469_v22  ;;  %v3664_v9 = vadd.f32 %v7314_v48, %v3470_v61  ;;  %v3712_v22 = vld [vmem:[#allocation2 + $0x142] sm:$0xff] }
 0x4f1   : > { %v3767_v0 = vpop.f32.mrf.mxu1 }
 0x4f2   : > { %v3855_v56 = vadd.f32 %v3767_v0, %v3661_v41  ;;  %v7374_v0 = vpop.f32.mrf.mxu2 }
 0x4f4   : > { %v3891_v11 = vadd.f32 %v7324_v45, %v3855_v56  ;;  %3814 = vmatmul.f32.gmra.mxu1 %v3709_v47  ;;  %v7376_v56 = vpop.f32.mrf.mxu3  ;;  %v3711_v47 = vld [vmem:[#allocation2 + $0x13a] sm:$0xff] }
 0x4f6   : > { %v3923_v40 = vmax.f32 %v3891_v11, 0.0  ;;  %v7947_v11 = vld [vmem:[#allocation24_spill] sm:$0xff] }
 0x4f8   : > { %3999 = vmatmul.f32.gmra.mxu2 %v3923_v40  ;;  %v3082_v40 = vadd.f32 %v7090_v43, %v7947_v11 }
 0x4f9   : > { %v3770_v15 = vpop.f32.mrf.mxu1 }
 0x4fa   : > { %v3856_v13 = vadd.f32 %v3770_v15, %v3662_v39  ;;  %v7384_v39 = vpop.f32.mrf.mxu0  ;;  %v7388_v8 = vpop.f32.mrf.mxu2 }
 0x4fc   : > { %v3892_v55 = vadd.f32 %v7324_v45, %v3856_v13  ;;  %3817 = vmatmul.f32.gmra.mxu1 %v3710_v2  ;;  %v3276_v13 = vadd.f32 %v7213_v63, %v3082_v40 }
 0x4fe   : > { %v3924_v46 = vmax.f32 %v3892_v55, 0.0  ;;  %v3471_v55 = vadd.f32 %v7332_v54, %v3276_v13  ;;  %v3713_v54 = vld [vmem:[#allocation2 + $0x152] sm:$0xff] }
 0x500   : > { %4002 = vmatmul.f32.gmra.mxu2 %v3924_v46  ;;  %v7391_v46 = vpop.f32.mrf.mxu3 }
 0x501   : > { %v3773_v41 = vpop.f32.mrf.mxu1 }
 0x502   : > { %v3857_v17 = vadd.f32 %v3773_v41, %v3663_v27  ;;  %v7948_v27 = vld [vmem:[#allocation14_spill] sm:$0xff]  ;;  %v3665_v41 = vadd.f32 %v7338_v23, %v3471_v55  ;;  %v3600_v61 = vpop.f32.mrf.mxu0  ;;  %v7399_v11 = vpop.f32.mrf.mxu2 }
 0x503   : > { %v3083_v48 = vadd.f32 %v7103_v12, %v7948_v27  ;;  %v7950_v27 = vld [vmem:[#allocation29_spill] sm:$0xff] }
 0x504   : > { %v3893_v31 = vadd.f32 %v7324_v45, %v3857_v17  ;;  %3820 = vmatmul.f32.gmra.mxu1 %v3711_v47 }
 0x505   : > { %v3277_v63 = vadd.f32 %v7221_v14, %v3083_v48  ;;  %v3085_v48 = vadd.f32 %v7129_v35, %v7950_v27 }
 0x506   : > { %v3925_v53 = vmax.f32 %v3893_v31, 0.0 }
 0x507   : > { %v3472_v31 = vadd.f32 %v7345_v28, %v3277_v63 }
 0x508   : > { %4005 = vmatmul.f32.gmra.mxu2 %v3925_v53 }
 0x509   : > { %v3776_v15 = vpop.f32.mrf.mxu1  ;;  %v3666_v23 = vadd.f32 %v7348_v20, %v3472_v31 }
 0x50a   : > { %v3858_v2 = vadd.f32 %v3776_v15, %v3664_v9  ;;  %v3409_v9 = vpop.f32.mrf.mxu3  ;;  %v7949_v15 = vld [vmem:[#allocation31_spill] sm:$0xff] }
 0x50b   : > { %v3084_v12 = vadd.f32 %v7119_v10, %v7949_v15 }
 0x50c   : > { %v3894_v57 = vadd.f32 %v7324_v45, %v3858_v2  ;;  %3823 = vmatmul.f32.gmra.mxu1 %v3712_v22  ;;  %v3714_v22 = vld [vmem:[#allocation2 + $0x15a] sm:$0xff] }
 0x50d   : > { %v3278_v14 = vadd.f32 %v7227_v37, %v3084_v12  ;;  %v3279_v37 = vadd.f32 %v7239_v60, %v3085_v48 }
 0x50e   : > { %v3926_v43 = vmax.f32 %v3894_v57, 0.0  ;;  %v3603_v57 = vpop.f32.mrf.mxu0 }
 0x50f   : > { %v3473_v28 = vadd.f32 %v7355_v7, %v3278_v14  ;;  %v3474_v7 = vadd.f32 %v7366_v29, %v3279_v37  ;;  %v3716_v14 = vld [vmem:[#allocation2 + $0x172] sm:$0xff] }
 0x510   : > { %4008 = vmatmul.f32.gmra.mxu2 %v3926_v43 }
 0x511   : > { %v3779_v17 = vpop.f32.mrf.mxu1  ;;  %v3667_v10 = vadd.f32 %v7361_v38, %v3473_v28  ;;  %v3668_v15 = vadd.f32 %v7371_v50, %v3474_v7  ;;  %v7952_v28 = vld [vmem:[#allocation27_spill] sm:$0xff] }
 0x512   : > { %v3859_v47 = vadd.f32 %v3779_v17, %v3665_v41  ;;  %v7409_v41 = vpop.f32.mrf.mxu2  ;;  %v3412_v20 = vpop.f32.mrf.mxu3 }
 0x514   : > { %v3895_v53 = vadd.f32 %v7324_v45, %v3859_v47  ;;  %3826 = vmatmul.f32.gmra.mxu1 %v3713_v54  ;;  %v3715_v47 = vld [vmem:[#allocation2 + $0x16a] sm:$0xff] }
 0x516   : > { %v3927_v40 = vmax.f32 %v3895_v53, 0.0  ;;  %v3606_v53 = vpop.f32.mrf.mxu0 }
 0x518   : > { %4011 = vmatmul.f32.gmra.mxu2 %v3927_v40  ;;  %v7951_v40 = vld [vmem:[#allocation19_spill] sm:$0xff] }
 0x519   : > { %v3782_v13 = vpop.f32.mrf.mxu1  ;;  %v3086_v35 = vadd.f32 %v7145_v34, %v7951_v40  ;;  %v3087_v34 = vadd.f32 %v7155_v6, %v7952_v28 }
 0x51a   : > { %v3860_v2 = vadd.f32 %v3782_v13, %v3666_v23  ;;  %v7419_v23 = vpop.f32.mrf.mxu2  ;;  %v3415_v13 = vpop.f32.mrf.mxu3 }
 0x51b   : > { %v3280_v12 = vadd.f32 %v7251_v59, %v3086_v35  ;;  %v3281_v59 = vadd.f32 %v7260_v52, %v3087_v34 }
 0x51c   : > { %v3896_v55 = vadd.f32 %v7324_v45, %v3860_v2  ;;  %3829 = vmatmul.f32.gmra.mxu1 %v3714_v22 }
 0x51d   : > { %v3475_v29 = vadd.f32 %v7376_v56, %v3280_v12 }
 0x51e   : > { %v3928_v43 = vmax.f32 %v3896_v55, 0.0  ;;  %v3609_v55 = vpop.f32.mrf.mxu0 }
 0x51f   : > { %v3669_v50 = vadd.f32 %v7384_v39, %v3475_v29  ;;  %v3090_v29 = vadd.f32 %v7193_v44, %v6998_v42  ;;  %v3091_v42 = vadd.f32 %v7202_v32, %v7012_v5  ;;  %v7458_v5 = vld [vmem:[#allocation3] ss:$0 sm:$0xff] }
 0x520   : > { %4014 = vmatmul.f32.gmra.mxu2 %v3928_v43 }
 0x521   : > { %v3785_v17 = vpop.f32.mrf.mxu1  ;;  %v3284_v28 = vadd.f32 %v7296_v36, %v3090_v29 }
 0x522   : > { %v3861_v63 = vadd.f32 %v3785_v17, %v3667_v10  ;;  %v7427_v48 = vpop.f32.mrf.mxu2  ;;  %v3476_v10 = vadd.f32 %v7391_v46, %v3281_v59  ;;  %v3418_v17 = vpop.f32.mrf.mxu3 }
 0x523   : > { %v3479_v34 = vadd.f32 %v3415_v13, %v3284_v28 }
 0x524   : > { %v3897_v54 = vadd.f32 %v7324_v45, %v3861_v63  ;;  %3832 = vmatmul.f32.gmra.mxu1 %v3715_v47  ;;  %v7953_v63 = vld [vmem:[#allocation45_spill] sm:$0xff]  ;;  %v3670_v39 = vadd.f32 %v3600_v61, %v3476_v10 }
 0x525   : > { %v3088_v6 = vadd.f32 %v7168_v30, %v7953_v63  ;;  %v3673_v44 = vadd.f32 %v3609_v55, %v3479_v34  ;;  %v3092_v63 = vadd.f32 %v7208_v24, %v7026_v62 }
 0x526   : > { %v3929_v31 = vmax.f32 %v3897_v54, 0.0  ;;  %v3612_v54 = vpop.f32.mrf.mxu0 }
 0x527   : > { %v3282_v7 = vadd.f32 %v7273_v58, %v3088_v6 }
 0x528   : > { %4017 = vmatmul.f32.gmra.mxu2 %v3929_v31 }
 0x529   : > { %v3788_v38 = vpop.f32.mrf.mxu1  ;;  %v3477_v31 = vadd.f32 %v3409_v9, %v3282_v7 }
 0x52a   : > { %v3862_v60 = vadd.f32 %v3788_v38, %v3668_v15  ;;  %v7437_v46 = vpop.f32.mrf.mxu2  ;;  %v3421_v35 = vpop.f32.mrf.mxu3  ;;  %v3089_v15 = vadd.f32 %v7178_v4, %v6984_v49  ;;  %v3719_v38 = vld [vmem:[#allocation2 + $0x19a] sm:$0xff] }
 0x52b   : > { %v3671_v30 = vadd.f32 %v3603_v57, %v3477_v31 }
 0x52c   : > { %v3898_v2 = vadd.f32 %v7324_v45, %v3862_v60  ;;  %3835 = vmatmul.f32.gmra.mxu1 %v3716_v14  ;;  %v3283_v58 = vadd.f32 %v7287_v25, %v3089_v15 }
 0x52e   : > { %v3930_v22 = vmax.f32 %v3898_v2, 0.0  ;;  %v3478_v60 = vadd.f32 %v3412_v20, %v3283_v58  ;;  %v3615_v14 = vpop.f32.mrf.mxu0 }
 0x530   : > { %4020 = vmatmul.f32.gmra.mxu2 %v3930_v22  ;;  %v3672_v49 = vadd.f32 %v3606_v53, %v3478_v60  ;;  %v3720_v22 = vld [vmem:[#allocation2 + $0x1a2] sm:$0xff]  ;;  %v3285_v53 = vadd.f32 %v7306_v18, %v3091_v42  ;;  %v3286_v18 = vadd.f32 %v7316_v33, %v3092_v63 }
 0x531   : > { %v3791_v43 = vpop.f32.mrf.mxu1  ;;  %v7954_v33 = vld [vmem:[#allocation43_spill] sm:$0xff] }
 0x532   : > { %v3863_v27 = vadd.f32 %v3791_v43, %v3669_v50  ;;  %v7445_v2 = vpop.f32.mrf.mxu2  ;;  %v3424_v4 = vpop.f32.mrf.mxu3 }
 0x534   : > { %v3899_v56 = vadd.f32 %v7324_v45, %v3863_v27  ;;  %3838 = vmatmul.f32.gmra.mxu1 %v7180_v19 }
 0x536   : > { %v3931_v37 = vmax.f32 %v3899_v56, 0.0  ;;  %v3618_v43 = vpop.f32.mrf.mxu0  ;;  %v3480_v56 = vadd.f32 %v3418_v17, %v3285_v53 }
 0x538   : > { %4023 = vmatmul.f32.gmra.mxu2 %v3931_v37  ;;  %v3674_v6 = vadd.f32 %v3612_v54, %v3480_v56  ;;  %v3093_v54 = vadd.f32 %v7954_v33, %v7040_v26  ;;  %v7956_v26 = vld [vmem:[#allocation49_spill] sm:$0xff] }
 0x539   : > { %v3794_v47 = vpop.f32.mrf.mxu1 }
 0x53a   : > { %v3864_v52 = vadd.f32 %v3794_v47, %v3670_v39  ;;  %v7452_v10 = vpop.f32.mrf.mxu2  ;;  %v3427_v36 = vpop.f32.mrf.mxu3  ;;  %v3481_v47 = vadd.f32 %v3421_v35, %v3286_v18 }
 0x53c   : > { %v3900_v40 = vadd.f32 %v7324_v45, %v3864_v52  ;;  %3841 = vmatmul.f32.gmra.mxu1 %v7195_v3  ;;  %v3675_v31 = vadd.f32 %v3615_v14, %v3481_v47 }
 0x53e   : > { %v3932_v19 = vmax.f32 %v3900_v40, 0.0  ;;  %v3621_v32 = vpop.f32.mrf.mxu0 }
 0x540   : > { %4026 = vmatmul.f32.gmra.mxu2 %v3932_v19  ;;  %v3287_v19 = vadd.f32 %v7330_v16, %v3093_v54  ;;  %v7961_v54 = vld [vmem:[#allocation41_spill] sm:$0xff] }
 0x541   : > { %v3797_v61 = vpop.f32.mrf.mxu1 }
 0x542   : > { %v3865_v12 = vadd.f32 %v3797_v61, %v3671_v30  ;;  %v3430_v7 = vpop.f32.mrf.mxu3  ;;  %v3482_v61 = vadd.f32 %v3424_v4, %v3287_v19 }
 0x544   : > { %v3901_v9 = vadd.f32 %v7324_v45, %v3865_v12  ;;  %3844 = vmatmul.f32.gmra.mxu1 %v3719_v38  ;;  %v3676_v14 = vadd.f32 %v3618_v43, %v3482_v61 }
 0x546   : > { %v3933_v3 = vmax.f32 %v3901_v9, 0.0  ;;  %v3624_v30 = vpop.f32.mrf.mxu0  ;;  %v7955_v9 = vld [vmem:[#allocation37_spill] sm:$0xff] }
 0x548   : > { %4029 = vmatmul.f32.gmra.mxu2 %v3933_v3  ;;  %v3094_v3 = vadd.f32 %v7956_v26, %v7955_v9  ;;  %v7963_v26 = vld [vmem:[#allocation25_spill] sm:$0xff] }
 0x549   : > { %v3800_v57 = vpop.f32.mrf.mxu1 }
 0x54a   : > { %v3866_v25 = vadd.f32 %v3800_v57, %v3672_v49  ;;  %v3433_v60 = vpop.f32.mrf.mxu3  ;;  %v3288_v16 = vadd.f32 %v7342_v21, %v3094_v3  ;;  %v7964_v3 = vld [vmem:[#allocation11_spill] sm:$0xff] }
 0x54c   : > { %v3902_v20 = vadd.f32 %v7324_v45, %v3866_v25  ;;  %3847 = vmatmul.f32.gmra.mxu1 %v3720_v22  ;;  %v3483_v4 = vadd.f32 %v3427_v36, %v3288_v16 }
 0x54e   : > { %v3934_v50 = vmax.f32 %v3902_v20, 0.0  ;;  %v3627_v25 = vpop.f32.mrf.mxu0  ;;  %v7957_v20 = vld [vmem:[#allocation50_spill] sm:$0xff]  ;;  %v3677_v43 = vadd.f32 %v3621_v32, %v3483_v4 }
 0x550   : > { %4032 = vmatmul.f32.gmra.mxu2 %v3934_v50  ;;  %v7958_v50 = vld [vmem:[#allocation10_spill] sm:$0xff] }
 0x551   : > { %v3803_v59 = vpop.f32.mrf.mxu1  ;;  %v3095_v42 = vadd.f32 %v7958_v50, %v7957_v20  ;;  %v7965_v50 = vld [vmem:[#allocation39_spill] sm:$0xff] }
 0x552   : > { %v3867_v27 = vadd.f32 %v3803_v59, %v3673_v44  ;;  %v3436_v44 = vpop.f32.mrf.mxu3 }
 0x553   : > { %v3289_v21 = vadd.f32 %v7353_v1, %v3095_v42  ;;  %v7966_v42 = vld [vmem:[#allocation48_spill] sm:$0xff] }
 0x554   : > { %v3903_v13 = vadd.f32 %v7324_v45, %v3867_v27 }
 0x555   : > { %v3484_v36 = vadd.f32 %v3430_v7, %v3289_v21 }
 0x556   : > { %v3935_v37 = vmax.f32 %v3903_v13, 0.0  ;;  %v3630_v63 = vpop.f32.mrf.mxu0 }
 0x557   : > { %v3678_v32 = vadd.f32 %v3624_v30, %v3484_v36 }
 0x558   : > { %4035 = vmatmul.f32.gmra.mxu2 %v3935_v37 }
 0x559   : > { %v3806_v55 = vpop.f32.mrf.mxu1 }
 0x55a   : > { %v3868_v39 = vadd.f32 %v3806_v55, %v3674_v6  ;;  %v7959_v6 = vld [vmem:[#allocation28_spill] sm:$0xff]  ;;  %v7960_v55 = vld [vmem:[#allocation38_spill] sm:$0xff]  ;;  %v3439_v47 = vpop.f32.mrf.mxu3 }
 0x55b   : > { %v3988_v17 = vpop.f32.mrf.mxu2  ;;  %v3096_v18 = vadd.f32 %v7960_v55, %v7959_v6  ;;  %v7968_v6 = vld [vmem:[#allocation42_spill] sm:$0xff] }
 0x55c   : > { %v3904_v62 = vadd.f32 %v7324_v45, %v3868_v39  ;;  %v3989_v24 = vadd.f32 %v7458_v5, %v3988_v17 }
 0x55d   : > { %v3290_v1 = vadd.f32 %v7363_v51, %v3096_v18 }
 0x55e   : > { %v3936_v52 = vmax.f32 %v3904_v62, 0.0  ;;  %4085 = vst.msk [vmem:[%s7464_s9] sm:$0xff] %vm4084_vm3, %v3989_v24 }
 0x55f   : > { %v3485_v24 = vadd.f32 %v3433_v60, %v3290_v1 }
 0x560   : > { %4038 = vmatmul.f32.gmra.mxu2 %v3936_v52 }
 0x561   : > { %v3809_v40 = vpop.f32.mrf.mxu1  ;;  %v3679_v19 = vadd.f32 %v3627_v25, %v3485_v24 }
 0x562   : > { %v3869_v15 = vadd.f32 %v3809_v40, %v3675_v31  ;;  %v7962_v31 = vld [vmem:[#allocation51_spill] sm:$0xff]  ;;  %v3442_v60 = vpop.f32.mrf.mxu3 }
 0x563   : > { %v3991_v35 = vpop.f32.mrf.mxu2  ;;  %v3097_v40 = vadd.f32 %v7962_v31, %v7961_v54  ;;  %v7970_v54 = vld [vmem:[#allocation47_spill] sm:$0xff] }
 0x564   : > { %v3905_v38 = vadd.f32 %v7324_v45, %v3869_v15  ;;  %v3992_v58 = vadd.f32 %v7458_v5, %v3991_v35  ;;  %v3633_v15 = vpop.f32.mrf.mxu0 }
 0x565   : > { %v3291_v51 = vadd.f32 %v7374_v0, %v3097_v40 }
 0x566   : > { %v3937_v12 = vmax.f32 %v3905_v38, 0.0  ;;  %4086 = vst.msk [vmem:[%s7464_s9 + $0x8] sm:$0xff] %vm4084_vm3, %v3992_v58 }
 0x567   : > { %v3486_v38 = vadd.f32 %v3436_v44, %v3291_v51 }
 0x568   : > { %4041 = vmatmul.f32.gmra.mxu2 %v3937_v12 }
 0x569   : > { %v3812_v29 = vpop.f32.mrf.mxu1 }
 0x56a   : > { %v3870_v49 = vadd.f32 %v3812_v29, %v3676_v14  ;;  %v3098_v14 = vadd.f32 %v7964_v3, %v7963_v26  ;;  %v3680_v29 = vadd.f32 %v3630_v63, %v3486_v38  ;;  %v3445_v20 = vpop.f32.mrf.mxu3  ;;  %v7967_v63 = vld [vmem:[#allocation46_spill] sm:$0xff] }
 0x56b   : > { %v3994_v57 = vpop.f32.mrf.mxu2  ;;  %v3100_v55 = vadd.f32 %v7968_v6, %v7967_v63 }
 0x56c   : > { %v3906_v22 = vadd.f32 %v7324_v45, %v3870_v49  ;;  %v3995_v28 = vadd.f32 %v7458_v5, %v3994_v57  ;;  %v3292_v0 = vadd.f32 %v7388_v8, %v3098_v14  ;;  %v3636_v57 = vpop.f32.mrf.mxu0 }
 0x56e   : > { %v3938_v34 = vmax.f32 %v3906_v22, 0.0  ;;  %4087 = vst.msk [vmem:[%s7464_s9 + $0x10] sm:$0xff] %vm4084_vm3, %v3995_v28  ;;  %v3487_v22 = vadd.f32 %v3439_v47, %v3292_v0 }
 0x570   : > { %4044 = vmatmul.f32.gmra.mxu2 %v3938_v34  ;;  %v3681_v44 = vadd.f32 %v3633_v15, %v3487_v22 }
 0x571   : > { %v3815_v59 = vpop.f32.mrf.mxu1 }
 0x572   : > { %v3871_v53 = vadd.f32 %v3815_v59, %v3677_v43  ;;  %v3099_v43 = vadd.f32 %v7966_v42, %v7965_v50 }
 0x573   : > { %v3997_v27 = vpop.f32.mrf.mxu2 }
 0x574   : > { %v3907_v56 = vadd.f32 %v7324_v45, %v3871_v53  ;;  %v3998_v13 = vadd.f32 %v7458_v5, %v3997_v27  ;;  %v3293_v8 = vadd.f32 %v7399_v11, %v3099_v43  ;;  %v3294_v11 = vadd.f32 %v7409_v41, %v3100_v55 }
 0x576   : > { %v3939_v37 = vmax.f32 %v3907_v56, 0.0  ;;  %4088 = vst.msk [vmem:[%s7464_s9 + $0x18] sm:$0xff] %vm4084_vm3, %v3998_v13  ;;  %v3488_v27 = vadd.f32 %v3442_v60, %v3293_v8  ;;  %v3639_v13 = vpop.f32.mrf.mxu0  ;;  %v3489_v47 = vadd.f32 %v3445_v20, %v3294_v11  ;;  %v7972_v60 = vld [vmem:[#allocation53_spill] sm:$0xff] }
 0x578   : > { %4047 = vmatmul.f32.gmra.mxu2 %v3939_v37  ;;  %v3682_v18 = vadd.f32 %v3636_v57, %v3488_v27  ;;  %v3683_v40 = vadd.f32 %v3639_v13, %v3489_v47  ;;  %v7978_v47 = vld [vmem:[#allocation18_spill] sm:$0xff] }
 0x579   : > { %v3818_v39 = vpop.f32.mrf.mxu1 }
 0x57a   : > { %v3872_v17 = vadd.f32 %v3818_v39, %v3678_v32  ;;  %v3448_v32 = vpop.f32.mrf.mxu3 }
 0x57b   : > { %v4000_v62 = vpop.f32.mrf.mxu2 }
 0x57c   : > { %v3908_v7 = vadd.f32 %v7324_v45, %v3872_v17  ;;  %v4001_v52 = vadd.f32 %v7458_v5, %v4000_v62 }
 0x57e   : > { %v3940_v33 = vmax.f32 %v3908_v7, 0.0  ;;  %4089 = vst.msk [vmem:[%s7464_s9 + $0x20] sm:$0xff] %vm4084_vm3, %v4001_v52  ;;  %v3642_v52 = vpop.f32.mrf.mxu0 }
 0x580   : > { %4050 = vmatmul.f32.gmra.mxu2 %v3940_v33  ;;  %v7969_v33 = vld [vmem:[#allocation40_spill] sm:$0xff] }
 0x581   : > { %v3821_v30 = vpop.f32.mrf.mxu1  ;;  %v3101_v31 = vadd.f32 %v7970_v54, %v7969_v33 }
 0x582   : > { %v3873_v35 = vadd.f32 %v3821_v30, %v3679_v19  ;;  %v3451_v30 = vpop.f32.mrf.mxu3 }
 0x583   : > { %v4003_v61 = vpop.f32.mrf.mxu2  ;;  %v3295_v41 = vadd.f32 %v7419_v23, %v3101_v31 }
 0x584   : > { %v3909_v58 = vadd.f32 %v7324_v45, %v3873_v35  ;;  %v4004_v12 = vadd.f32 %v7458_v5, %v4003_v61 }
 0x585   : > { %v3490_v35 = vadd.f32 %v3448_v32, %v3295_v41 }
 0x586   : > { %v3941_v9 = vmax.f32 %v3909_v58, 0.0  ;;  %4090 = vst.msk [vmem:[%s7464_s9 + $0x28] sm:$0xff] %vm4084_vm3, %v4004_v12  ;;  %v7971_v12 = vld [vmem:[#allocation8_spill] sm:$0xff]  ;;  %v3645_v3 = vpop.f32.mrf.mxu0 }
 0x587   : > { %v3684_v26 = vadd.f32 %v3642_v52, %v3490_v35 }
 0x588   : > { %4053 = vmatmul.f32.gmra.mxu2 %v3941_v9  ;;  %v3102_v9 = vadd.f32 %v7972_v60, %v7971_v12 }
 0x589   : > { %v3824_v16 = vpop.f32.mrf.mxu1 }
 0x58a   : > { %v3874_v49 = vadd.f32 %v3824_v16, %v3680_v29  ;;  %v3296_v23 = vadd.f32 %v7427_v48, %v3102_v9 }
 0x58b   : > { %v4006_v4 = vpop.f32.mrf.mxu2 }
 0x58c   : > { %v3910_v28 = vadd.f32 %v7324_v45, %v3874_v49  ;;  %v4007_v25 = vadd.f32 %v7458_v5, %v4006_v4  ;;  %v3491_v0 = vadd.f32 %v3451_v30, %v3296_v23  ;;  %v3454_v4 = vpop.f32.mrf.mxu3 }
 0x58e   : > { %v3942_v34 = vmax.f32 %v3910_v28, 0.0  ;;  %4091 = vst.msk [vmem:[%s7464_s9 + $0x30] sm:$0xff] %vm4084_vm3, %v4007_v25  ;;  %v7973_v28 = vld [vmem:[#allocation32_spill] sm:$0xff]  ;;  %v7974_v25 = vld [vmem:[#allocation17_spill] sm:$0xff]  ;;  %v3685_v20 = vadd.f32 %v3645_v3, %v3491_v0  ;;  %v3648_v43 = vpop.f32.mrf.mxu0 }
 0x590   : > { %4056 = vmatmul.f32.gmra.mxu2 %v3942_v34  ;;  %v3103_v34 = vadd.f32 %v7974_v25, %v7973_v28 }
 0x591   : > { %v3827_v59 = vpop.f32.mrf.mxu1 }
 0x592   : > { %v3875_v21 = vadd.f32 %v3827_v59, %v3681_v44  ;;  %v3297_v48 = vadd.f32 %v7437_v46, %v3103_v34 }
 0x593   : > { %v4009_v53 = vpop.f32.mrf.mxu2 }
 0x594   : > { %v3911_v36 = vadd.f32 %v7324_v45, %v3875_v21  ;;  %v4010_v56 = vadd.f32 %v7458_v5, %v4009_v53  ;;  %v3492_v59 = vadd.f32 %v3454_v4, %v3297_v48  ;;  %v3457_v27 = vpop.f32.mrf.mxu3 }
 0x596   : > { %v3943_v37 = vmax.f32 %v3911_v36, 0.0  ;;  %4092 = vst.msk [vmem:[%s7464_s9 + $0x38] sm:$0xff] %vm4084_vm3, %v4010_v56  ;;  %v7975_v36 = vld [vmem:[#allocation44_spill] sm:$0xff]  ;;  %v7976_v56 = vld [vmem:[#allocation21_spill] sm:$0xff]  ;;  %v3651_v55 = vpop.f32.mrf.mxu0 }
 0x597   : > { %v3104_v13 = vadd.f32 %v7976_v56, %v7975_v36 }
 0x598   : > { %4059 = vmatmul.f32.gmra.mxu2 %v3943_v37  ;;  %v3686_v37 = vadd.f32 %v3648_v43, %v3492_v59 }
 0x599   : > { %v3830_v39 = vpop.f32.mrf.mxu1  ;;  %v3298_v46 = vadd.f32 %v7445_v2, %v3104_v13 }
 0x59a   : > { %v3876_v1 = vadd.f32 %v3830_v39, %v3682_v18 }
 0x59b   : > { %v4012_v17 = vpop.f32.mrf.mxu2  ;;  %v3493_v32 = vadd.f32 %v3457_v27, %v3298_v46 }
 0x59c   : > { %v3912_v62 = vadd.f32 %v7324_v45, %v3876_v1  ;;  %v4013_v24 = vadd.f32 %v7458_v5, %v4012_v17  ;;  %v7977_v17 = vld [vmem:[#allocation9_spill] sm:$0xff] }
 0x59e   : > { %v3944_v7 = vmax.f32 %v3912_v62, 0.0  ;;  %4093 = vst.msk [vmem:[%s7464_s9 + $0x40] sm:$0xff] %vm4084_vm3, %v4013_v24  ;;  %v3105_v62 = vadd.f32 %v7978_v47, %v7977_v17  ;;  %v3687_v24 = vadd.f32 %v3651_v55, %v3493_v32  ;;  %v3654_v41 = vpop.f32.mrf.mxu0 }
 0x5a0   : > { %4062 = vmatmul.f32.gmra.mxu2 %v3944_v7  ;;  %v3460_v7 = vpop.f32.mrf.mxu3  ;;  %v3299_v2 = vadd.f32 %v7452_v10, %v3105_v62 }
 0x5a1   : > { %v3833_v19 = vpop.f32.mrf.mxu1 }
 0x5a2   : > { %v3877_v15 = vadd.f32 %v3833_v19, %v3683_v40  ;;  %v3494_v31 = vadd.f32 %v3460_v7, %v3299_v2 }
 0x5a3   : > { %v4015_v51 = vpop.f32.mrf.mxu2 }
 0x5a4   : > { %v3913_v61 = vadd.f32 %v7324_v45, %v3877_v15  ;;  %v4016_v38 = vadd.f32 %v7458_v5, %v4015_v51  ;;  %v3688_v30 = vadd.f32 %v3654_v41, %v3494_v31 }
 0x5a6   : > { %v3945_v58 = vmax.f32 %v3913_v61, 0.0  ;;  %4094 = vst.msk [vmem:[%s7464_s9 + $0x48] sm:$0xff] %vm4084_vm3, %v4016_v38 }
 0x5a8   : > { %4065 = vmatmul.f32.gmra.mxu2 %v3945_v58 }
 0x5a9   : > { %v3836_v14 = vpop.f32.mrf.mxu1 }
 0x5aa   : > { %v3878_v29 = vadd.f32 %v3836_v14, %v3684_v26 }
 0x5ab   : > { %v4018_v16 = vpop.f32.mrf.mxu2 }
 0x5ac   : > { %v3914_v49 = vadd.f32 %v7324_v45, %v3878_v29  ;;  %v4019_v57 = vadd.f32 %v7458_v5, %v4018_v16 }
 0x5ae   : > { %v3946_v22 = vmax.f32 %v3914_v49, 0.0  ;;  %4095 = vst.msk [vmem:[%s7464_s9 + $0x50] sm:$0xff] %vm4084_vm3, %v4019_v57 }
 0x5b0   : > { %4068 = vmatmul.f32.gmra.mxu2 %v3946_v22 }
 0x5b1   : > { %v3839_v50 = vpop.f32.mrf.mxu1 }
 0x5b2   : > { %v3879_v42 = vadd.f32 %v3839_v50, %v3685_v20 }
 0x5b3   : > { %v4021_v44 = vpop.f32.mrf.mxu2 }
 0x5b4   : > { %v3915_v8 = vadd.f32 %v7324_v45, %v3879_v42  ;;  %v4022_v21 = vadd.f32 %v7458_v5, %v4021_v44 }
 0x5b6   : > { %v3947_v53 = vmax.f32 %v3915_v8, 0.0  ;;  %4096 = vst.msk [vmem:[%s7464_s9 + $0x58] sm:$0xff] %vm4084_vm3, %v4022_v21 }
 0x5b8   : > { %4071 = vmatmul.f32.gmra.mxu2 %v3947_v53 }
 0x5b9   : > { %v3842_v63 = vpop.f32.mrf.mxu1 }
 0x5ba   : > { %v3880_v6 = vadd.f32 %v3842_v63, %v3686_v37 }
 0x5bb   : > { %v4024_v18 = vpop.f32.mrf.mxu2 }
 0x5bc   : > { %v3916_v39 = vadd.f32 %v7324_v45, %v3880_v6  ;;  %v4025_v11 = vadd.f32 %v7458_v5, %v4024_v18 }
 0x5be   : > { %v3948_v1 = vmax.f32 %v3916_v39, 0.0  ;;  %4097 = vst.msk [vmem:[%s7464_s9 + $0x60] sm:$0xff] %vm4084_vm3, %v4025_v11 }
 0x5c0   : > { %4074 = vmatmul.f32.gmra.mxu2 %v3948_v1 }
 0x5c1   : > { %v3845_v52 = vpop.f32.mrf.mxu1 }
 0x5c2   : > { %v3881_v33 = vadd.f32 %v3845_v52, %v3687_v24 }
 0x5c3   : > { %v4027_v54 = vpop.f32.mrf.mxu2 }
 0x5c4   : > { %v3917_v40 = vadd.f32 %v7324_v45, %v3881_v33  ;;  %v4028_v19 = vadd.f32 %v7458_v5, %v4027_v54 }
 0x5c6   : > { %v3949_v15 = vmax.f32 %v3917_v40, 0.0  ;;  %4098 = vst.msk [vmem:[%s7464_s9 + $0x68] sm:$0xff] %vm4084_vm3, %v4028_v19 }
 0x5c8   : > { %4077 = vmatmul.f32.gmra.mxu2 %v3949_v15 }
 0x5c9   : > { %v3848_v51 = vpop.f32.mrf.mxu1 }
 0x5ca   : > { %v3882_v35 = vadd.f32 %v3848_v51, %v3688_v30 }
 0x5cb   : > { %v4030_v10 = vpop.f32.mrf.mxu2 }
 0x5cc   : > { %v3918_v61 = vadd.f32 %v7324_v45, %v3882_v35  ;;  %v4031_v38 = vadd.f32 %v7458_v5, %v4030_v10 }
 0x5ce   : > { %v3950_v58 = vmax.f32 %v3918_v61, 0.0  ;;  %4099 = vst.msk [vmem:[%s7464_s9 + $0x70] sm:$0xff] %vm4084_vm3, %v4031_v38 }
 0x5d0   : > { %4080 = vmatmul.f32.gmra.mxu2 %v3950_v58 }
 0x5d3   : > { %v4033_v12 = vpop.f32.mrf.mxu2 }
 0x5d4   : > { %v4034_v60 = vadd.f32 %v7458_v5, %v4033_v12 }
 0x5d6   : > { %4100 = vst.msk [vmem:[%s7464_s9 + $0x78] sm:$0xff] %vm4084_vm3, %v4034_v60 }
 0x5db   : > { %v4036_v9 = vpop.f32.mrf.mxu2 }
 0x5dc   : > { %v4037_v26 = vadd.f32 %v7458_v5, %v4036_v9 }
 0x5de   : > { %4101 = vst.msk [vmem:[%s7464_s9 + $0x80] sm:$0xff] %vm4084_vm3, %v4037_v26 }
 0x5e3   : > { %v4039_v45 = vpop.f32.mrf.mxu2 }
 0x5e4   : > { %v4040_v3 = vadd.f32 %v7458_v5, %v4039_v45 }
 0x5e6   : > { %4102 = vst.msk [vmem:[%s7464_s9 + $0x88] sm:$0xff] %vm4084_vm3, %v4040_v3 }
 0x5eb   : > { %v4042_v14 = vpop.f32.mrf.mxu2 }
 0x5ec   : > { %v4043_v23 = vadd.f32 %v7458_v5, %v4042_v14 }
 0x5ee   : > { %4103 = vst.msk [vmem:[%s7464_s9 + $0x90] sm:$0xff] %vm4084_vm3, %v4043_v23 }
 0x5f3   : > { %v4045_v29 = vpop.f32.mrf.mxu2 }
 0x5f4   : > { %v4046_v16 = vadd.f32 %v7458_v5, %v4045_v29 }
 0x5f6   : > { %4104 = vst.msk [vmem:[%s7464_s9 + $0x98] sm:$0xff] %vm4084_vm3, %v4046_v16 }
 0x5fb   : > { %v4048_v0 = vpop.f32.mrf.mxu2 }
 0x5fc   : > { %v4049_v49 = vadd.f32 %v7458_v5, %v4048_v0 }
 0x5fe   : > { %4105 = vst.msk [vmem:[%s7464_s9 + $0xa0] sm:$0xff] %vm4084_vm3, %v4049_v49 }
 0x603   : > { %v4051_v57 = vpop.f32.mrf.mxu2 }
 0x604   : > { %v4052_v4 = vadd.f32 %v7458_v5, %v4051_v57 }
 0x606   : > { %4106 = vst.msk [vmem:[%s7464_s9 + $0xa8] sm:$0xff] %vm4084_vm3, %v4052_v4 }
 0x60b   : > { %v4054_v22 = vpop.f32.mrf.mxu2 }
 0x60c   : > { %v4055_v28 = vadd.f32 %v7458_v5, %v4054_v22 }
 0x60e   : > { %4107 = vst.msk [vmem:[%s7464_s9 + $0xb0] sm:$0xff] %vm4084_vm3, %v4055_v28 }
 0x613   : > { %v4057_v25 = vpop.f32.mrf.mxu2 }
 0x614   : > { %v4058_v34 = vadd.f32 %v7458_v5, %v4057_v25 }
 0x616   : > { %4108 = vst.msk [vmem:[%s7464_s9 + $0xb8] sm:$0xff] %vm4084_vm3, %v4058_v34 }
 0x61b   : > { %v4060_v20 = vpop.f32.mrf.mxu2 }
 0x61c   : > { %v4061_v50 = vadd.f32 %v7458_v5, %v4060_v20 }
 0x61e   : > { %4109 = vst.msk [vmem:[%s7464_s9 + $0xc0] sm:$0xff] %vm4084_vm3, %v4061_v50 }
 0x623   : > { %v4063_v48 = vpop.f32.mrf.mxu2 }
 0x624   : > { %v4064_v42 = vadd.f32 %v7458_v5, %v4063_v48 }
 0x626   : > { %4110 = vst.msk [vmem:[%s7464_s9 + $0xc8] sm:$0xff] %vm4084_vm3, %v4064_v42 }
 0x62b   : > { %v4066_v43 = vpop.f32.mrf.mxu2 }
 0x62c   : > { %v4067_v44 = vadd.f32 %v7458_v5, %v4066_v43 }
 0x62e   : > { %4111 = vst.msk [vmem:[%s7464_s9 + $0xd0] sm:$0xff] %vm4084_vm3, %v4067_v44 }
 0x633   : > { %v4069_v59 = vpop.f32.mrf.mxu2 }
 0x634   : > { %v4070_v8 = vadd.f32 %v7458_v5, %v4069_v59 }
 0x636   : > { %4112 = vst.msk [vmem:[%s7464_s9 + $0xd8] sm:$0xff] %vm4084_vm3, %v4070_v8 }
 0x63b   : > { %v4072_v21 = vpop.f32.mrf.mxu2 }
 0x63c   : > { %v4073_v53 = vadd.f32 %v7458_v5, %v4072_v21 }
 0x63e   : > { %4113 = vst.msk [vmem:[%s7464_s9 + $0xe0] sm:$0xff] %vm4084_vm3, %v4073_v53 }
 0x643   : > { %v4075_v27 = vpop.f32.mrf.mxu2 }
 0x644   : > { %v4076_v36 = vadd.f32 %v7458_v5, %v4075_v27 }
 0x646   : > { %4114 = vst.msk [vmem:[%s7464_s9 + $0xe8] sm:$0xff] %vm4084_vm3, %v4076_v36 }
 0x64b   : > { %v4078_v56 = vpop.f32.mrf.mxu2 }
 0x64c   : > { %v4079_v13 = vadd.f32 %v7458_v5, %v4078_v56 }
 0x64e   : > { %4115 = vst.msk [vmem:[%s7464_s9 + $0xf0] sm:$0xff] %vm4084_vm3, %v4079_v13 }
 0x653   : > { %v4081_v37 = vpop.f32.mrf.mxu2 }
 0x654   : > { %v4082_v63 = vadd.f32 %v7458_v5, %v4081_v37 }
 0x656   : > { %4116 = vst.msk [vmem:[%s7464_s9 + $0xf8] sm:$0xff] %vm4084_vm3, %v4082_v63 }
 0x657 PF: > { %s19_s26 = sadd.s32 1, %s4639_s26  }
 0x658   : > { %p16_p4 = scmp.ge.s32.totalorder %s19_s26, 4  }
 0x65a   :  { %18 = sbr.rel (!%p16_p4) target bundleno = 3 (0x3), region = 96 }

</bundles_post_ra>
